<compile_context>
chip_gen: v5e
topology: v5e:2x2
jax: 0.10.0
libtpu: 0.0.40
codegen_flags: <defaults>
</compile_context>

<pallas_src>
import math

import jax
import jax.numpy as jnp
import numpy as np
from jax.experimental import pallas as pl
from jax.experimental.pallas import tpu as pltpu

L_FREQ = 4                                    # number of sin/cos frequency bands
FREQS = tuple(float((2.0 ** k) * math.pi) for k in range(L_FREQ))
ENC_DIM = 3 + 2 * 3 * L_FREQ                  # 27


def offset_net_kernel(xT_ref, c1_ref, w1e_ref, w2T_ref, b2_ref, w3T_ref, b3_ref,
                      o_ref):
    """One (vertex-tile, batch) grid step in transposed (feature x row) layout.

    xT_ref  : (3, T)    vertex positions for this tile (rows on lanes)
    c1_ref  : (H, 1)    per-batch hoisted term  params[b] @ W1_params + b1
    w1e_ref : (H, 27)   W1^T encoding columns, reordered [x(3) | sin(12) | cos(12)]
    w2T_ref : (H, H)    W2^T
    b2_ref  : (H, 1)    b2
    w3T_ref : (Do, H)   W3^T
    b3_ref  : (Do, 1)   b3
    o_ref   : (Do, T)   per-vertex offsets (lane-dense stores)
    """
    xT = xT_ref[...]                                           # (3, T) f32

    # Packed frequency slab: rows [f0*x; f1*x; f2*x; f3*x] -> single sin / cos.
    fx = jnp.concatenate([f * xT for f in FREQS], axis=0)      # (12, T)
    sin_fx = jnp.sin(fx)                                       # (12, T)
    cos_fx = jnp.cos(fx)                                       # (12, T)

    # --- layer 1: three slice matmuls against the resident reordered W1^T ---
    w1e = w1e_ref[...]                                         # (H, 27)
    h = jnp.dot(w1e[:, 0:3], xT, preferred_element_type=jnp.float32)
    h = h + jnp.dot(w1e[:, 3:3 + 3 * L_FREQ], sin_fx,
                    preferred_element_type=jnp.float32)
    h = h + jnp.dot(w1e[:, 3 + 3 * L_FREQ:ENC_DIM], cos_fx,
                    preferred_element_type=jnp.float32)
    h = h + c1_ref[...]                 # per-batch conditioning + b1, (H, 1) bcast
    h = jnp.maximum(h, 0.0)

    # --- layer 2 ---
    h = jnp.dot(w2T_ref[...], h, preferred_element_type=jnp.float32) + b2_ref[...]
    h = jnp.maximum(h, 0.0)

    # --- layer 3 (output) ---
    out = jnp.dot(w3T_ref[...], h, preferred_element_type=jnp.float32) + b3_ref[...]
    o_ref[...] = out.astype(o_ref.dtype)


def non_rigid_offset_net(x, params, weights, *, max_tile=8192):
    """x: (1 or B, V, 3) f32, params: (B, P) f32 -> offsets (B, V, Do) f32."""
    w1, b1, w2, b2, w3, b3 = weights
    B, P = params.shape
    Bx, V, _ = x.shape
    H = w1.shape[1]
    Do = w3.shape[1]

    # --- host-side weight prep (once, tiny) -------------------------------
    w1f = w1.astype(jnp.float32)
    # Reorder W1's encoding rows so [x | all-sin | all-cos] groups are
    # contiguous -> three slice matmuls in the kernel instead of nine.
    w1_x = w1f[0:3]
    w1_sin = jnp.concatenate(
        [w1f[3 + 6 * k: 6 + 6 * k] for k in range(L_FREQ)], axis=0)
    w1_cos = jnp.concatenate(
        [w1f[6 + 6 * k: 9 + 6 * k] for k in range(L_FREQ)], axis=0)
    w1e = jnp.concatenate([w1_x, w1_sin, w1_cos], axis=0).T        # (H, 27)
    # Per-batch conditioning hoisted out of the grid.
    c1 = (params.astype(jnp.float32) @ w1f[ENC_DIM:]
          + b1.astype(jnp.float32).reshape(1, -1))                 # (B, H)
    c1 = c1[:, :, None]                                            # (B, H, 1)
    w2T = w2.astype(jnp.float32).T                                 # (H, H)
    w3T = w3.astype(jnp.float32).T                                 # (Do, H)
    b2c = b2.astype(jnp.float32).reshape(-1)[:, None]              # (H, 1)
    b3c = b3.astype(jnp.float32).reshape(-1)[:, None]              # (Do, 1)

    # Rows-on-lanes input (no padding; Pallas masks the ragged last block).
    xT = jnp.swapaxes(x.astype(jnp.float32), 1, 2)                 # (Bx, 3, V)

    # --- vertex tile: as large as possible (per-step footprint is tiny) ----
    v128 = pl.cdiv(V, 128) * 128
    tile = min(int(max_tile), v128)
    if B == 1 and v128 >= 256:
        # keep >= 2 parallel grid steps so both v7x TensorCores get work
        tile = min(tile, pl.cdiv(v128 // 2, 128) * 128)
    tile = max((tile // 128) * 128, 128)
    n_vtiles = pl.cdiv(V, tile)

    if Bx == 1:
        x_map = lambda j, b: (0, 0, j)      # shared geometry: block idx constant
    else:                                   # across the (innermost) batch axis
        x_map = lambda j, b: (b, 0, j)      # per-batch geometry

    out = pl.pallas_call(
        offset_net_kernel,
        out_shape=jax.ShapeDtypeStruct((B, Do, V), jnp.float32),
        grid_spec=pltpu.PrefetchScalarGridSpec(
            num_scalar_prefetch=0,
            grid=(n_vtiles, B),             # batch innermost -> x^T reuse
            in_specs=[
                pl.BlockSpec((None, 3, tile), x_map),                 # x^T tile
                pl.BlockSpec((None, H, 1), lambda j, b: (b, 0, 0)),   # c1[b]
                pl.BlockSpec((H, ENC_DIM), lambda j, b: (0, 0)),      # W1^T enc
                pl.BlockSpec((H, H), lambda j, b: (0, 0)),            # W2^T
                pl.BlockSpec((H, 1), lambda j, b: (0, 0)),            # b2
                pl.BlockSpec((Do, H), lambda j, b: (0, 0)),           # W3^T
                pl.BlockSpec((Do, 1), lambda j, b: (0, 0)),           # b3
            ],
            out_specs=pl.BlockSpec((None, Do, tile), lambda j, b: (b, 0, j)),
        ),
        compiler_params=pltpu.CompilerParams(
            dimension_semantics=("parallel", "parallel")),
    )(xT, c1, w1e, w2T, b2c, w3T, b3c)

    return jnp.swapaxes(out, 1, 2)          # (B, V, Do) to match module output


def reference_forward(x, params, weights):
    """Pure-JAX reference mirroring the PyTorch forward exactly."""
    w1, b1, w2, b2, w3, b3 = weights
    B, P = params.shape
    V = x.shape[1]
    x_b = jnp.broadcast_to(x, (B, V, 3)).reshape(-1, 3)
    p_b = jnp.broadcast_to(params[:, None, :], (B, V, P)).reshape(-1, P)
    parts = [x_b]
    for f in FREQS:
        parts.append(jnp.sin(f * x_b))
        parts.append(jnp.cos(f * x_b))
    enc = jnp.concatenate(parts, axis=-1)
    feat = jnp.concatenate([enc, p_b], axis=-1)
    h = jnp.maximum(feat @ w1 + b1, 0.0)
    h = jnp.maximum(h @ w2 + b2, 0.0)
    out = h @ w3 + b3
    return out.reshape(B, V, -1)


def make_weights(key, in_dim, hidden, out_dim):
    ks = jax.random.split(key, 6)

    def lin(kw, kb, fan_in, fan_out):
        s = 1.0 / math.sqrt(fan_in)
        w = jax.random.uniform(kw, (fan_in, fan_out), jnp.float32, -s, s)
        b = jax.random.uniform(kb, (1, fan_out), jnp.float32, -s, s)
        return w, b

    w1, b1 = lin(ks[0], ks[1], in_dim, hidden)
    w2, b2 = lin(ks[2], ks[3], hidden, hidden)
    w3, b3 = lin(ks[4], ks[5], hidden, out_dim)
    return (w1, b1, w2, b2, w3, b3)


if __name__ == "__main__":
    key = jax.random.PRNGKey(0)
    k_x, k_p, k_w = jax.random.split(key, 3)

    batch = 2
    num_verts = 1000                          # non-multiple of 128: ragged tile
    params_dim = 8
    hidden = 32
    in_dim = ENC_DIM + params_dim             # 35

    x = jax.random.uniform(k_x, (1, num_verts, 3), jnp.float32, -1.0, 1.0)
    params = jax.random.normal(k_p, (batch, params_dim), jnp.float32)
    weights = make_weights(k_w, in_dim, hidden, 3)

    fwd = jax.jit(lambda xx, pp: non_rigid_offset_net(xx, pp, weights))
    out = jax.block_until_ready(fwd(x, params))

    ref = reference_forward(x, params, weights)
    assert out.shape == (batch, num_verts, 3)
    assert np.allclose(np.asarray(out), np.asarray(ref), atol=5e-3, rtol=5e-3)

    print("KERNEL_OK")
</pallas_src>

<mosaic_0001>
module attributes {stable_mosaic.version = 11 : i64} {
  func.func @offset_net_kernel(%arg0: i32, %arg1: i32, %arg2: memref<1x3x1024xf32, #tpu.memory_space<vmem>>, %arg3: memref<1x32x1xf32, #tpu.memory_space<vmem>>, %arg4: memref<32x27xf32, #tpu.memory_space<vmem>>, %arg5: memref<32x32xf32, #tpu.memory_space<vmem>>, %arg6: memref<32x1xf32, #tpu.memory_space<vmem>>, %arg7: memref<3x32xf32, #tpu.memory_space<vmem>>, %arg8: memref<3x1xf32, #tpu.memory_space<vmem>>, %arg9: memref<1x3x1024xf32, #tpu.memory_space<vmem>>) attributes {dimension_semantics = [#tpu.dimension_semantics<parallel>, #tpu.dimension_semantics<parallel>], iteration_bounds = array<i64: 1, 2>, scalar_prefetch = 0 : i64, scratch_operands = 0 : i64, tpu.core_type = #tpu.core_type<tc>, window_params = [{transform_indices = @transform_0, window_bounds = array<i64: 1, 3, 1024>}, {transform_indices = @transform_1, window_bounds = array<i64: 1, 32, 1>}, {pipeline_mode = #tpu.pipeline_mode<synchronous>, transform_indices = @transform_2, window_bounds = array<i64: 32, 27>}, {pipeline_mode = #tpu.pipeline_mode<synchronous>, transform_indices = @transform_3, window_bounds = array<i64: 32, 32>}, {pipeline_mode = #tpu.pipeline_mode<synchronous>, transform_indices = @transform_4, window_bounds = array<i64: 32, 1>}, {pipeline_mode = #tpu.pipeline_mode<synchronous>, transform_indices = @transform_5, window_bounds = array<i64: 3, 32>}, {pipeline_mode = #tpu.pipeline_mode<synchronous>, transform_indices = @transform_6, window_bounds = array<i64: 3, 1>}, {transform_indices = @transform_7, window_bounds = array<i64: 1, 3, 1024>}]} {
    %c0 = arith.constant 0 : index
    %c0_0 = arith.constant 0 : index
    %c0_1 = arith.constant 0 : index
    %0 = vector.load %arg2[%c0, %c0_0, %c0_1] : memref<1x3x1024xf32, #tpu.memory_space<vmem>>, vector<1x3x1024xf32>
    %1 = vector.shape_cast %0 : vector<1x3x1024xf32> to vector<3x1024xf32>
    %cst = arith.constant 3.14159274 : f32
    %2 = vector.broadcast %cst : f32 to vector<3x1024xf32>
    %3 = arith.mulf %2, %1 : vector<3x1024xf32>
    %cst_2 = arith.constant 6.28318548 : f32
    %4 = vector.broadcast %cst_2 : f32 to vector<3x1024xf32>
    %5 = arith.mulf %4, %1 : vector<3x1024xf32>
    %cst_3 = arith.constant 12.566371 : f32
    %6 = vector.broadcast %cst_3 : f32 to vector<3x1024xf32>
    %7 = arith.mulf %6, %1 : vector<3x1024xf32>
    %cst_4 = arith.constant 25.1327419 : f32
    %8 = vector.broadcast %cst_4 : f32 to vector<3x1024xf32>
    %9 = arith.mulf %8, %1 : vector<3x1024xf32>
    %10 = tpu.concatenate %3, %5, %7, %9 in 0 : vector<3x1024xf32>, vector<3x1024xf32>, vector<3x1024xf32>, vector<3x1024xf32> -> vector<12x1024xf32>
    %11 = math.sin %10 : vector<12x1024xf32>
    %12 = math.cos %10 : vector<12x1024xf32>
    %c0_5 = arith.constant 0 : index
    %c0_6 = arith.constant 0 : index
    %13 = vector.load %arg4[%c0_5, %c0_6] : memref<32x27xf32, #tpu.memory_space<vmem>>, vector<32x27xf32>
    %14 = vector.extract_strided_slice %13 {offsets = [0, 0], sizes = [32, 3], strides = [1, 1]} : vector<32x27xf32> to vector<32x3xf32>
    %cst_7 = arith.constant dense<0.000000e+00> : vector<32x1024xf32>
    %15 = tpu.matmul %14, %1, %cst_7 {dimension_numbers = #tpu.dot_dimension_numbers<[1], [0], [0], [1], [0, 0, 1, 1], [], []>} : vector<32x3xf32>, vector<3x1024xf32>, vector<32x1024xf32> -> vector<32x1024xf32>
    %16 = vector.extract_strided_slice %13 {offsets = [0, 3], sizes = [32, 12], strides = [1, 1]} : vector<32x27xf32> to vector<32x12xf32>
    %cst_8 = arith.constant dense<0.000000e+00> : vector<32x1024xf32>
    %17 = tpu.matmul %16, %11, %cst_8 {dimension_numbers = #tpu.dot_dimension_numbers<[1], [0], [0], [1], [0, 0, 1, 1], [], []>} : vector<32x12xf32>, vector<12x1024xf32>, vector<32x1024xf32> -> vector<32x1024xf32>
    %18 = arith.addf %15, %17 : vector<32x1024xf32>
    %19 = vector.extract_strided_slice %13 {offsets = [0, 15], sizes = [32, 12], strides = [1, 1]} : vector<32x27xf32> to vector<32x12xf32>
    %cst_9 = arith.constant dense<0.000000e+00> : vector<32x1024xf32>
    %20 = tpu.matmul %19, %12, %cst_9 {dimension_numbers = #tpu.dot_dimension_numbers<[1], [0], [0], [1], [0, 0, 1, 1], [], []>} : vector<32x12xf32>, vector<12x1024xf32>, vector<32x1024xf32> -> vector<32x1024xf32>
    %21 = arith.addf %18, %20 : vector<32x1024xf32>
    %c0_10 = arith.constant 0 : index
    %c0_11 = arith.constant 0 : index
    %c0_12 = arith.constant 0 : index
    %22 = vector.load %arg3[%c0_10, %c0_11, %c0_12] : memref<1x32x1xf32, #tpu.memory_space<vmem>>, vector<1x32x1xf32>
    %23 = vector.shape_cast %22 : vector<1x32x1xf32> to vector<32x1xf32>
    %24 = vector.broadcast %23 : vector<32x1xf32> to vector<32x1024xf32>
    %25 = arith.addf %21, %24 : vector<32x1024xf32>
    %cst_13 = arith.constant 0.000000e+00 : f32
    %26 = vector.broadcast %cst_13 : f32 to vector<32x1024xf32>
    %27 = arith.maximumf %25, %26 : vector<32x1024xf32>
    %c0_14 = arith.constant 0 : index
    %c0_15 = arith.constant 0 : index
    %28 = vector.load %arg5[%c0_14, %c0_15] : memref<32x32xf32, #tpu.memory_space<vmem>>, vector<32x32xf32>
    %cst_16 = arith.constant dense<0.000000e+00> : vector<32x1024xf32>
    %29 = tpu.matmul %28, %27, %cst_16 {dimension_numbers = #tpu.dot_dimension_numbers<[1], [0], [0], [1], [0, 0, 1, 1], [], []>} : vector<32x32xf32>, vector<32x1024xf32>, vector<32x1024xf32> -> vector<32x1024xf32>
    %c0_17 = arith.constant 0 : index
    %c0_18 = arith.constant 0 : index
    %30 = vector.load %arg6[%c0_17, %c0_18] : memref<32x1xf32, #tpu.memory_space<vmem>>, vector<32x1xf32>
    %31 = vector.broadcast %30 : vector<32x1xf32> to vector<32x1024xf32>
    %32 = arith.addf %29, %31 : vector<32x1024xf32>
    %cst_19 = arith.constant 0.000000e+00 : f32
    %33 = vector.broadcast %cst_19 : f32 to vector<32x1024xf32>
    %34 = arith.maximumf %32, %33 : vector<32x1024xf32>
    %c0_20 = arith.constant 0 : index
    %c0_21 = arith.constant 0 : index
    %35 = vector.load %arg7[%c0_20, %c0_21] : memref<3x32xf32, #tpu.memory_space<vmem>>, vector<3x32xf32>
    %cst_22 = arith.constant dense<0.000000e+00> : vector<3x1024xf32>
    %36 = tpu.matmul %35, %34, %cst_22 {dimension_numbers = #tpu.dot_dimension_numbers<[1], [0], [0], [1], [0, 0, 1, 1], [], []>} : vector<3x32xf32>, vector<32x1024xf32>, vector<3x1024xf32> -> vector<3x1024xf32>
    %c0_23 = arith.constant 0 : index
    %c0_24 = arith.constant 0 : index
    %37 = vector.load %arg8[%c0_23, %c0_24] : memref<3x1xf32, #tpu.memory_space<vmem>>, vector<3x1xf32>
    %38 = vector.broadcast %37 : vector<3x1xf32> to vector<3x1024xf32>
    %39 = arith.addf %36, %38 : vector<3x1024xf32>
    %c0_25 = arith.constant 0 : index
    %c0_26 = arith.constant 0 : index
    %c0_27 = arith.constant 0 : index
    %40 = vector.load %arg9[%c0_25, %c0_26, %c0_27] : memref<1x3x1024xf32, #tpu.memory_space<vmem>>, vector<1x3x1024xf32>
    %41 = vector.shape_cast %40 : vector<1x3x1024xf32> to vector<3x1024xf32>
    %42 = vector.shape_cast %39 : vector<3x1024xf32> to vector<1x3x1024xf32>
    tpu.vector_store %arg9[%c0_25, %c0_26, %c0_27], %42 {strides = array<i32>} : memref<1x3x1024xf32, #tpu.memory_space<vmem>>, vector<1x3x1024xf32>,
    return
  }
  func.func @transform_0(%arg0: i32, %arg1: i32) -> (i32, i32, i32) {
    %c0_i32 = arith.constant 0 : i32
    %c0_i32_0 = arith.constant 0 : i32
    %c0_i32_1 = arith.constant 0 : i32
    return %c0_i32, %c0_i32_0, %arg0 : i32, i32, i32
  }
  func.func @transform_1(%arg0: i32, %arg1: i32) -> (i32, i32, i32) {
    %c0_i32 = arith.constant 0 : i32
    %c0_i32_0 = arith.constant 0 : i32
    %c0_i32_1 = arith.constant 0 : i32
    return %arg1, %c0_i32, %c0_i32_0 : i32, i32, i32
  }
  func.func @transform_2(%arg0: i32, %arg1: i32) -> (i32, i32) {
    %c0_i32 = arith.constant 0 : i32
    %c0_i32_0 = arith.constant 0 : i32
    %c0_i32_1 = arith.constant 0 : i32
    return %c0_i32, %c0_i32_0 : i32, i32
  }
  func.func @transform_3(%arg0: i32, %arg1: i32) -> (i32, i32) {
    %c0_i32 = arith.constant 0 : i32
    %c0_i32_0 = arith.constant 0 : i32
    %c0_i32_1 = arith.constant 0 : i32
    return %c0_i32, %c0_i32_0 : i32, i32
  }
  func.func @transform_4(%arg0: i32, %arg1: i32) -> (i32, i32) {
    %c0_i32 = arith.constant 0 : i32
    %c0_i32_0 = arith.constant 0 : i32
    %c0_i32_1 = arith.constant 0 : i32
    return %c0_i32, %c0_i32_0 : i32, i32
  }
  func.func @transform_5(%arg0: i32, %arg1: i32) -> (i32, i32) {
    %c0_i32 = arith.constant 0 : i32
    %c0_i32_0 = arith.constant 0 : i32
    %c0_i32_1 = arith.constant 0 : i32
    return %c0_i32, %c0_i32_0 : i32, i32
  }
  func.func @transform_6(%arg0: i32, %arg1: i32) -> (i32, i32) {
    %c0_i32 = arith.constant 0 : i32
    %c0_i32_0 = arith.constant 0 : i32
    %c0_i32_1 = arith.constant 0 : i32
    return %c0_i32, %c0_i32_0 : i32, i32
  }
  func.func @transform_7(%arg0: i32, %arg1: i32) -> (i32, i32, i32) {
    %c0_i32 = arith.constant 0 : i32
    %c0_i32_0 = arith.constant 0 : i32
    return %arg1, %c0_i32, %arg0 : i32, i32, i32
  }
}

</mosaic_0001>

<bundles_post_ra>
// kernel: _lambda_.1
= control target key start
LH: loop header
LB: loop body
LE: loop exit
PB: predicated region body
PF: predicated region fallthrough
CT: control target
= control target key end

     0   :  { %s7379_s24 = smov 0   ;;  %s7381_s25 = smov 0   ;;  %s10362_s0 = inlined_call_operand.vmem [shape: f32[1,3,1000], index: 0, kind: input, shape index: {}]   ;;  %s10363_s1 = inlined_call_operand.vmem [shape: f32[2,32,1], index: 1, kind: input, shape index: {}]   ;;  %s10364_s2 = inlined_call_operand.vmem [shape: f32[32,27], index: 2, kind: input, shape index: {}]   ;;  %s10365_s3 = inlined_call_operand.vmem [shape: f32[32,32], index: 3, kind: input, shape index: {}]   ;;  %s10366_s4 = inlined_call_operand.vmem [shape: f32[32,1], index: 4, kind: input, shape index: {}]   ;;  %s10367_s5 = inlined_call_operand.vmem [shape: f32[3,32], index: 5, kind: input, shape index: {}]   ;;  %s10368_s6 = inlined_call_operand.vmem [shape: f32[3,1], index: 6, kind: input, shape index: {}]   ;;  %s10369_s7 = inlined_call_operand.vmem [shape: f32[2,3,1000], index: 7, kind: output, shape index: {}]  }
   0x1   :  { %s7383_s26 = smov 0  }
   0x2 LB: > { %s26_s27 = sadd.s32 1, %s7324_s25  ;;  %p6997_p0 = scmp.ge.s32.totalorder %s7328_s26, 1  ;;  %s7328_s26 = sphi %s7383_s26, %s17_s26   ;;  %s7324_s25 = sphi %s7381_s25, %s10620_s25   ;;  %s7320_s24 = sphi %s7379_s24, %s10619_s24  }
   0x3   : > { %p27_p1 = scmp.ge.s32.totalorder %s26_s27, 2  ;;  %p262_p2 = scmp.lt.s32.totalorder %s7328_s26, 3 }
   0x5   : > { %s10622_s27 = smov (%p27_p1, %s26_s27), 0  ;;  %p263_p3 = pnand %p6997_p0, %p262_p2 }
   0x7   : > { %266 = sbr.rel (%p263_p3) target bundleno = 1326 (0x52e), region = 48 }
   0xc   : > { %v5447_v0 = vld [vmem:[%s10364_s2] sm:$0xff]  ;;  %v5449_v1 = vld [vmem:[%s10364_s2 + $0x10] sm:$0xff]  ;;  %s7330_s9 = smov 125   ;;  %v7411_v4 = vld [vmem:[%s10362_s0 + $0x8] sm:$0x77]  ;;  %v10393_v9 = vmov 0  }
   0xd   : > { %5455 = vrot.lane.b32.xlu0 %v5447_v0, %s7330_s9  ;;  %5459 = vrot.lane.b32.xlu1 %v5449_v1, %s7330_s9  ;;  %v324_v2 = vld [vmem:[%s10362_s0] sm:$0x77]  ;;  %v329_v5 = vmul.f32 3.1415927, %v7411_v4  ;;  %v5448_v6 = vld [vmem:[%s10364_s2 + $0x8] sm:$0xff]  ;;  %vm10374_vm0 = vcmask 1040384  }
   0xe   : > { %v328_v3 = vmul.f32 3.1415927, %v324_v2  ;;  %v5450_v7 = vld [vmem:[%s10364_s2 + $0x18] sm:$0xff]  ;;  %v332_v8 = vmul.f32 6.2831855, %v324_v2  ;;  %7297 = vset.pattern.permute.xlu1 %v10393_v9  ;;  %7296 = vset.pattern.permute.xlu0 %v10393_v9  ;;  %s7338_s28 = smov 113  }
   0xf   : > { %350 = vst [vmem:[#allocation1 + $0x10] ss:$2 sm:$0xff] %v329_v5  ;;  %7295 = vset.pattern.permute.xlu2 %v10393_v9  ;;  %v333_v12 = vmul.f32 6.2831855, %v7411_v4  ;;  %v336_v14 = vmul.f32 12.566371, %v324_v2 }
  0x10   : > { %348 = vst [vmem:[#allocation1] ss:$2 sm:$0xff] %v328_v3  ;;  %v337_v18 = vmul.f32 12.566371, %v7411_v4  ;;  %v340_v19 = vmul.f32 25.132742, %v324_v2 }
  0x11   : > { %v341_v24 = vmul.f32 25.132742, %v7411_v4  ;;  %v10400_v62 = vmov 683565275   ;;  %v10391_v0 = vmov 2475754826  }
  0x12   : > { %v10389_v5 = vmov 2102212464   ;;  %p309_p4 = scmp.lt.s32.totalorder %s7320_s24, 1 }
  0x14   : > { %s10624_s24 = smov (!%p309_p4, %s7320_s24), 1 }
  0x15   : > { %5457 = vrot.lane.b32.xlu0 %v5448_v6, %s7330_s9  ;;  %5461 = vrot.lane.b32.xlu1 %v5450_v7, %s7330_s9  ;;  %v10380_v7 = vmov 920167782   ;;  %s7260_s20 = sshll.u32 %s10624_s24, 5 }
  0x16   : > { %v7428_v13 = vld.sshfl [vmem:[#allocation1 + $0x10] sm:$0xff pattern:$0x75316420]  ;;  %v7430_v15 = vld.sshfl [vmem:[#allocation1 + $0x18] sm:$0xff pattern:$0x75316420]  ;;  %s9877_s23 = scalar_lea.vmem %s10363_s1, %s7260_s20  ;;  %s322_s9 = scalar_lea.vmem %s10369_s7, %s7260_s20 }
  0x17   : > { %v7422_v10 = vld.sshfl [vmem:[#allocation1] sm:$0xff pattern:$0x75316420]  ;;  %v7424_v11 = vld.sshfl [vmem:[#allocation1 + $0x8] sm:$0xff pattern:$0x75316420] }
  0x18   : > { %375 = vst [vmem:[#allocation1] ss:$2 sm:$0xff] %v332_v8 }
  0x19   : > { %377 = vst [vmem:[#allocation1 + $0x10] ss:$2 sm:$0xff] %v333_v12 }
  0x1f   : > { %v7432_v16 = vld.sshfl [vmem:[#allocation1] sm:$0xff pattern:$0x75316420]  ;;  %v7434_v17 = vld.sshfl [vmem:[#allocation1 + $0x8] sm:$0xff pattern:$0x75316420] }
  0x20   : > { %410 = vst [vmem:[#allocation1] ss:$2 sm:$0xff] %v336_v14  ;;  %v7437_v20 = vld.sshfl [vmem:[#allocation1 + $0x10] sm:$0xff pattern:$0x75316420] }
  0x21   : > { %v7439_v21 = vld.sshfl [vmem:[#allocation1 + $0x18] sm:$0xff pattern:$0x75316420] }
  0x22   : > { %412 = vst [vmem:[#allocation1 + $0x10] ss:$2 sm:$0xff] %v337_v18 }
  0x27   : > { %v7441_v22 = vld.sshfl [vmem:[#allocation1] sm:$0xff pattern:$0x75316420]  ;;  %v7443_v23 = vld.sshfl [vmem:[#allocation1 + $0x8] sm:$0xff pattern:$0x75316420] }
  0x28   : > { %445 = vst [vmem:[#allocation1] ss:$2 sm:$0xff] %v340_v19  ;;  %v425_v27 = vrot.slane %v7441_v22, 2  ;;  %v10371_v28 = vrot.slane %v7443_v23, 2 }
  0x29   : > { %v7446_v25 = vld.sshfl [vmem:[#allocation1 + $0x10] sm:$0xff pattern:$0x75316420]  ;;  %v7448_v26 = vld.sshfl [vmem:[#allocation1 + $0x18] sm:$0xff pattern:$0x75316420] }
  0x2a   : > { %447 = vst [vmem:[#allocation1 + $0x10] ss:$2 sm:$0xff] %v341_v24  ;;  %v10370_v42 = vrot.slane %v7446_v25, 2 }
  0x2f   : > { %v452_v29 = vld.sshfl [vmem:[#allocation1] sm:$0xff pattern:$0x75316420]  ;;  %v453_v30 = vld.sshfl [vmem:[#allocation1 + $0x8] sm:$0xff pattern:$0x75316420] }
  0x30   : > { %v460_v31 = vrot.slane %v452_v29, 7  ;;  %v461_v32 = vrot.slane %v453_v30, 7  ;;  %5733 = vst [vmem:[#allocation1] ss:$2 sm:$0xff] %v324_v2  ;;  %v10382_v2 = vmov 2131351028  }
  0x31   : > { %v454_v39 = vld.sshfl [vmem:[#allocation1 + $0x10] sm:$0xff pattern:$0x75316420] }
  0x32   : > { %v7455_v33 = vsel %vm10374_vm0, %v425_v27, %v460_v31  ;;  %v7460_v34 = vsel %vm10374_vm0, %v10371_v28, %v461_v32  ;;  %v462_v43 = vrot.slane %v454_v39, 7  ;;  %v10372_v31 = vmov 1326507024  }
  0x33   : > { %v1743_v35 = vand.u32 2147483647, %v7455_v33  ;;  %v1746_v36 = vand.u32 2139095040, %v7455_v33  ;;  %v1898_v37 = vand.u32 2147483647, %v7460_v34  ;;  %v1901_v38 = vand.u32 2139095040, %v7460_v34 }
  0x34   : > { %v7474_v50 = vsel %vm10374_vm0, %v10370_v42, %v462_v43 }
  0x35   : > { %v1747_v40 = vshrl.u32 %v1746_v36, 23  ;;  %v1750_v41 = vand.u32 8388607, %v1743_v35  ;;  %v1902_v44 = vshrl.u32 %v1901_v38, 23  ;;  %v1905_v45 = vand.u32 8388607, %v1898_v37 }
  0x36   : > { %v2056_v55 = vand.u32 2139095040, %v7474_v50 }
  0x37   : > { %v7026_v46 = vadd.s32 4294967169, %v1747_v40  ;;  %v1751_v47 = vor.u32 8388608, %v1750_v41  ;;  %v7029_v48 = vadd.s32 4294967169, %v1902_v44  ;;  %v1906_v51 = vor.u32 8388608, %v1905_v45 }
  0x38   : > { %v7491_v14 = vshrl.u32 %v2056_v55, 23 }
  0x39   : > { %v1753_v49 = vadd.s32 1, %v7026_v46  ;;  %v1908_v52 = vadd.s32 1, %v7029_v48  ;;  %v7476_v54 = vshll.u32 %v1751_v47, 8  ;;  %v7483_v60 = vshll.u32 %v1906_v51, 8 }
  0x3b   : > { %vm1754_vm1 = vcmp.gt.s32.totalorder %v1753_v49, 0  ;;  %vm1909_vm2 = vcmp.gt.s32.totalorder %v1908_v52, 0  ;;  %v1792_v12 = vand.u32 65535, %v7476_v54  ;;  %v1793_v29 = vshrl.u32 %v7476_v54, 16 }
  0x3c   : > { %v1755_v53 = vsel %vm1754_vm1, %v1753_v49, 0  ;;  %v1910_v57 = vsel %vm1909_vm2, %v1908_v52, 0 }
  0x3d   : > { %v1757_v56 = vand.u32 31, %v1755_v53  ;;  %v7479_v58 = vshrl.u32 %v1755_v53, 5  ;;  %v7481_v59 = vand.u32 31, %v1910_v57  ;;  %v7511_v47 = vshrl.u32 %v1910_v57, 5 }
  0x3f   : > { %v1758_v61 = vsub.s32 32, %v1757_v56  ;;  %v1760_v63 = vshll.u32 %v10400_v62, %v1757_v56  ;;  %v1763_v1 = vshll.u32 %v10391_v0, %v1757_v56  ;;  %v1766_v3 = vshll.u32 %v10382_v2, %v1757_v56 }
  0x40   : > { %v1769_v6 = vshll.u32 %v10389_v5, %v1757_v56  ;;  %v1772_v8 = vshll.u32 %v10380_v7, %v1757_v56  ;;  %vm1775_vm3 = vcmp.lt.s32.totalorder %v7479_v58, 1  ;;  %vm1778_vm4 = vcmp.lt.s32.totalorder %v7479_v58, 4 }
  0x41   : > { %v1761_v18 = vshrl.u32 %v10391_v0, %v1758_v61  ;;  %v1764_v19 = vshrl.u32 %v10382_v2, %v1758_v61  ;;  %v1767_v24 = vshrl.u32 %v10389_v5, %v1758_v61  ;;  %v1770_v30 = vshrl.u32 %v10380_v7, %v1758_v61 }
  0x42   : > { %v1773_v32 = vshrl.u32 %v10372_v31, %v1758_v61  ;;  %v7502_v40 = vsub.s32 32, %v7481_v59  ;;  %v1759_v41 = vshrl.u32 %v10400_v62, %v1758_v61  ;;  %vm1777_vm5 = vcmp.lt.s32.totalorder %v7479_v58, 3 }
  0x43   : > { %v1762_v36 = vor.u32 %v1761_v18, %v1760_v63  ;;  %v1765_v38 = vor.u32 %v1764_v19, %v1763_v1  ;;  %v1768_v39 = vor.u32 %v1767_v24, %v1766_v3  ;;  %v1771_v43 = vor.u32 %v1770_v30, %v1769_v6 }
  0x44   : > { %v1774_v44 = vor.u32 %v1773_v32, %v1772_v8  ;;  %vm1776_vm6 = vcmp.lt.s32.totalorder %v7479_v58, 2  ;;  %v1915_v51 = vshll.u32 %v10400_v62, %v7481_v59  ;;  %v1918_v52 = vshll.u32 %v10391_v0, %v7481_v59 }
  0x45   : > { %v1783_v45 = vsel %vm1775_vm3, %v1762_v36, %v1765_v38  ;;  %v1787_v46 = vsel %vm1775_vm3, %v1765_v38, %v1768_v39  ;;  %v1784_v48 = vsel %vm1778_vm4, %v1771_v43, 920167782  ;;  %v1780_v53 = vsel %vm1778_vm4, %v1768_v39, 2102212464 }
  0x46   : > { %v1788_v49 = vsel %vm1778_vm4, %v1774_v44, 1326507024  ;;  %v1785_v55 = vsel %vm1777_vm5, %v1768_v39, %v1784_v48  ;;  %v1916_v57 = vshrl.u32 %v10391_v0, %v7502_v40  ;;  %v1779_v61 = vsel %vm1775_vm3, %v1759_v41, %v1762_v36 }
  0x47   : > { %v1789_v56 = vsel %vm1777_vm5, %v1771_v43, %v1788_v49  ;;  %v1786_v63 = vsel %vm1776_vm6, %v1783_v45, %v1785_v55  ;;  %v1919_v3 = vshrl.u32 %v10382_v2, %v7502_v40  ;;  %v1781_v24 = vsel %vm1777_vm5, %v1765_v38, %v1780_v53 }
  0x48   : > { %v1790_v1 = vsel %vm1776_vm6, %v1787_v46, %v1789_v56  ;;  %v1816_v18 = vand.u32 65535, %v1786_v63  ;;  %v1817_v19 = vshrl.u32 %v1786_v63, 16  ;;  %v7539_v30 = vor.u32 %v1916_v57, %v1915_v51 }
  0x49   : > { %v1794_v6 = vand.u32 65535, %v1790_v1  ;;  %v1795_v8 = vshrl.u32 %v1790_v1, 16  ;;  %v7541_v32 = vor.u32 %v1919_v3, %v1918_v52  ;;  %v1921_v36 = vshll.u32 %v10382_v2, %v7481_v59 }
  0x4a   : > { %v1922_v44 = vshrl.u32 %v10389_v5, %v7502_v40  ;;  %v1818_v46 = vmul.u32 %v1816_v18, %v1792_v12  ;;  %v1819_v48 = vmul.u32 %v1817_v19, %v1792_v12  ;;  %v1820_v49 = vmul.u32 %v1816_v18, %v1793_v29 }
  0x4b   : > { %v1796_v39 = vmul.u32 %v1794_v6, %v1792_v12  ;;  %v1797_v41 = vmul.u32 %v1795_v8, %v1792_v12  ;;  %v1798_v43 = vmul.u32 %v1794_v6, %v1793_v29  ;;  %v1799_v45 = vmul.u32 %v1795_v8, %v1793_v29 }
  0x4c   : > { %v1821_v51 = vmul.u32 %v1817_v19, %v1793_v29  ;;  %v1822_v52 = vshll.u32 %v1819_v48, 16  ;;  %v1823_v57 = vshrl.u32 %v1819_v48, 16  ;;  %v1824_v63 = vshll.u32 %v1820_v49, 16 }
  0x4d   : > { %v1800_v55 = vshll.u32 %v1797_v41, 16  ;;  %v1801_v56 = vshrl.u32 %v1797_v41, 16  ;;  %v1802_v38 = vshll.u32 %v1798_v43, 16  ;;  %v1803_v53 = vshrl.u32 %v1798_v43, 16 }
  0x4e   : > { %v1825_v3 = vshrl.u32 %v1820_v49, 16  ;;  %v1924_v6 = vshll.u32 %v10389_v5, %v7481_v59  ;;  %vm1826_vm8 = vc.u32 %v1818_v46, %v1822_v52  ;;  %v1828_v8 = vadd.s32 %v1822_v52, %v1818_v46 }
  0x4f   : > { %vm1804_vm7 = vc.u32 %v1796_v39, %v1800_v55  ;;  %v1806_v1 = vadd.s32 %v1800_v55, %v1796_v39  ;;  %v1925_v12 = vshrl.u32 %v10380_v7, %v7502_v40  ;;  %v1827_v29 = vsel %vm1826_vm8, 1, %v10393_v9 }
  0x50   : > { %v1805_v42 = vsel %vm1804_vm7, 1, %v10393_v9  ;;  %v1927_v19 = vshll.u32 %v10380_v7, %v7481_v59  ;;  %v1829_v41 = vadd.s32 %v1827_v29, %v1821_v51  ;;  %vm1830_vm10 = vc.u32 %v1828_v8, %v1824_v63 }
  0x51   : > { %v1807_v18 = vadd.s32 %v1805_v42, %v1799_v45  ;;  %vm1808_vm9 = vc.u32 %v1806_v1, %v1802_v38  ;;  %v1923_v43 = vor.u32 %v1922_v44, %v1921_v36  ;;  %v1831_v49 = vsel %vm1830_vm10, 1, %v10393_v9 }
  0x52   : > { %v1809_v39 = vsel %vm1808_vm9, 1, %v10393_v9  ;;  %v1926_v55 = vor.u32 %v1925_v12, %v1924_v6  ;;  %v1928_v46 = vshrl.u32 %v10372_v31, %v7502_v40  ;;  %v7559_v52 = vadd.s32 %v1828_v8, %v1824_v63 }
  0x53   : > { %v1811_v48 = vadd.s32 %v1809_v39, %v1807_v18  ;;  %v1833_v42 = vadd.s32 %v1831_v49, %v1829_v41  ;;  %vm1930_vm11 = vcmp.lt.s32.totalorder %v7511_v47, 1  ;;  %vm1932_vm12 = vcmp.lt.s32.totalorder %v7511_v47, 3 }
  0x54   : > { %v1929_v45 = vor.u32 %v1928_v46, %v1927_v19  ;;  %vm1931_vm13 = vcmp.lt.s32.totalorder %v7511_v47, 2  ;;  %vm1933_vm14 = vcmp.lt.s32.totalorder %v7511_v47, 4  ;;  %v1782_v36 = vsel %vm1776_vm6, %v1779_v61, %v1781_v24 }
  0x55   : > { %v1812_v59 = vadd.s32 %v1811_v48, %v1801_v56  ;;  %v1834_v44 = vadd.s32 %v1833_v42, %v1823_v57  ;;  %v1938_v38 = vsel %vm1930_vm11, %v7539_v30, %v7541_v32  ;;  %v1939_v51 = vsel %vm1933_vm14, %v1926_v55, 920167782 }
  0x56   : > { %v1940_v56 = vsel %vm1932_vm12, %v1923_v43, %v1939_v51  ;;  %v1942_v1 = vsel %vm1930_vm11, %v7541_v32, %v1923_v43  ;;  %v1947_v58 = vand.u32 65535, %v7483_v60  ;;  %v1943_v57 = vsel %vm1933_vm14, %v1929_v45, 1326507024 }
  0x57   : > { %v7573_v63 = vadd.s32 %v1812_v59, %v1803_v53  ;;  %v1835_v61 = vadd.s32 %v1834_v44, %v1825_v3  ;;  %v1941_v24 = vsel %vm1931_vm13, %v1938_v38, %v1940_v56  ;;  %v1948_v6 = vshrl.u32 %v7483_v60, 16 }
  0x58   : > { %v1836_v53 = vmul.u32 %v7476_v54, %v1782_v36  ;;  %v1944_v8 = vsel %vm1932_vm12, %v1926_v55, %v1943_v57  ;;  %v1971_v12 = vand.u32 65535, %v1941_v24  ;;  %v1914_v3 = vshrl.u32 %v10400_v62, %v7502_v40 }
  0x59   : > { %vm1838_vm15 = vc.u32 %v7573_v63, %v7559_v52  ;;  %v1839_v18 = vadd.s32 1, %v1835_v61  ;;  %v1945_v29 = vsel %vm1931_vm13, %v1942_v1, %v1944_v8  ;;  %v1972_v19 = vshrl.u32 %v1941_v24, 16 }
  0x5a   : > { %v1949_v39 = vand.u32 65535, %v1945_v29  ;;  %v1950_v41 = vshrl.u32 %v1945_v29, 16  ;;  %v7032_v48 = vadd.s32 4294967169, %v7491_v14  ;;  %v1935_v49 = vsel %vm1933_vm14, %v1923_v43, 2102212464 }
  0x5b   : > { %v1840_v54 = vsel %vm1838_vm15, %v1839_v18, %v1835_v61  ;;  %v1974_v46 = vmul.u32 %v1972_v19, %v1947_v58  ;;  %v1975_v42 = vmul.u32 %v1971_v12, %v1948_v6  ;;  %v1973_v36 = vmul.u32 %v1971_v12, %v1947_v58 }
  0x5c   : > { %v1841_v55 = vadd.s32 %v1840_v54, %v1836_v53  ;;  %v1951_v59 = vmul.u32 %v1949_v39, %v1947_v58  ;;  %v1952_v45 = vmul.u32 %v1950_v41, %v1947_v58  ;;  %v1934_v40 = vsel %vm1930_vm11, %v1914_v3, %v7539_v30 }
  0x5d   : > { %v1953_v44 = vmul.u32 %v1949_v39, %v1948_v6  ;;  %v1977_v38 = vshll.u32 %v1974_v46, 16  ;;  %v1954_v56 = vmul.u32 %v1950_v41, %v1948_v6  ;;  %v2063_v14 = vadd.s32 1, %v7032_v48 }
  0x5e   : > { %v1842_v51 = vadd.s32 536870912, %v1841_v55  ;;  %v1955_v1 = vshll.u32 %v1952_v45, 16  ;;  %v1936_v43 = vsel %vm1932_vm12, %v7541_v32, %v1935_v49  ;;  %v1976_v24 = vmul.u32 %v1972_v19, %v1948_v6 }
  0x5f   : > { %v1957_v61 = vshll.u32 %v1953_v44, 16  ;;  %v1979_v57 = vshll.u32 %v1975_v42, 16  ;;  %vm1981_vm2 = vc.u32 %v1973_v36, %v1977_v38  ;;  %v1956_v8 = vshrl.u32 %v1952_v45, 16 }
  0x60   : > { %v7604_v53 = vshrl.u32 %v1842_v51, 30  ;;  %vm1959_vm1 = vc.u32 %v1951_v59, %v1955_v1  ;;  %v1961_v58 = vadd.s32 %v1955_v1, %v1951_v59  ;;  %v1982_v12 = vsel %vm1981_vm2, 1, %v10393_v9 }
  0x61   : > { %v1960_v30 = vsel %vm1959_vm1, 1, %v10393_v9  ;;  %v1983_v18 = vadd.s32 %v1977_v38, %v1973_v36  ;;  %vm2064_vm4 = vcmp.gt.s32.totalorder %v2063_v14, 0  ;;  %v1978_v6 = vshrl.u32 %v1974_v46, 16 }
  0x62   : > { %v1844_v3 = vshll.u32 %v7604_v53, 30  ;;  %v1962_v29 = vadd.s32 %v1960_v30, %v1954_v56  ;;  %vm1963_vm3 = vc.u32 %v1961_v58, %v1957_v61  ;;  %v1984_v19 = vadd.s32 %v1982_v12, %v1976_v24 }
  0x63   : > { %v1964_v32 = vsel %vm1963_vm3, 1, %v10393_v9  ;;  %vm1985_vm5 = vc.u32 %v1983_v18, %v1979_v57  ;;  %v1958_v41 = vshrl.u32 %v1953_v44, 16  ;;  %v1980_v49 = vshrl.u32 %v1975_v42, 16 }
  0x64   : > { %v1845_v39 = vsub.s32 %v1841_v55, %v1844_v3  ;;  %v1966_v48 = vadd.s32 %v1964_v32, %v1962_v29  ;;  %v1986_v54 = vsel %vm1985_vm5, 1, %v10393_v9  ;;  %v2053_v45 = vand.u32 2147483647, %v7474_v50 }
  0x65   : > { %v1988_v59 = vadd.s32 %v1986_v54, %v1984_v19  ;;  %v2065_v36 = vsel %vm2064_vm4, %v2063_v14, 0  ;;  %v7612_v56 = vadd.s32 %v1983_v18, %v1979_v57  ;;  %v1937_v46 = vsel %vm1931_vm13, %v1934_v40, %v1936_v43  ;;  %v7628_v43 = vld.sshfl [vmem:[#allocation1 + $0x18] sm:$0xff pattern:$0x75316420] }
  0x66   : > { %vm1846_vm6 = vcmp.lt.s32.totalorder %v1845_v39, 0  ;;  %v1847_v38 = vsub.s32 0, %v1845_v39  ;;  %v1967_v51 = vadd.s32 %v1966_v48, %v1956_v8  ;;  %v2067_v44 = vand.u32 31, %v2065_v36  ;;  %5735 = vst [vmem:[#allocation1 + $0x10] ss:$2 sm:$0xff] %v7411_v4 }
  0x67   : > { %v1989_v1 = vadd.s32 %v1988_v59, %v1978_v6  ;;  %v1991_v42 = vmul.u32 %v7483_v60, %v1937_v46  ;;  %v2060_v14 = vand.u32 8388607, %v2053_v45  ;;  %vm1745_vm8 = vcmp.lt.s32.totalorder %v7455_v33, 0 }
  0x68   : > { %v1848_v61 = vsel %vm1846_vm6, %v1847_v38, %v1845_v39  ;;  %v7616_v55 = vadd.s32 %v1967_v51, %v1958_v41  ;;  %v7623_v30 = vsub.s32 32, %v2067_v44  ;;  %v1837_v47 = vadd.s32 %v7559_v52, %v7573_v63 }
  0x69   : > { %v1849_v24 = vclz %v1848_v61  ;;  %v1990_v58 = vadd.s32 %v1989_v1, %v1980_v49  ;;  %vm7632_vm10 = vcmp.le.f32.partialorder %v1743_v35, 0.7853982  ;;  %v1867_v18 = vsub.s32 4, %v7604_v53 }
  0x6a   : > { %vm1993_vm7 = vc.u32 %v7616_v55, %v7612_v56  ;;  %v2061_v29 = vor.u32 8388608, %v2060_v14  ;;  %v7638_v63 = vshrl.u32 %v2065_v36, 5  ;;  %v2073_v41 = vshll.u32 %v10391_v0, %v2067_v44 }
  0x6b   : > { %v7027_v57 = vadd.s32 4294967294, %v1849_v24  ;;  %v1994_v8 = vadd.s32 1, %v1990_v58  ;;  %v2074_v35 = vshrl.u32 %v10382_v2, %v7623_v30  ;;  %v2076_v48 = vshll.u32 %v10382_v2, %v2067_v44 }
  0x6c   : > { %v2077_v59 = vshrl.u32 %v10389_v5, %v7623_v30  ;;  %v2079_v4 = vshll.u32 %v10389_v5, %v2067_v44  ;;  %v2082_v36 = vshll.u32 %v10380_v7, %v2067_v44  ;;  %v2083_v51 = vshrl.u32 %v10372_v31, %v7623_v30 }
  0x6d   : > { %vm7028_vm9 = vcmp.lt.s32.totalorder %v7027_v57, 0  ;;  %v1995_v40 = vsel %vm1993_vm7, %v1994_v8, %v1990_v58  ;;  %v1868_v61 = vsel %vm1745_vm8, %v1867_v18, %v7604_v53  ;;  %v7655_v24 = vshll.u32 %v2061_v29, 8 }
  0x6e   : > { %v1852_v12 = vsel %vm7028_vm9, 0, %v7027_v57  ;;  %v1996_v3 = vadd.s32 %v1995_v40, %v1991_v42  ;;  %v2070_v42 = vshll.u32 %v10400_v62, %v2067_v44  ;;  %v2071_v14 = vshrl.u32 %v10391_v0, %v7623_v30 }
  0x6f   : > { %v1853_v32 = vsub.s32 32, %v1852_v12  ;;  %v1854_v6 = vshll.u32 %v1845_v39, %v1852_v12  ;;  %v1857_v52 = vsub.s32 4294967266, %v1852_v12  ;;  %v2080_v39 = vshrl.u32 %v10380_v7, %v7623_v30 }
  0x70   : > { %v1997_v19 = vadd.s32 536870912, %v1996_v3  ;;  %v7660_v57 = vor.u32 %v2074_v35, %v2073_v41  ;;  %v2078_v40 = vor.u32 %v2077_v59, %v2076_v48  ;;  %vm1900_vm11 = vcmp.lt.s32.totalorder %v7460_v34, 0 }
  0x71   : > { %v1855_v54 = vshrl.u32 %v1837_v47, %v1853_v32  ;;  %v1858_v49 = vadd.s32 127, %v1857_v52  ;;  %v2081_v12 = vor.u32 %v2080_v39, %v2079_v4  ;;  %vm2085_vm12 = vcmp.lt.s32.totalorder %v7638_v63, 1 }
  0x72   : > { %v1998_v38 = vshrl.u32 %v1997_v19, 30  ;;  %v1870_v44 = vsel %vm7632_vm10, 0, %v1868_v61  ;;  %vm2088_vm13 = vcmp.lt.s32.totalorder %v7638_v63, 4  ;;  %v7670_v18 = vand.u32 65535, %v7655_v24 }
  0x73   : > { %v1856_v46 = vor.u32 %v1855_v54, %v1854_v6  ;;  %v1859_v1 = vshll.u32 %v1858_v49, 23  ;;  %v2084_v6 = vor.u32 %v2083_v51, %v2082_v36  ;;  %v2072_v52 = vor.u32 %v2071_v14, %v2070_v42 }
  0x74   : > { %v1999_v58 = vshll.u32 %v1998_v38, 30  ;;  %vm2087_vm15 = vcmp.lt.s32.totalorder %v7638_v63, 3  ;;  %vm2086_vm1 = vcmp.lt.s32.totalorder %v7638_v63, 2  ;;  %v2094_v19 = vsel %vm2088_vm13, %v2081_v12, 920167782 }
  0x75   : > { %v1860_v8 = vor.u32 4788187, %v1859_v1  ;;  %v1863_v47 = vcvt.s32.f32 %v1856_v46  ;;  %v2097_v41 = vsel %vm2085_vm12, %v7660_v57, %v2078_v40  ;;  %v1887_v35 = vadd.s32 3, %v1870_v44 }
  0x76   : > { %v7663_v32 = vsub.s32 %v1996_v3, %v1999_v58  ;;  %v2098_v54 = vsel %vm2088_vm13, %v2084_v6, 1326507024  ;;  %v7685_v49 = vshrl.u32 %v7655_v24, 16  ;;  %vm7689_vm2 = vcmp.le.f32.partialorder %v1898_v37, 0.7853982 }
  0x77   : > { %v1861_v53 = vand.u32 2147483647, %v1860_v8  ;;  %v2022_v36 = vsub.s32 4, %v1998_v38  ;;  %v2099_v51 = vsel %vm2087_vm15, %v2081_v12, %v2098_v54  ;;  %v1992_v46 = vadd.s32 %v7612_v56, %v7616_v55 }
  0x78   : > { %vm2001_vm14 = vcmp.lt.s32.totalorder %v7663_v32, 0  ;;  %v2002_v29 = vsub.s32 0, %v7663_v32  ;;  %v2093_v1 = vsel %vm2085_vm12, %v2072_v52, %v7660_v57  ;;  %v2095_v61 = vsel %vm2087_vm15, %v2078_v40, %v2094_v19 }
  0x79   : > { %v1864_v3 = vmul.f32 %v1863_v47, %v1861_v53  ;;  %v2100_v37 = vsel %vm2086_vm1, %v2097_v41, %v2099_v51  ;;  %v2069_v14 = vshrl.u32 %v10400_v62, %v7623_v30  ;;  %v7713_v55 = vand.u32 3, %v1887_v35 }
  0x7a   : > { %v2003_v48 = vsel %vm2001_vm14, %v2002_v29, %v7663_v32  ;;  %v2105_v8 = vshrl.u32 %v2100_v37, 16  ;;  %v7715_v47 = vand.u32 3, %v1870_v44  ;;  %v2104_v12 = vand.u32 65535, %v2100_v37 }
  0x7b   : > { %v1865_v59 = vxor.u32 2147483648, %v1864_v3  ;;  %v2004_v39 = vclz %v2003_v48  ;;  %v2023_v53 = vsel %vm1900_vm11, %v2022_v36, %v1998_v38  ;;  %v2096_v30 = vsel %vm2086_vm1, %v2093_v1, %v2095_v61 }
  0x7c   : > { %v2090_v60 = vsel %vm2088_vm13, %v2078_v40, 2102212464  ;;  %v2126_v44 = vand.u32 65535, %v2096_v30  ;;  %v7732_v40 = vmul.u32 %v2104_v12, %v7685_v49  ;;  %vm1893_vm4 = vcmp.eq.s32.totalorder %v7713_v55, 2 }
  0x7d   : > { %v1866_v58 = vsel %vm1745_vm8, %v1865_v59, %v1864_v3  ;;  %v7030_v42 = vadd.s32 4294967294, %v2004_v39  ;;  %v7726_v3 = vmul.u32 %v2105_v8, %v7670_v18  ;;  %v2106_v59 = vmul.u32 %v2104_v12, %v7670_v18 }
  0x7e   : > { %v7711_v56 = vsel %vm7632_vm10, %v7455_v33, %v1866_v58  ;;  %v2127_v39 = vshrl.u32 %v2096_v30, 16  ;;  %vm4364_vm5 = vcmp.eq.s32.totalorder %v7715_v47, 2  ;;  %v7742_v37 = vsel %vm2085_vm12, %v2069_v14, %v2072_v52 }
  0x7f   : > { %v1871_v6 = vmul.f32 %v7711_v56, %v7711_v56  ;;  %vm7031_vm3 = vcmp.lt.s32.totalorder %v7030_v42, 0  ;;  %v2110_v38 = vshll.u32 %v7726_v3, 16  ;;  %v2109_v30 = vmul.u32 %v2105_v8, %v7685_v49 }
  0x80   : > { %v2007_v29 = vsel %vm7031_vm3, 0, %v7030_v42  ;;  %vm1890_vm6 = vcmp.eq.s32.totalorder %v7713_v55, 0  ;;  %vm4361_vm7 = vcmp.eq.s32.totalorder %v7715_v47, 0  ;;  %v7754_v52 = vmul.u32 %v2127_v39, %v7670_v18 }
  0x81   : > { %v1872_v19 = vmul.f32 -0.001358992, %v1871_v6  ;;  %v1879_v41 = vmul.f32 -0.00019511016, %v1871_v6  ;;  %v2008_v35 = vsub.s32 32, %v2007_v29  ;;  %v2009_v48 = vshll.u32 %v7663_v32, %v2007_v29 }
  0x82   : > { %v2012_v54 = vsub.s32 4294967266, %v2007_v29  ;;  %v7738_v32 = vsel %vm7689_vm2, 0, %v2023_v53  ;;  %vm2114_vm8 = vc.u32 %v2106_v59, %v2110_v38  ;;  %v2128_v29 = vmul.u32 %v2126_v44, %v7670_v18 }
  0x83   : > { %v1873_v36 = vadd.f32 0.041655596, %v1872_v19  ;;  %v1880_v51 = vadd.f32 0.008332121, %v1879_v41  ;;  %v2010_v1 = vshrl.u32 %v1992_v46, %v2008_v35  ;;  %v7747_v46 = vsel %vm2087_vm15, %v7660_v57, %v2090_v60 }
  0x84   : > { %v2013_v61 = vadd.s32 127, %v2012_v54  ;;  %vm1889_vm9 = vcmp.lt.s32.totalorder %v7713_v55, 2  ;;  %vm4360_vm10 = vcmp.lt.s32.totalorder %v7715_v47, 2  ;;  %v2112_v57 = vshll.u32 %v7732_v40, 16 }
  0x85   : > { %v1874_v58 = vmul.f32 %v1873_v36, %v1871_v6  ;;  %v1881_v42 = vmul.f32 %v1880_v51, %v1871_v6  ;;  %v2011_v12 = vor.u32 %v2010_v1, %v2009_v48  ;;  %v2115_v8 = vsel %vm2114_vm8, 1, %v10393_v9 }
  0x86   : > { %v2014_v53 = vshll.u32 %v2013_v61, 23  ;;  %vm1886_vm12 = vweird.f32 %v7455_v33  ;;  %v2042_v35 = vadd.s32 3, %v7738_v32  ;;  %v2130_v48 = vmul.u32 %v2126_v44, %v7685_v49 }
  0x87   : > { %v1875_v14 = vadd.f32 -0.4999988, %v1874_v58  ;;  %v1882_v19 = vadd.f32 -0.16666654, %v1881_v42  ;;  %v2018_v41 = vcvt.s32.f32 %v2011_v12  ;;  %vm5472_vm13 = vcmask 1043456  }
  0x88   : > { %v2015_v60 = vor.u32 4788187, %v2014_v53  ;;  %v2116_v36 = vadd.s32 %v2110_v38, %v2106_v59  ;;  %v2117_v51 = vadd.s32 %v2115_v8, %v2109_v30  ;;  %v2111_v61 = vshrl.u32 %v7726_v3, 16 }
  0x89   : > { %v1876_v18 = vmul.f32 %v1875_v14, %v1871_v6  ;;  %v1883_v54 = vmul.f32 %v1882_v19, %v1871_v6  ;;  %v2131_v58 = vmul.u32 %v2127_v39, %v7685_v49  ;;  %v2132_v42 = vshll.u32 %v7754_v52, 16 }
  0x8a   : > { %v2016_v1 = vand.u32 2147483647, %v2015_v60  ;;  %v2113_v12 = vshrl.u32 %v7732_v40, 16  ;;  %vm2118_vm14 = vc.u32 %v2116_v36, %v2112_v57  ;;  %v2134_v14 = vshll.u32 %v2130_v48, 16 }
  0x8b   : > { %v1877_v28 = vadd.f32 1.0, %v1876_v18  ;;  %v1884_v31 = vadd.f32 1.0, %v1883_v54  ;;  %v2119_v44 = vsel %vm2118_vm14, 1, %v10393_v9  ;;  %vm2136_vm15 = vc.u32 %v2128_v29, %v2132_v42 }
  0x8c   : > { %v2019_v53 = vmul.f32 %v2018_v41, %v2016_v1  ;;  %v2121_v38 = vadd.s32 %v2119_v44, %v2117_v51  ;;  %v2137_v3 = vsel %vm2136_vm15, 1, %v10393_v9  ;;  %v2133_v49 = vshrl.u32 %v7754_v52, 16 }
  0x8d   : > { %v1885_v6 = vmul.f32 %v1884_v31, %v7711_v56  ;;  %v1894_v59 = vxor.u32 2147483648, %v1877_v28  ;;  %v2138_v39 = vadd.s32 %v2132_v42, %v2128_v29  ;;  %v2139_v19 = vadd.s32 %v2137_v3, %v2131_v58 }
  0x8e   : > { %v2020_v30 = vxor.u32 2147483648, %v2019_v53  ;;  %v428_v60 = vrot.slane %v7448_v26, 2  ;;  %v2122_v56 = vadd.s32 %v2121_v38, %v2111_v61  ;;  %v463_v41 = vrot.slane %v7628_v43, 7  ;;  %v8276_v26 = vld [vmem:[%s10362_s0 + $0x18] sm:$0x77] }
  0x8f   : > { %v1891_v8 = vxor.u32 2147483648, %v1885_v6  ;;  %v1895_v40 = vsel %vm1893_vm4, %v1894_v59, %v1885_v6  ;;  %v4366_v57 = vsel %vm4364_vm5, %v1894_v59, %v1885_v6  ;;  %vm2140_vm3 = vc.u32 %v2138_v39, %v2134_v14 }
  0x90   : > { %v2021_v31 = vsel %vm1900_vm11, %v2020_v30, %v2019_v53  ;;  %v2135_v54 = vshrl.u32 %v2130_v48, 16  ;;  %v2141_v43 = vsel %vm2140_vm3, 1, %v10393_v9  ;;  %v2142_v58 = vadd.s32 %v2138_v39, %v2134_v14 }
  0x91   : > { %v1892_v29 = vsel %vm1890_vm6, %v1877_v28, %v1891_v8  ;;  %v4363_v52 = vsel %vm4361_vm7, %v1877_v28, %v1891_v8  ;;  %v2024_v18 = vsel %vm7689_vm2, %v7460_v34, %v2021_v31  ;;  %v2143_v4 = vadd.s32 %v2141_v43, %v2139_v19 }
  0x92   : > { %v1896_v36 = vsel %vm1889_vm9, %v1892_v29, %v1895_v40  ;;  %v4367_v51 = vsel %vm4360_vm10, %v4363_v52, %v4366_v57  ;;  %v2026_v1 = vmul.f32 %v2024_v18, %v2024_v18  ;;  %v2123_v42 = vadd.s32 %v2122_v56, %v2113_v12 }
  0x93   : > { %v1897_v61 = vsel %vm1886_vm12, nan, %v1896_v36  ;;  %v7795_v28 = vsel %vm1886_vm12, nan, %v4367_v51  ;;  %v7801_v47 = vsel %vm10374_vm0, %v428_v60, %v463_v41  ;;  %v2092_v53 = vsel %vm2086_vm1, %v7742_v37, %v7747_v46 }
  0x94   : > { %10435 = vst [vmem:[#allocation2_spill] sm:$0xff] %v7795_v28  ;;  %7098 = vmatpush.msk.msra.mxu0 %vm5472_vm13, %v1897_v61  ;;  %v2027_v48 = vmul.f32 -0.001358992, %v2026_v1  ;;  %v2034_v55 = vmul.f32 -0.00019511016, %v2026_v1  ;;  %v2144_v33 = vadd.s32 %v2143_v4, %v2133_v49  ;;  %v2211_v44 = vand.u32 2139095040, %v7801_v47 }
  0x95   : > { %v2043_v59 = vand.u32 3, %v2042_v35  ;;  %v2146_v39 = vmul.u32 %v7655_v24, %v2092_v53  ;;  %vm2148_vm11 = vc.u32 %v2123_v42, %v2142_v58  ;;  %v2208_v8 = vand.u32 2147483647, %v7801_v47 }
  0x96   : > { %v2028_v14 = vadd.f32 0.041655596, %v2027_v48  ;;  %v2035_v6 = vadd.f32 0.008332121, %v2034_v55  ;;  %v2145_v38 = vadd.s32 %v2144_v33, %v2135_v54  ;;  %v2212_v3 = vshrl.u32 %v2211_v44, 23 }
  0x97   : > { %v390_v63 = vrot.slane %v7432_v16, 5  ;;  %vm476_vm1 = vcmask 1042432   ;;  %vm2041_vm2 = vweird.f32 %v7460_v34  ;;  %vm2044_vm4 = vcmp.lt.s32.totalorder %v2043_v59, 2 }
  0x98   : > { %v2029_v30 = vmul.f32 %v2028_v14, %v2026_v1  ;;  %v2036_v12 = vmul.f32 %v2035_v6, %v2026_v1  ;;  %v2149_v19 = vadd.s32 1, %v2145_v38  ;;  %v7035_v40 = vadd.s32 4294967169, %v2212_v3 }
  0x99   : > { %v4513_v35 = vand.u32 3, %v7738_v32  ;;  %vm2045_vm5 = vcmp.eq.s32.totalorder %v2043_v59, 0  ;;  %v2215_v41 = vand.u32 8388607, %v2208_v8  ;;  %v477_v16 = vsel %vm476_vm1, %v7422_v10, %v390_v63 }
  0x9a   : > { %v2030_v37 = vadd.f32 -0.4999988, %v2029_v30  ;;  %v2037_v46 = vadd.f32 -0.16666654, %v2036_v12  ;;  %v2150_v49 = vsel %vm2148_vm11, %v2149_v19, %v2145_v38  ;;  %v2218_v57 = vadd.s32 1, %v7035_v40 }
  0x9b   : > { %v2151_v24 = vadd.s32 %v2150_v49, %v2146_v39  ;;  %vm485_vm7 = vcmask 1045504   ;;  %vm2048_vm8 = vcmp.eq.s32.totalorder %v2043_v59, 2  ;;  %vm4514_vm9 = vcmp.lt.s32.totalorder %v4513_v35, 2 }
  0x9c   : > { %v2031_v31 = vmul.f32 %v2030_v37, %v2026_v1  ;;  %v2038_v56 = vmul.f32 %v2037_v46, %v2026_v1  ;;  %vm2219_vm6 = vcmp.gt.s32.totalorder %v2218_v57, 0  ;;  %vm4518_vm10 = vcmp.eq.s32.totalorder %v4513_v35, 2 }
  0x9d   : > { %v2152_v54 = vadd.s32 536870912, %v2151_v24  ;;  %v2220_v36 = vsel %vm2219_vm6, %v2218_v57, 0  ;;  %vm4515_vm12 = vcmp.eq.s32.totalorder %v4513_v35, 0  ;;  %v7817_v61 = vadd.s32 %v2142_v58, %v2123_v42 }
  0x9e   : > { %v2032_v29 = vadd.f32 1.0, %v2031_v31  ;;  %v2039_v52 = vadd.f32 1.0, %v2038_v56  ;;  %v2222_v32 = vand.u32 31, %v2220_v36  ;;  %v2216_v4 = vor.u32 8388608, %v2215_v41 }
  0x9f   : > { %v2153_v43 = vshrl.u32 %v2152_v54, 30  ;;  %v7822_v10 = vsel %vm485_vm7, %v477_v16, %v425_v27  ;;  %v7824_v14 = vshrl.u32 %v2220_v36, 5  ;;  %vm2055_vm14 = vcmp.lt.s32.totalorder %v7474_v50, 0 }
  0xa0   : > { %v2040_v51 = vmul.f32 %v2039_v52, %v2024_v18  ;;  %v2049_v1 = vxor.u32 2147483648, %v2032_v29  ;;  %v2223_v48 = vsub.s32 32, %v2222_v32  ;;  %10436 = vst [vmem:[#allocation3_spill] sm:$0xff] %v7822_v10  ;;  %v2228_v18 = vshll.u32 %v10391_v0, %v2222_v32 }
  0xa1   : > { %v2154_v44 = vshll.u32 %v2153_v43, 30  ;;  %v2231_v58 = vshll.u32 %v10382_v2, %v2222_v32  ;;  %v2225_v12 = vshll.u32 %v10400_v62, %v2222_v32  ;;  %v2234_v46 = vshll.u32 %v10389_v5, %v2222_v32 }
  0xa2   : > { %v2046_v55 = vxor.u32 2147483648, %v2040_v51  ;;  %v2050_v53 = vsel %vm2048_vm8, %v2049_v1, %v2040_v51  ;;  %v4520_v33 = vsel %vm4518_vm10, %v2049_v1, %v2040_v51  ;;  %v2229_v6 = vshrl.u32 %v10382_v2, %v2223_v48 }
  0xa3   : > { %v2155_v3 = vsub.s32 %v2151_v24, %v2154_v44  ;;  %v2232_v22 = vshrl.u32 %v10389_v5, %v2223_v48  ;;  %v2226_v39 = vshrl.u32 %v10391_v0, %v2223_v48  ;;  %v7844_v35 = vshll.u32 %v2216_v4, 8 }
  0xa4   : > { %v2047_v42 = vsel %vm2045_vm5, %v2032_v29, %v2046_v55  ;;  %v4517_v38 = vsel %vm4515_vm12, %v2032_v29, %v2046_v55  ;;  %v2230_v59 = vor.u32 %v2229_v6, %v2228_v18  ;;  %vm7848_vm3 = vcmp.le.f32.partialorder %v2053_v45, 0.7853982 }
  0xa5   : > { %v2051_v27 = vsel %vm2044_vm4, %v2047_v42, %v2050_v53  ;;  %v4521_v30 = vsel %vm4514_vm9, %v4517_v38, %v4520_v33  ;;  %vm2156_vm15 = vcmp.lt.s32.totalorder %v2155_v3, 0  ;;  %v2157_v63 = vsub.s32 0, %v2155_v3 }
  0xa6   : > { %v2052_v19 = vsel %vm2041_vm2, nan, %v2051_v27  ;;  %v7840_v40 = vsel %vm2041_vm2, nan, %v4521_v30  ;;  %v2233_v37 = vor.u32 %v2232_v22, %v2231_v58  ;;  %v2235_v34 = vshrl.u32 %v10380_v7, %v2223_v48 }
  0xa7   : > { %10437 = vst [vmem:[#allocation4_spill] sm:$0xff] %v7840_v40  ;;  %7103 = vmatpush.msk.msra.mxu1 %vm5472_vm13, %v2052_v19  ;;  %v2158_v57 = vsel %vm2156_vm15, %v2157_v63, %v2155_v3  ;;  %v2237_v31 = vshll.u32 %v10380_v7, %v2222_v32  ;;  %v10440_v56 = vmov 1326507024   ;;  %v2177_v16 = vsub.s32 4, %v2153_v43 }
  0xa8   : > { %v2238_v24 = vshrl.u32 %v10440_v56, %v2223_v48  ;;  %v2159_v41 = vclz %v2158_v57  ;;  %v2227_v29 = vor.u32 %v2226_v39, %v2225_v12  ;;  %vm2240_vm11 = vcmp.lt.s32.totalorder %v7824_v14, 1 }
  0xa9   : > { %v2236_v52 = vor.u32 %v2235_v34, %v2234_v46  ;;  %vm2242_vm2 = vcmp.lt.s32.totalorder %v7824_v14, 3  ;;  %vm2243_vm4 = vcmp.lt.s32.totalorder %v7824_v14, 4  ;;  %v2257_v36 = vand.u32 65535, %v7844_v35 }
  0xaa   : > { %v2239_v54 = vor.u32 %v2238_v24, %v2237_v31  ;;  %v7033_v45 = vadd.s32 4294967294, %v2159_v41  ;;  %v2258_v51 = vshrl.u32 %v7844_v35, 16  ;;  %v506_v32 = vand.u32 2139095040, %v7822_v10 }
  0xab   : > { %vm2241_vm5 = vcmp.lt.s32.totalorder %v7824_v14, 2  ;;  %v2249_v1 = vsel %vm2243_vm4, %v2236_v52, 920167782  ;;  %v2252_v4 = vsel %vm2240_vm11, %v2230_v59, %v2233_v37  ;;  %v2224_v53 = vshrl.u32 %v10400_v62, %v2223_v48 }
  0xac   : > { %v2253_v55 = vsel %vm2243_vm4, %v2239_v54, 1326507024  ;;  %vm7034_vm6 = vcmp.lt.s32.totalorder %v7033_v45, 0  ;;  %v2248_v33 = vsel %vm2240_vm11, %v2227_v29, %v2230_v59  ;;  %v2250_v44 = vsel %vm2242_vm2, %v2233_v37, %v2249_v1 }
  0xad   : > { %v2162_v18 = vsel %vm7034_vm6, 0, %v7033_v45  ;;  %v2178_v6 = vsel %vm2055_vm14, %v2177_v16, %v2153_v43  ;;  %v2245_v58 = vsel %vm2243_vm4, %v2233_v37, 2102212464  ;;  %v2254_v42 = vsel %vm2242_vm2, %v2236_v52, %v2253_v55 }
  0xae   : > { %v2163_v38 = vsub.s32 32, %v2162_v18  ;;  %v2164_v22 = vshll.u32 %v2155_v3, %v2162_v18  ;;  %v2167_v27 = vsub.s32 4294967266, %v2162_v18  ;;  %v2255_v48 = vsel %vm2241_vm5, %v2252_v4, %v2254_v42 }
  0xaf   : > { %v2251_v30 = vsel %vm2241_vm5, %v2248_v33, %v2250_v44  ;;  %v2259_v12 = vand.u32 65535, %v2255_v48  ;;  %v503_v39 = vand.u32 2147483647, %v7822_v10  ;;  %v507_v19 = vshrl.u32 %v506_v32, 23 }
  0xb0   : > { %v2165_v63 = vshrl.u32 %v7817_v61, %v2163_v38  ;;  %v2168_v43 = vadd.s32 127, %v2167_v27  ;;  %v7881_v37 = vsel %vm7848_vm3, 0, %v2178_v6  ;;  %v2260_v46 = vshrl.u32 %v2255_v48, 16 }
  0xb1   : > { %v2244_v3 = vsel %vm2240_vm11, %v2224_v53, %v2227_v29  ;;  %v2246_v57 = vsel %vm2242_vm2, %v2230_v59, %v2245_v58  ;;  %v2263_v34 = vmul.u32 %v2259_v12, %v2258_v51  ;;  %v2281_v31 = vand.u32 65535, %v2251_v30 }
  0xb2   : > { %v2166_v24 = vor.u32 %v2165_v63, %v2164_v22  ;;  %v2169_v41 = vshll.u32 %v2168_v43, 23  ;;  %v2262_v16 = vmul.u32 %v2260_v46, %v2257_v36  ;;  %v2282_v52 = vshrl.u32 %v2251_v30, 16 }
  0xb3   : > { %v2261_v54 = vmul.u32 %v2259_v12, %v2257_v36  ;;  %v7002_v61 = vadd.s32 4294967169, %v507_v19  ;;  %v2197_v1 = vadd.s32 3, %v7881_v37  ;;  %v7890_v4 = vand.u32 8388607, %v503_v39 }
  0xb4   : > { %v2170_v45 = vor.u32 4788187, %v2169_v41  ;;  %v2173_v32 = vcvt.s32.f32 %v2166_v24  ;;  %v7894_v29 = vsel %vm2241_vm5, %v2244_v3, %v2246_v57  ;;  %v2264_v59 = vmul.u32 %v2260_v46, %v2258_v51 }
  0xb5   : > { %v2265_v55 = vshll.u32 %v2262_v16, 16  ;;  %v2267_v53 = vshll.u32 %v2263_v34, 16  ;;  %v2283_v44 = vmul.u32 %v2281_v31, %v2257_v36  ;;  %v2284_v18 = vmul.u32 %v2282_v52, %v2257_v36 }
  0xb6   : > { %v2171_v33 = vand.u32 2147483647, %v2170_v45  ;;  %v2285_v6 = vmul.u32 %v2281_v31, %v2258_v51  ;;  %v2266_v58 = vshrl.u32 %v2262_v16, 16  ;;  %v513_v38 = vadd.s32 1, %v7002_v61 }
  0xb7   : > { %vm2269_vm8 = vc.u32 %v2261_v54, %v2265_v55  ;;  %v2271_v42 = vadd.s32 %v2265_v55, %v2261_v54  ;;  %v2286_v48 = vmul.u32 %v2282_v52, %v2258_v51  ;;  %v2287_v30 = vshll.u32 %v2284_v18, 16 }
  0xb8   : > { %v2174_v22 = vmul.f32 %v2173_v32, %v2171_v33  ;;  %v2270_v27 = vsel %vm2269_vm8, 1, %v10393_v9  ;;  %v2268_v12 = vshrl.u32 %v2263_v34, 16  ;;  %v2289_v19 = vshll.u32 %v2285_v6, 16 }
  0xb9   : > { %v2272_v14 = vadd.s32 %v2270_v27, %v2264_v59  ;;  %vm2273_vm9 = vc.u32 %v2271_v42, %v2267_v53  ;;  %vm2291_vm10 = vc.u32 %v2283_v44, %v2287_v30  ;;  %v2293_v46 = vadd.s32 %v2287_v30, %v2283_v44 }
  0xba   : > { %v2175_v63 = vxor.u32 2147483648, %v2174_v22  ;;  %v2274_v43 = vsel %vm2273_vm9, 1, %v10393_v9  ;;  %v2288_v3 = vshrl.u32 %v2284_v18, 16  ;;  %v2292_v57 = vsel %vm2291_vm10, 1, %v10393_v9 }
  0xbb   : > { %v2276_v36 = vadd.s32 %v2274_v43, %v2272_v14  ;;  %vm514_vm12 = vcmp.gt.s32.totalorder %v513_v38, 0  ;;  %v2294_v24 = vadd.s32 %v2292_v57, %v2286_v48  ;;  %vm2295_vm15 = vc.u32 %v2293_v46, %v2289_v19 }
  0xbc   : > { %v2176_v31 = vsel %vm2055_vm14, %v2175_v63, %v2174_v22  ;;  %v7901_v51 = vadd.s32 %v2293_v46, %v2289_v19  ;;  %v2296_v16 = vsel %vm2295_vm15, 1, %v10393_v9  ;;  %v515_v52 = vsel %vm514_vm12, %v513_v38, 0 }
  0xbd   : > { %v2179_v34 = vsel %vm7848_vm3, %v7474_v50, %v2176_v31  ;;  %v2277_v41 = vadd.s32 %v2276_v36, %v2266_v58  ;;  %v2290_v61 = vshrl.u32 %v2285_v6, 16  ;;  %v2298_v45 = vadd.s32 %v2296_v16, %v2294_v24 }
  0xbe   : > { %v2181_v54 = vmul.f32 %v2179_v34, %v2179_v34  ;;  %v517_v32 = vand.u32 31, %v515_v52  ;;  %v511_v55 = vor.u32 8388608, %v7890_v4  ;;  %v7912_v42 = vand.u32 3, %v2197_v1 }
  0xbf   : > { %v7907_v59 = vadd.s32 %v2277_v41, %v2268_v12  ;;  %v2299_v44 = vadd.s32 %v2298_v45, %v2288_v3  ;;  %v2301_v49 = vmul.u32 %v7844_v35, %v7894_v29  ;;  %v4667_v19 = vand.u32 3, %v7881_v37 }
  0xc0   : > { %v2182_v53 = vmul.f32 -0.001358992, %v2181_v54  ;;  %v2189_v33 = vmul.f32 -0.00019511016, %v2181_v54  ;;  %v7910_v18 = vsub.s32 32, %v517_v32  ;;  %v520_v6 = vshll.u32 %v10400_v62, %v517_v32 }
  0xc1   : > { %vm2303_vm14 = vc.u32 %v7907_v59, %v7901_v51  ;;  %v2300_v22 = vadd.s32 %v2299_v44, %v2290_v61  ;;  %v523_v4 = vshll.u32 %v10391_v0, %v517_v32  ;;  %v526_v48 = vshll.u32 %v10382_v2, %v517_v32 }
  0xc2   : > { %v2183_v58 = vadd.f32 0.041655596, %v2182_v53  ;;  %v2190_v38 = vadd.f32 0.008332121, %v2189_v33  ;;  %v521_v27 = vshrl.u32 %v10391_v0, %v7910_v18  ;;  %v524_v1 = vshrl.u32 %v10382_v2, %v7910_v18 }
  0xc3   : > { %v527_v35 = vshrl.u32 %v10389_v5, %v7910_v18  ;;  %v2304_v12 = vadd.s32 1, %v2300_v22  ;;  %v529_v14 = vshll.u32 %v10389_v5, %v517_v32  ;;  %vm2203_vm3 = vcmp.eq.s32.totalorder %v7912_v42, 2 }
  0xc4   : > { %v2184_v29 = vmul.f32 %v2183_v58, %v2181_v54  ;;  %v2191_v30 = vmul.f32 %v2190_v38, %v2181_v54  ;;  %v7930_v63 = vshrl.u32 %v515_v52, 5  ;;  %v530_v43 = vshrl.u32 %v10380_v7, %v7910_v18 }
  0xc5   : > { %vm2199_vm11 = vcmp.lt.s32.totalorder %v7912_v42, 2  ;;  %v2305_v3 = vsel %vm2303_vm14, %v2304_v12, %v2300_v22  ;;  %v7938_v57 = vor.u32 %v521_v27, %v520_v6  ;;  %vm2196_vm2 = vweird.f32 %v7474_v50 }
  0xc6   : > { %v2185_v46 = vadd.f32 -0.4999988, %v2184_v29  ;;  %v2192_v36 = vadd.f32 -0.16666654, %v2191_v30  ;;  %v2306_v31 = vadd.s32 %v2305_v3, %v2301_v49  ;;  %v531_v24 = vor.u32 %v530_v43, %v529_v14 }
  0xc7   : > { %v532_v37 = vshll.u32 %v10380_v7, %v517_v32  ;;  %v533_v41 = vshrl.u32 %v10440_v56, %v7910_v18  ;;  %v7944_v61 = vor.u32 %v524_v1, %v523_v4  ;;  %v7946_v45 = vor.u32 %v527_v35, %v526_v48 }
  0xc8   : > { %v2186_v16 = vmul.f32 %v2185_v46, %v2181_v54  ;;  %v2193_v52 = vmul.f32 %v2192_v36, %v2181_v54  ;;  %v2307_v53 = vadd.s32 536870912, %v2306_v31  ;;  %vm535_vm4 = vcmp.lt.s32.totalorder %v7930_v63, 1 }
  0xc9   : > { %vm537_vm5 = vcmp.lt.s32.totalorder %v7930_v63, 3  ;;  %vm538_vm6 = vcmp.lt.s32.totalorder %v7930_v63, 4  ;;  %vm4672_vm8 = vcmp.eq.s32.totalorder %v4667_v19, 2  ;;  %v7951_v32 = vshll.u32 %v511_v55, 8 }
  0xca   : > { %v2187_v33 = vadd.f32 1.0, %v2186_v16  ;;  %v2194_v44 = vadd.f32 1.0, %v2193_v52  ;;  %v7953_v49 = vshrl.u32 %v2307_v53, 30  ;;  %v534_v6 = vor.u32 %v533_v41, %v532_v37 }
  0xcb   : > { %vm536_vm9 = vcmp.lt.s32.totalorder %v7930_v63, 2  ;;  %v544_v54 = vsel %vm538_vm6, %v531_v24, 920167782  ;;  %v543_v22 = vsel %vm535_vm4, %v7938_v57, %v7944_v61  ;;  %vm2200_vm10 = vcmp.eq.s32.totalorder %v7912_v42, 0 }
  0xcc   : > { %v2195_v58 = vmul.f32 %v2194_v44, %v2179_v34  ;;  %v2204_v38 = vxor.u32 2147483648, %v2187_v33  ;;  %v545_v55 = vsel %vm537_vm5, %v7946_v45, %v544_v54  ;;  %vm4668_vm12 = vcmp.lt.s32.totalorder %v4667_v19, 2 }
  0xcd   : > { %vm4669_vm15 = vcmp.eq.s32.totalorder %v4667_v19, 0  ;;  %v2309_v4 = vshll.u32 %v7953_v49, 30  ;;  %v552_v48 = vand.u32 65535, %v7951_v32  ;;  %v546_v29 = vsel %vm536_vm9, %v543_v22, %v545_v55 }
  0xce   : > { %v2201_v27 = vxor.u32 2147483648, %v2195_v58  ;;  %v2205_v34 = vsel %vm2203_vm3, %v2204_v38, %v2195_v58  ;;  %v4674_v1 = vsel %vm4672_vm8, %v2204_v38, %v2195_v58  ;;  %v547_v30 = vsel %vm535_vm4, %v7944_v61, %v7946_v45 }
  0xcf   : > { %v2310_v35 = vsub.s32 %v2306_v31, %v2309_v4  ;;  %v548_v12 = vsel %vm538_vm6, %v534_v6, 1326507024  ;;  %v553_v36 = vshrl.u32 %v7951_v32, 16  ;;  %v576_v19 = vand.u32 65535, %v546_v29 }
  0xd0   : > { %v2202_v14 = vsel %vm2200_vm10, %v2187_v33, %v2201_v27  ;;  %v4671_v43 = vsel %vm4669_vm15, %v2187_v33, %v2201_v27  ;;  %v549_v46 = vsel %vm537_vm5, %v531_v24, %v548_v12  ;;  %v577_v24 = vshrl.u32 %v546_v29, 16 }
  0xd1   : > { %v2206_v3 = vsel %vm2199_vm11, %v2202_v14, %v2205_v34  ;;  %v4675_v31 = vsel %vm4668_vm12, %v4671_v43, %v4674_v1  ;;  %vm2311_vm14 = vcmp.lt.s32.totalorder %v2310_v35, 0  ;;  %v2312_v37 = vsub.s32 0, %v2310_v35 }
  0xd2   : > { %v2207_v41 = vsel %vm2196_vm2, nan, %v2206_v3  ;;  %v7989_v16 = vsel %vm2196_vm2, nan, %v4675_v31  ;;  %v550_v52 = vsel %vm536_vm9, %v547_v30, %v549_v46  ;;  %v7994_v6 = vmul.u32 %v577_v24, %v552_v48 }
  0xd3   : > { %10441 = vst [vmem:[#allocation5_spill] sm:$0xff] %v7989_v16  ;;  %7108 = vmatpush.msk.msra.mxu2 %vm5472_vm13, %v2207_v41  ;;  %v2313_v53 = vsel %vm2311_vm14, %v2312_v37, %v2310_v35  ;;  %v554_v42 = vand.u32 65535, %v550_v52  ;;  %v555_v33 = vshrl.u32 %v550_v52, 16  ;;  %v519_v54 = vshrl.u32 %v10400_v62, %v7910_v18 }
  0xd4   : > { %v2314_v44 = vclz %v2313_v53  ;;  %v391_v55 = vrot.slane %v7434_v17, 5  ;;  %vm2210_vm3 = vcmp.lt.s32.totalorder %v7801_v47, 0  ;;  %v2302_v4 = vadd.s32 %v7901_v51, %v7907_v59 }
  0xd5   : > { %v556_v58 = vmul.u32 %v554_v42, %v552_v48  ;;  %v557_v50 = vmul.u32 %v555_v33, %v552_v48  ;;  %v558_v38 = vmul.u32 %v554_v42, %v553_v36  ;;  %v559_v27 = vmul.u32 %v555_v33, %v553_v36 }
  0xd6   : > { %v7036_v22 = vadd.s32 4294967294, %v2314_v44  ;;  %v580_v1 = vmul.u32 %v576_v19, %v553_v36  ;;  %v578_v30 = vmul.u32 %v576_v19, %v552_v48  ;;  %v582_v12 = vshll.u32 %v7994_v6, 16 }
  0xd7   : > { %v560_v34 = vshll.u32 %v557_v50, 16  ;;  %v562_v29 = vshll.u32 %v558_v38, 16  ;;  %v539_v14 = vsel %vm535_vm4, %v519_v54, %v7938_v57  ;;  %vm8008_vm8 = vcmp.le.f32.partialorder %v2208_v8, 0.7853982 }
  0xd8   : > { %vm7037_vm11 = vcmp.lt.s32.totalorder %v7036_v22, 0  ;;  %v2332_v3 = vsub.s32 4, %v7953_v49  ;;  %v581_v37 = vmul.u32 %v577_v24, %v553_v36  ;;  %v584_v41 = vshll.u32 %v580_v1, 16 }
  0xd9   : > { %v2317_v18 = vsel %vm7037_vm11, 0, %v7036_v22  ;;  %vm564_vm2 = vc.u32 %v556_v58, %v560_v34  ;;  %v566_v17 = vadd.s32 %v560_v34, %v556_v58  ;;  %vm586_vm10 = vc.u32 %v578_v30, %v582_v12 }
  0xda   : > { %v2318_v51 = vsub.s32 32, %v2317_v18  ;;  %v2319_v59 = vshll.u32 %v2310_v35, %v2317_v18  ;;  %v2322_v46 = vsub.s32 4294967266, %v2317_v18  ;;  %v565_v48 = vsel %vm564_vm2, 1, %v10393_v9 }
  0xdb   : > { %v567_v31 = vadd.s32 %v565_v48, %v559_v27  ;;  %vm568_vm4 = vc.u32 %v566_v17, %v562_v29  ;;  %v561_v53 = vshrl.u32 %v557_v50, 16  ;;  %v587_v42 = vsel %vm586_vm10, 1, %v10393_v9 }
  0xdc   : > { %v2320_v52 = vshrl.u32 %v2302_v4, %v2318_v51  ;;  %v2323_v57 = vadd.s32 127, %v2322_v46  ;;  %v569_v8 = vsel %vm568_vm4, 1, %v10393_v9  ;;  %v588_v33 = vadd.s32 %v582_v12, %v578_v30 }
  0xdd   : > { %v540_v44 = vsel %vm538_vm6, %v7946_v45, 2102212464  ;;  %v571_v54 = vadd.s32 %v569_v8, %v567_v31  ;;  %v563_v58 = vshrl.u32 %v558_v38, 16  ;;  %v589_v36 = vadd.s32 %v587_v42, %v581_v37 }
  0xde   : > { %v2321_v19 = vor.u32 %v2320_v52, %v2319_v59  ;;  %v2324_v35 = vshll.u32 %v2323_v57, 23  ;;  %vm590_vm12 = vc.u32 %v588_v33, %v584_v41  ;;  %v478_v24 = vsel %vm476_vm1, %v7424_v11, %v391_v55 }
  0xdf   : > { %v2333_v4 = vsel %vm2210_vm3, %v2332_v3, %v7953_v49  ;;  %v583_v27 = vshrl.u32 %v7994_v6, 16  ;;  %v541_v34 = vsel %vm537_vm5, %v7944_v61, %v540_v44  ;;  %v572_v45 = vadd.s32 %v571_v54, %v561_v53 }
  0xe0   : > { %v2325_v22 = vor.u32 4788187, %v2324_v35  ;;  %v2328_v50 = vcvt.s32.f32 %v2321_v19  ;;  %v591_v38 = vsel %vm590_vm12, 1, %v10393_v9  ;;  %v10444_v29 = vrot.slane %v7443_v23, 2 }
  0xe1   : > { %v585_v55 = vshrl.u32 %v580_v1, 16  ;;  %v593_v12 = vadd.s32 %v591_v38, %v589_v36  ;;  %v2335_v49 = vsel %vm8008_vm8, 0, %v2333_v4  ;;  %v573_v6 = vadd.s32 %v572_v45, %v563_v58 }
  0xe2   : > { %v8032_v30 = vsel %vm485_vm7, %v478_v24, %v10444_v29  ;;  %v2326_v11 = vand.u32 2147483647, %v2325_v22  ;;  %v592_v17 = vadd.s32 %v588_v33, %v584_v41  ;;  %v542_v61 = vsel %vm536_vm9, %v539_v14, %v541_v34 }
  0xe3   : > { %10445 = vst [vmem:[#allocation6_spill] sm:$0xff] %v8032_v30  ;;  %v661_v18 = vand.u32 2139095040, %v8032_v30  ;;  %v594_v59 = vadd.s32 %v593_v12, %v583_v27  ;;  %v2352_v48 = vadd.s32 3, %v2335_v49  ;;  %v596_v1 = vmul.u32 %v7951_v32, %v542_v61 }
  0xe4   : > { %v2329_v51 = vmul.f32 %v2328_v50, %v2326_v11  ;;  %vm598_vm5 = vc.u32 %v573_v6, %v592_v17  ;;  %v658_v37 = vand.u32 2147483647, %v8032_v30  ;;  %v392_v14 = vrot.slane %v7437_v20, 5 }
  0xe5   : > { %v662_v46 = vshrl.u32 %v661_v18, 23  ;;  %v595_v3 = vadd.s32 %v594_v59, %v585_v55  ;;  %v8047_v8 = vand.u32 3, %v2352_v48  ;;  %v8049_v32 = vand.u32 3, %v2335_v49 }
  0xe6   : > { %v2330_v23 = vxor.u32 2147483648, %v2329_v51  ;;  %v665_v19 = vand.u32 8388607, %v658_v37  ;;  %v479_v43 = vsel %vm476_vm1, %v7428_v13, %v392_v14  ;;  %v8059_v50 = vadd.s32 %v592_v17, %v573_v6 }
  0xe7   : > { %v7005_v31 = vadd.s32 4294967169, %v662_v46  ;;  %v599_v57 = vadd.s32 1, %v595_v3  ;;  %vm2358_vm9 = vcmp.eq.s32.totalorder %v8047_v8, 2  ;;  %vm4826_vm15 = vcmp.eq.s32.totalorder %v8049_v32, 2 }
  0xe8   : > { %v2331_v52 = vsel %vm2210_vm3, %v2330_v23, %v2329_v51  ;;  %v666_v27 = vor.u32 8388608, %v665_v19  ;;  %v10446_v29 = vrot.slane %v7446_v25, 2  ;;  %vm2355_vm14 = vcmp.eq.s32.totalorder %v8047_v8, 0 }
  0xe9   : > { %v668_v41 = vadd.s32 1, %v7005_v31  ;;  %v2334_v63 = vsel %vm8008_vm8, %v7801_v47, %v2331_v52  ;;  %v600_v42 = vsel %vm598_vm5, %v599_v57, %v595_v3  ;;  %vm4823_vm3 = vcmp.eq.s32.totalorder %v8049_v32, 0 }
  0xea   : > { %v2336_v53 = vmul.f32 %v2334_v63, %v2334_v63  ;;  %v601_v33 = vadd.s32 %v600_v42, %v596_v1  ;;  %v8067_v13 = vsel %vm485_vm7, %v479_v43, %v10446_v29  ;;  %vm2354_vm11 = vcmp.lt.s32.totalorder %v8047_v8, 2 }
  0xeb   : > { %vm669_vm6 = vcmp.gt.s32.totalorder %v668_v41, 0  ;;  %10447 = vst [vmem:[#allocation7_spill] sm:$0xff] %v8067_v13  ;;  %vm4822_vm2 = vcmp.lt.s32.totalorder %v8049_v32, 2  ;;  %vm2351_vm8 = vweird.f32 %v7801_v47  ;;  %v8090_v31 = vshll.u32 %v666_v27, 8 }
  0xec   : > { %v670_v35 = vsel %vm669_vm6, %v668_v41, 0  ;;  %v2337_v44 = vmul.f32 -0.001358992, %v2336_v53  ;;  %v2344_v54 = vmul.f32 -0.00019511016, %v2336_v53  ;;  %v602_v36 = vadd.s32 536870912, %v601_v33 }
  0xed   : > { %v672_v58 = vand.u32 31, %v670_v35  ;;  %v8072_v55 = vshrl.u32 %v670_v35, 5  ;;  %vm505_vm12 = vcmp.lt.s32.totalorder %v7822_v10, 0 }
  0xee   : > { %v2338_v20 = vadd.f32 0.041655596, %v2337_v44  ;;  %v2345_v24 = vadd.f32 0.008332121, %v2344_v54  ;;  %v8061_v4 = vshrl.u32 %v602_v36, 30 }
  0xef   : > { %v8055_v22 = vsub.s32 32, %v672_v58  ;;  %v684_v38 = vshll.u32 %v10389_v5, %v672_v58  ;;  %v675_v12 = vshll.u32 %v10400_v62, %v672_v58  ;;  %v678_v18 = vshll.u32 %v10391_v0, %v672_v58 }
  0xf0   : > { %v2339_v34 = vmul.f32 %v2338_v20, %v2336_v53  ;;  %v2346_v45 = vmul.f32 %v2345_v24, %v2336_v53  ;;  %v604_v11 = vshll.u32 %v8061_v4, 30  ;;  %v681_v59 = vshll.u32 %v10382_v2, %v672_v58 }
  0xf1   : > { %v676_v25 = vshrl.u32 %v10391_v0, %v8055_v22  ;;  %v685_v17 = vshrl.u32 %v10380_v7, %v8055_v22  ;;  %v679_v61 = vshrl.u32 %v10382_v2, %v8055_v22  ;;  %v682_v46 = vshrl.u32 %v10389_v5, %v8055_v22 }
  0xf2   : > { %v2340_v49 = vadd.f32 -0.4999988, %v2339_v34  ;;  %v2347_v6 = vadd.f32 -0.16666654, %v2346_v45  ;;  %v8083_v51 = vsub.s32 %v601_v33, %v604_v11  ;;  %v687_v52 = vshll.u32 %v10380_v7, %v672_v58 }
  0xf3   : > { %v686_v3 = vor.u32 %v685_v17, %v684_v38  ;;  %v688_v57 = vshrl.u32 %v10440_v56, %v8055_v22  ;;  %v8097_v42 = vor.u32 %v676_v25, %v675_v12  ;;  %v816_v33 = vand.u32 2139095040, %v8067_v13 }
  0xf4   : > { %v2341_v23 = vmul.f32 %v2340_v49, %v2336_v53  ;;  %v2348_v48 = vmul.f32 %v2347_v6, %v2336_v53  ;;  %vm606_vm4 = vcmp.lt.s32.totalorder %v8083_v51, 0  ;;  %v607_v1 = vsub.s32 0, %v8083_v51 }
  0xf5   : > { %v8101_v19 = vor.u32 %v679_v61, %v678_v18  ;;  %v683_v35 = vor.u32 %v682_v46, %v681_v59  ;;  %vm693_vm10 = vcmp.lt.s32.totalorder %v8072_v55, 4  ;;  %vm690_vm5 = vcmp.lt.s32.totalorder %v8072_v55, 1 }
  0xf6   : > { %v2342_v41 = vadd.f32 1.0, %v2341_v23  ;;  %v2349_v14 = vadd.f32 1.0, %v2348_v48  ;;  %v608_v53 = vsel %vm606_vm4, %v607_v1, %v8083_v51  ;;  %v689_v36 = vor.u32 %v688_v57, %v687_v52 }
  0xf7   : > { %v609_v58 = vclz %v608_v53  ;;  %vm692_vm6 = vcmp.lt.s32.totalorder %v8072_v55, 3  ;;  %v699_v43 = vsel %vm693_vm10, %v686_v3, 920167782  ;;  %v707_v20 = vand.u32 65535, %v8090_v31 }
  0xf8   : > { %v2350_v44 = vmul.f32 %v2349_v14, %v2334_v63  ;;  %v2359_v54 = vxor.u32 2147483648, %v2342_v41  ;;  %vm8116_vm4 = vcmp.le.f32.partialorder %v503_v39, 0.7853982  ;;  %v627_v38 = vsub.s32 4, %v8061_v4 }
  0xf9   : > { %v7003_v34 = vadd.s32 4294967294, %v609_v58  ;;  %vm691_vm0 = vcmp.lt.s32.totalorder %v8072_v55, 2  ;;  %v698_v29 = vsel %vm690_vm5, %v8097_v42, %v8101_v19  ;;  %v817_v11 = vshrl.u32 %v816_v33, 23 }
  0xfa   : > { %v2356_v24 = vxor.u32 2147483648, %v2350_v44  ;;  %v2360_v27 = vsel %vm2358_vm9, %v2359_v54, %v2350_v44  ;;  %v4828_v63 = vsel %vm4826_vm15, %v2359_v54, %v2350_v44  ;;  %v700_v39 = vsel %vm692_vm6, %v683_v35, %v699_v43 }
  0xfb   : > { %vm7004_vm9 = vcmp.lt.s32.totalorder %v7003_v34, 0  ;;  %v703_v17 = vsel %vm693_vm10, %v689_v36, 1326507024  ;;  %v701_v32 = vsel %vm691_vm0, %v698_v29, %v700_v39  ;;  %v702_v48 = vsel %vm690_vm5, %v8101_v19, %v683_v35 }
  0xfc   : > { %v2357_v12 = vsel %vm2355_vm14, %v2342_v41, %v2356_v24  ;;  %v4825_v18 = vsel %vm4823_vm3, %v2342_v41, %v2356_v24  ;;  %v612_v25 = vsel %vm7004_vm9, 0, %v7003_v34  ;;  %v708_v1 = vshrl.u32 %v8090_v31, 16 }
  0xfd   : > { %v2361_v49 = vsel %vm2354_vm11, %v2357_v12, %v2360_v27  ;;  %v4829_v6 = vsel %vm4822_vm2, %v4825_v18, %v4828_v63  ;;  %v613_v46 = vsub.s32 32, %v612_v25  ;;  %v614_v23 = vshll.u32 %v8083_v51, %v612_v25 }
  0xfe   : > { %v2362_v61 = vsel %vm2351_vm8, nan, %v2361_v49  ;;  %v8142_v59 = vsel %vm2351_vm8, nan, %v4829_v6  ;;  %v617_v8 = vsub.s32 4294967266, %v612_v25  ;;  %v704_v47 = vsel %vm692_vm6, %v686_v3, %v703_v17 }
  0xff   : > { %10450 = vst [vmem:[#allocation8_spill] sm:$0xff] %v8142_v59  ;;  %7113 = vmatpush.msk.msra.mxu3 %vm5472_vm13, %v2362_v61  ;;  %v615_v52 = vshrl.u32 %v8059_v50, %v613_v46  ;;  %v731_v57 = vand.u32 65535, %v701_v32  ;;  %v732_v41 = vshrl.u32 %v701_v32, 16  ;;  %v628_v14 = vsel %vm505_vm12, %v627_v38, %v8061_v4 }
 0x100   : > { %v618_v51 = vadd.s32 127, %v617_v8  ;;  %v813_v33 = vand.u32 2147483647, %v8067_v13  ;;  %v7008_v53 = vadd.s32 4294967169, %v817_v11  ;;  %v674_v54 = vshrl.u32 %v10400_v62, %v8055_v22 }
 0x101   : > { %v616_v44 = vor.u32 %v615_v52, %v614_v23  ;;  %v705_v50 = vsel %vm691_vm0, %v702_v48, %v704_v47  ;;  %v734_v58 = vmul.u32 %v732_v41, %v707_v20  ;;  %v735_v24 = vmul.u32 %v731_v57, %v708_v1 }
 0x102   : > { %v619_v36 = vshll.u32 %v618_v51, 23  ;;  %v709_v3 = vand.u32 65535, %v705_v50  ;;  %v710_v43 = vshrl.u32 %v705_v50, 16  ;;  %v8165_v63 = vsel %vm8116_vm4, 0, %v628_v14 }
 0x103   : > { %v623_v27 = vcvt.s32.f32 %v616_v44  ;;  %10451 = vst [vmem:[#allocation9_spill] sm:$0xff] %v8165_v63  ;;  %v695_v4 = vsel %vm693_vm10, %v683_v35, 2102212464  ;;  %v733_v34 = vmul.u32 %v731_v57, %v707_v20  ;;  %v694_v12 = vsel %vm690_vm5, %v674_v54, %v8097_v42 }
 0x104   : > { %v620_v38 = vor.u32 4788187, %v619_v36  ;;  %v711_v29 = vmul.u32 %v709_v3, %v707_v20  ;;  %v712_v22 = vmul.u32 %v710_v43, %v707_v20  ;;  %v713_v11 = vmul.u32 %v709_v3, %v708_v1 }
 0x105   : > { %v736_v18 = vmul.u32 %v732_v41, %v708_v1  ;;  %v737_v39 = vshll.u32 %v734_v58, 16  ;;  %v739_v49 = vshll.u32 %v735_v24, 16  ;;  %v714_v25 = vmul.u32 %v710_v43, %v708_v1 }
 0x106   : > { %v621_v6 = vand.u32 2147483647, %v620_v38  ;;  %v715_v17 = vshll.u32 %v712_v22, 16  ;;  %v717_v61 = vshll.u32 %v713_v11, 16  ;;  %v696_v35 = vsel %vm692_vm6, %v8101_v19, %v695_v4 }
 0x107   : > { %v738_v46 = vshrl.u32 %v734_v58, 16  ;;  %vm741_vm15 = vc.u32 %v733_v34, %v737_v39  ;;  %v743_v23 = vadd.s32 %v737_v39, %v733_v34  ;;  %v716_v42 = vshrl.u32 %v712_v22, 16 }
 0x108   : > { %v624_v20 = vmul.f32 %v623_v27, %v621_v6  ;;  %vm719_vm14 = vc.u32 %v711_v29, %v715_v17  ;;  %v721_v8 = vadd.s32 %v715_v17, %v711_v29  ;;  %v742_v32 = vsel %vm741_vm15, 1, %v10393_v9 }
 0x109   : > { %v720_v48 = vsel %vm719_vm14, 1, %v10393_v9  ;;  %v744_v52 = vadd.s32 %v742_v32, %v736_v18  ;;  %vm745_vm3 = vc.u32 %v743_v23, %v739_v49  ;;  %v740_v41 = vshrl.u32 %v735_v24, 16 }
 0x10a   : > { %v625_v1 = vxor.u32 2147483648, %v624_v20  ;;  %v722_v47 = vadd.s32 %v720_v48, %v714_v25  ;;  %vm723_vm11 = vc.u32 %v721_v8, %v717_v61  ;;  %v746_v57 = vsel %vm745_vm3, 1, %v10393_v9 }
 0x10b   : > { %v724_v19 = vsel %vm723_vm11, 1, %v10393_v9  ;;  %v748_v51 = vadd.s32 %v746_v57, %v744_v52  ;;  %v823_v14 = vadd.s32 1, %v7008_v53  ;;  %v647_v54 = vadd.s32 3, %v8165_v63 }
 0x10c   : > { %v626_v44 = vsel %vm505_vm12, %v625_v1, %v624_v20  ;;  %v718_v50 = vshrl.u32 %v713_v11, 16  ;;  %v726_v58 = vadd.s32 %v724_v19, %v722_v47  ;;  %v697_v3 = vsel %vm691_vm0, %v694_v12, %v696_v35 }
 0x10d   : > { %v629_v36 = vsel %vm8116_vm4, %v7822_v10, %v626_v44  ;;  %v749_v43 = vadd.s32 %v748_v51, %v738_v46  ;;  %vm824_vm2 = vcmp.gt.s32.totalorder %v823_v14, 0  ;;  %v8187_v4 = vadd.s32 %v743_v23, %v739_v49 }
 0x10e   : > { %v631_v27 = vmul.f32 %v629_v36, %v629_v36  ;;  %v727_v24 = vadd.s32 %v726_v58, %v716_v42  ;;  %v825_v53 = vsel %vm824_vm2, %v823_v14, 0  ;;  %v820_v38 = vand.u32 8388607, %v813_v33 }
 0x10f   : > { %v750_v34 = vadd.s32 %v749_v43, %v740_v41  ;;  %v827_v29 = vand.u32 31, %v825_v53  ;;  %v751_v45 = vmul.u32 %v8090_v31, %v697_v3  ;;  %v648_v25 = vand.u32 3, %v647_v54 }
 0x110   : > { %v632_v22 = vmul.f32 -0.001358992, %v631_v27  ;;  %v639_v11 = vmul.f32 -0.00019511016, %v631_v27  ;;  %v8191_v18 = vadd.s32 %v727_v24, %v718_v50  ;;  %v821_v17 = vor.u32 8388608, %v820_v38 }
 0x111   : > { %v754_v55 = vadd.s32 1, %v750_v34  ;;  %v828_v12 = vsub.s32 32, %v827_v29  ;;  %v8196_v61 = vshrl.u32 %v825_v53, 5  ;;  %v830_v20 = vshll.u32 %v10400_v62, %v827_v29 }
 0x112   : > { %v633_v39 = vadd.f32 0.041655596, %v632_v22  ;;  %v640_v6 = vadd.f32 0.008332121, %v639_v11  ;;  %vm753_vm0 = vc.u32 %v8191_v18, %v8187_v4  ;;  %v833_v31 = vshll.u32 %v10391_v0, %v827_v29 }
 0x113   : > { %v755_v49 = vsel %vm753_vm0, %v754_v55, %v750_v34  ;;  %v831_v8 = vshrl.u32 %v10391_v0, %v828_v12  ;;  %v834_v32 = vshrl.u32 %v10382_v2, %v828_v12  ;;  %v836_v42 = vshll.u32 %v10382_v2, %v827_v29 }
 0x114   : > { %v634_v35 = vmul.f32 %v633_v39, %v631_v27  ;;  %v641_v46 = vmul.f32 %v640_v6, %v631_v27  ;;  %v756_v23 = vadd.s32 %v755_v49, %v751_v45  ;;  %vm649_vm8 = vcmp.lt.s32.totalorder %v648_v25, 2 }
 0x115   : > { %v837_v47 = vshrl.u32 %v10389_v5, %v828_v12  ;;  %vm10428_vm10 = vweird.f32 %v7822_v10  ;;  %v839_v57 = vshll.u32 %v10389_v5, %v827_v29  ;;  %v840_v19 = vshrl.u32 %v10380_v7, %v828_v12 }
 0x116   : > { %v635_v48 = vadd.f32 -0.4999988, %v634_v35  ;;  %v642_v52 = vadd.f32 -0.16666654, %v641_v46  ;;  %v757_v1 = vadd.s32 536870912, %v756_v23  ;;  %v842_v41 = vshll.u32 %v10380_v7, %v827_v29 }
 0x117   : > { %v843_v51 = vshrl.u32 %v10440_v56, %v828_v12  ;;  %vm650_vm12 = vcmp.eq.s32.totalorder %v648_v25, 0  ;;  %vm653_vm5 = vcmp.eq.s32.totalorder %v648_v25, 2  ;;  %v832_v50 = vor.u32 %v831_v8, %v830_v20 }
 0x118   : > { %v636_v14 = vmul.f32 %v635_v48, %v631_v27  ;;  %v643_v44 = vmul.f32 %v642_v52, %v631_v27  ;;  %v758_v54 = vshrl.u32 %v757_v1, 30  ;;  %v8209_v58 = vor.u32 %v834_v32, %v833_v31 }
 0x119   : > { %v841_v3 = vor.u32 %v840_v19, %v839_v57  ;;  %vm845_vm6 = vcmp.lt.s32.totalorder %v8196_v61, 1  ;;  %v838_v34 = vor.u32 %v837_v47, %v836_v42  ;;  %v844_v38 = vor.u32 %v843_v51, %v842_v41 }
 0x11a   : > { %v8211_v43 = vadd.f32 1.0, %v636_v14  ;;  %v644_v24 = vadd.f32 1.0, %v643_v44  ;;  %v759_v53 = vshll.u32 %v758_v54, 30  ;;  %vm848_vm4 = vcmp.lt.s32.totalorder %v8196_v61, 4 }
 0x11b   : > { %v8215_v29 = vshll.u32 %v821_v17, 8  ;;  %vm847_vm9 = vcmp.lt.s32.totalorder %v8196_v61, 3  ;;  %vm846_vm15 = vcmp.lt.s32.totalorder %v8196_v61, 2  ;;  %v853_v45 = vsel %vm845_vm6, %v832_v50, %v8209_v58 }
 0x11c   : > { %10452 = vst [vmem:[#allocation10_spill] sm:$0xff] %v8211_v43  ;;  %v8217_v27 = vmul.f32 %v644_v24, %v629_v36  ;;  %v10377_v22 = vxor.u32 2147483648, %v8211_v43  ;;  %v760_v11 = vsub.s32 %v756_v23, %v759_v53  ;;  %v854_v55 = vsel %vm848_vm4, %v841_v3, 920167782 }
 0x11d   : > { %v393_v39 = vrot.slane %v7439_v21, 5  ;;  %v855_v17 = vsel %vm847_vm9, %v838_v34, %v854_v55  ;;  %v857_v35 = vsel %vm845_vm6, %v8209_v58, %v838_v34  ;;  %v858_v46 = vsel %vm848_vm4, %v844_v38, 1326507024 }
 0x11e   : > { %10453 = vst [vmem:[#allocation11_spill] sm:$0xff] %v8217_v27  ;;  %v10378_v6 = vxor.u32 2147483648, %v8217_v27  ;;  %v655_v36 = vsel %vm653_vm5, %v10377_v22, %v8217_v27  ;;  %vm761_vm14 = vcmp.lt.s32.totalorder %v760_v11, 0  ;;  %v762_v49 = vsub.s32 0, %v760_v11 }
 0x11f   : > { %v862_v21 = vand.u32 65535, %v8215_v29  ;;  %v829_v8 = vshrl.u32 %v10400_v62, %v828_v12  ;;  %v856_v31 = vsel %vm846_vm15, %v853_v45, %v855_v17  ;;  %v782_v48 = vsub.s32 4, %v758_v54 }
 0x120   : > { %v652_v23 = vsel %vm650_vm12, %v8211_v43, %v10378_v6  ;;  %v763_v20 = vsel %vm761_vm14, %v762_v49, %v760_v11  ;;  %v859_v52 = vsel %vm847_vm9, %v841_v3, %v858_v46  ;;  %v863_v57 = vshrl.u32 %v8215_v29, 16 }
 0x121   : > { %v656_v32 = vsel %vm649_vm8, %v652_v23, %v655_v36  ;;  %v764_v42 = vclz %v763_v20  ;;  %v860_v47 = vsel %vm846_vm15, %v857_v35, %v859_v52  ;;  %v887_v19 = vshrl.u32 %v856_v31, 16 }
 0x122   : > { %v657_v1 = vsel %vm10428_vm10, nan, %v656_v32  ;;  %v864_v41 = vand.u32 65535, %v860_v47  ;;  %v865_v51 = vshrl.u32 %v860_v47, 16  ;;  %vm660_vm3 = vcmp.lt.s32.totalorder %v8032_v30, 0 }
 0x123   : > { %5512 = vmatpush.msra.mxu0 %v657_v1  ;;  %v7006_v12 = vadd.s32 4294967294, %v764_v42  ;;  %v752_v25 = vadd.s32 %v8187_v4, %v8191_v18  ;;  %v886_v14 = vand.u32 65535, %v856_v31  ;;  %v480_v44 = vsel %vm476_vm1, %v7430_v15, %v393_v39 }
 0x124   : > { %v783_v3 = vsel %vm660_vm3, %v782_v48, %v758_v54  ;;  %v849_v24 = vsel %vm845_vm6, %v829_v8, %v832_v50  ;;  %v867_v53 = vmul.u32 %v865_v51, %v862_v21  ;;  %v866_v45 = vmul.u32 %v864_v41, %v862_v21 }
 0x125   : > { %vm7007_vm11 = vcmp.lt.s32.totalorder %v7006_v12, 0  ;;  %v868_v55 = vmul.u32 %v864_v41, %v863_v57  ;;  %v889_v36 = vmul.u32 %v887_v19, %v862_v21  ;;  %v850_v18 = vsel %vm848_vm4, %v838_v34, 2102212464 }
 0x126   : > { %v767_v38 = vsel %vm7007_vm11, 0, %v7006_v12  ;;  %v870_v4 = vshll.u32 %v867_v53, 16  ;;  %v869_v15 = vmul.u32 %v865_v51, %v863_v57  ;;  %v888_v39 = vmul.u32 %v886_v14, %v862_v21 }
 0x127   : > { %v768_v49 = vsub.s32 32, %v767_v38  ;;  %v769_v17 = vshll.u32 %v760_v11, %v767_v38  ;;  %v772_v35 = vsub.s32 4294967266, %v767_v38  ;;  %v890_v46 = vmul.u32 %v886_v14, %v863_v57 }
 0x128   : > { %v872_v20 = vshll.u32 %v868_v55, 16  ;;  %v8270_v50 = vsel %vm485_vm7, %v480_v44, %v428_v60  ;;  %vm874_vm2 = vc.u32 %v866_v45, %v870_v4  ;;  %v876_v8 = vadd.s32 %v870_v4, %v866_v45 }
 0x129   : > { %v770_v23 = vshrl.u32 %v752_v25, %v768_v49  ;;  %v773_v54 = vadd.s32 127, %v772_v35  ;;  %10454 = vst [vmem:[#allocation12_spill] sm:$0xff] %v8270_v50  ;;  %v891_v31 = vmul.u32 %v887_v19, %v863_v57  ;;  %v892_v11 = vshll.u32 %v889_v36, 16 }
 0x12a   : > { %v871_v48 = vshrl.u32 %v867_v53, 16  ;;  %v875_v34 = vsel %vm874_vm2, 1, %v10393_v9  ;;  %vm878_vm0 = vc.u32 %v876_v8, %v872_v20  ;;  %v894_v21 = vshll.u32 %v890_v46, 16 }
 0x12b   : > { %v771_v32 = vor.u32 %v770_v23, %v769_v17  ;;  %v774_v42 = vshll.u32 %v773_v54, 23  ;;  %v877_v52 = vadd.s32 %v875_v34, %v869_v15  ;;  %vm896_vm8 = vc.u32 %v888_v39, %v892_v11 }
 0x12c   : > { %v879_v47 = vsel %vm878_vm0, 1, %v10393_v9  ;;  %v897_v57 = vsel %vm896_vm8, 1, %v10393_v9  ;;  %v851_v19 = vsel %vm847_vm9, %v8209_v58, %v850_v18  ;;  %v898_v41 = vadd.s32 %v892_v11, %v888_v39 }
 0x12d   : > { %v775_v60 = vor.u32 4788187, %v774_v42  ;;  %v778_v1 = vcvt.s32.f32 %v771_v32  ;;  %v881_v12 = vadd.s32 %v879_v47, %v877_v52  ;;  %v899_v51 = vadd.s32 %v897_v57, %v891_v31 }
 0x12e   : > { %v873_v14 = vshrl.u32 %v868_v55, 16  ;;  %v971_v44 = vand.u32 2139095040, %v8270_v50  ;;  %v331_v53 = vmul.f32 3.1415927, %v8276_v26  ;;  %v893_v45 = vshrl.u32 %v889_v36, 16 }
 0x12f   : > { %v776_v25 = vand.u32 2147483647, %v775_v60  ;;  %v882_v38 = vadd.s32 %v881_v12, %v871_v48  ;;  %vm900_vm12 = vc.u32 %v898_v41, %v894_v21  ;;  %vm8287_vm5 = vcmp.le.f32.partialorder %v658_v37, 0.7853982 }
 0x130   : > { %v901_v58 = vsel %vm900_vm12, 1, %v10393_v9  ;;  %v972_v35 = vshrl.u32 %v971_v44, 23  ;;  %354 = vst [vmem:[#allocation1 + $0x30] ss:$2 sm:$0xff] %v331_v53  ;;  %v8294_v55 = vsel %vm8287_vm5, 0, %v783_v3  ;;  %v852_v4 = vsel %vm846_vm15, %v849_v24, %v851_v19 }
 0x131   : > { %v779_v17 = vmul.f32 %v778_v1, %v776_v25  ;;  %10457 = vst [vmem:[#allocation13_spill] sm:$0xff] %v8294_v55  ;;  %v895_v36 = vshrl.u32 %v890_v46, 16  ;;  %v903_v18 = vadd.s32 %v901_v58, %v899_v51  ;;  %v8298_v39 = vadd.s32 %v882_v38, %v873_v14 }
 0x132   : > { %v8300_v37 = vadd.s32 %v898_v41, %v894_v21  ;;  %v7011_v23 = vadd.s32 4294967169, %v972_v35  ;;  %v906_v8 = vmul.u32 %v8215_v29, %v852_v4  ;;  %v802_v3 = vadd.s32 3, %v8294_v55 }
 0x133   : > { %v780_v15 = vxor.u32 2147483648, %v779_v17  ;;  %v904_v54 = vadd.s32 %v903_v18, %v893_v45  ;;  %v10379_v46 = vand.u32 2147483647, %v8270_v50  ;;  %v335_v29 = vmul.f32 6.2831855, %v8276_v26 }
 0x134   : > { %v978_v31 = vadd.s32 1, %v7011_v23  ;;  %vm908_vm6 = vc.u32 %v8298_v39, %v8300_v37  ;;  %v8319_v60 = vand.u32 3, %v802_v3  ;;  %vm10427_vm14 = vweird.f32 %v8032_v30 }
 0x135   : > { %v781_v20 = vsel %vm660_vm3, %v780_v15, %v779_v17  ;;  %v905_v24 = vadd.s32 %v904_v54, %v895_v36  ;;  %v975_v51 = vand.u32 8388607, %v10379_v46  ;;  %vm815_vm11 = vcmp.lt.s32.totalorder %v8067_v13, 0 }
 0x136   : > { %v8308_v61 = vsel %vm8287_vm5, %v8032_v30, %v781_v20  ;;  %vm979_vm4 = vcmp.gt.s32.totalorder %v978_v31, 0  ;;  %vm805_vm9 = vcmp.eq.s32.totalorder %v8319_v60, 0  ;;  %vm804_vm15 = vcmp.lt.s32.totalorder %v8319_v60, 2 }
 0x137   : > { %v786_v11 = vmul.f32 %v8308_v61, %v8308_v61  ;;  %v909_v32 = vadd.s32 1, %v905_v24  ;;  %v980_v42 = vsel %vm979_vm4, %v978_v31, 0  ;;  %v8317_v48 = vld.sshfl [vmem:[#allocation1 + $0x30] sm:$0xff pattern:$0x75316420]  ;;  %vm808_vm3 = vcmp.eq.s32.totalorder %v8319_v60, 2 }
 0x138   : > { %v982_v21 = vand.u32 31, %v980_v42  ;;  %v8321_v47 = vld.sshfl [vmem:[#allocation1 + $0x38] sm:$0xff pattern:$0x75316420]  ;;  %v8341_v23 = vshrl.u32 %v980_v42, 5  ;;  %v976_v54 = vor.u32 8388608, %v975_v51  ;;  %v907_v60 = vadd.s32 %v8300_v37, %v8298_v39 }
 0x139   : > { %v787_v34 = vmul.f32 -0.001358992, %v786_v11  ;;  %v794_v52 = vmul.f32 -0.00019511016, %v786_v11  ;;  %v910_v1 = vsel %vm908_vm6, %v909_v32, %v905_v24  ;;  %381 = vst [vmem:[#allocation1 + $0x30] ss:$2 sm:$0xff] %v335_v29 }
 0x13a   : > { %v911_v12 = vadd.s32 %v910_v1, %v906_v8  ;;  %v8323_v41 = vsub.s32 32, %v982_v21  ;;  %v985_v25 = vshll.u32 %v10400_v62, %v982_v21  ;;  %v988_v14 = vshll.u32 %v10391_v0, %v982_v21 }
 0x13b   : > { %v788_v57 = vadd.f32 0.041655596, %v787_v34  ;;  %v795_v19 = vadd.f32 0.008332121, %v794_v52  ;;  %v991_v44 = vshll.u32 %v10382_v2, %v982_v21  ;;  %v994_v49 = vshll.u32 %v10389_v5, %v982_v21 }
 0x13c   : > { %v912_v45 = vadd.s32 536870912, %v911_v12  ;;  %v986_v17 = vshrl.u32 %v10391_v0, %v8323_v41  ;;  %v989_v58 = vshrl.u32 %v10382_v2, %v8323_v41  ;;  %v992_v35 = vshrl.u32 %v10389_v5, %v8323_v41 }
 0x13d   : > { %v789_v53 = vmul.f32 %v788_v57, %v786_v11  ;;  %v796_v38 = vmul.f32 %v795_v19, %v786_v11  ;;  %v995_v4 = vshrl.u32 %v10380_v7, %v8323_v41  ;;  %v997_v20 = vshll.u32 %v10380_v7, %v982_v21 }
 0x13e   : > { %v913_v15 = vshrl.u32 %v912_v45, 30  ;;  %v339_v8 = vmul.f32 12.566371, %v8276_v26  ;;  %v8347_v29 = vor.u32 %v986_v17, %v985_v25  ;;  %v8349_v32 = vor.u32 %v989_v58, %v988_v14 }
 0x13f   : > { %v790_v36 = vadd.f32 -0.4999988, %v789_v53  ;;  %v797_v18 = vadd.f32 -0.16666654, %v796_v38  ;;  %v993_v34 = vor.u32 %v992_v35, %v991_v44  ;;  %v996_v52 = vor.u32 %v995_v4, %v994_v49 }
 0x140   : > { %v914_v24 = vshll.u32 %v913_v15, 30  ;;  %v998_v42 = vshrl.u32 %v10440_v56, %v8323_v41  ;;  %vm1000_vm2 = vcmp.lt.s32.totalorder %v8341_v23, 1  ;;  %vm1002_vm0 = vcmp.lt.s32.totalorder %v8341_v23, 3  ;;  %v8365_v25 = vld.sshfl [vmem:[#allocation1 + $0x38] sm:$0xff pattern:$0x75316420] }
 0x141   : > { %v791_v31 = vmul.f32 %v790_v36, %v786_v11  ;;  %v798_v3 = vmul.f32 %v797_v18, %v786_v11  ;;  %v8359_v11 = vld.sshfl [vmem:[#allocation1 + $0x30] sm:$0xff pattern:$0x75316420]  ;;  %vm1003_vm8 = vcmp.lt.s32.totalorder %v8341_v23, 4  ;;  %v8363_v51 = vshll.u32 %v976_v54, 8 }
 0x142   : > { %v8356_v21 = vsub.s32 %v911_v12, %v914_v24  ;;  %v999_v19 = vor.u32 %v998_v42, %v997_v20  ;;  %416 = vst [vmem:[#allocation1 + $0x30] ss:$2 sm:$0xff] %v339_v8  ;;  %vm1001_vm5 = vcmp.lt.s32.totalorder %v8341_v23, 2  ;;  %v1008_v53 = vsel %vm1000_vm2, %v8347_v29, %v8349_v32 }
 0x143   : > { %v8353_v1 = vadd.f32 1.0, %v791_v31  ;;  %v799_v57 = vadd.f32 1.0, %v798_v3  ;;  %v1009_v38 = vsel %vm1003_vm8, %v996_v52, 920167782  ;;  %v1012_v58 = vsel %vm1000_vm2, %v8349_v32, %v993_v34 }
 0x144   : > { %vm916_vm12 = vcmp.lt.s32.totalorder %v8356_v21, 0  ;;  %v917_v12 = vsub.s32 0, %v8356_v21  ;;  %v937_v4 = vsub.s32 4, %v913_v15  ;;  %v1010_v36 = vsel %vm1002_vm0, %v993_v34, %v1009_v38 }
 0x145   : > { %10458 = vst [vmem:[#allocation14_spill] sm:$0xff] %v8353_v1  ;;  %v8368_v14 = vmul.f32 %v799_v57, %v8308_v61  ;;  %v10375_v44 = vxor.u32 2147483648, %v8353_v1  ;;  %v343_v61 = vmul.f32 25.132742, %v8276_v26  ;;  %v1013_v18 = vsel %vm1003_vm8, %v999_v19, 1326507024 }
 0x146   : > { %v918_v17 = vsel %vm916_vm12, %v917_v12, %v8356_v21  ;;  %v1014_v20 = vsel %vm1002_vm0, %v996_v52, %v1013_v18  ;;  %v1017_v8 = vand.u32 65535, %v8363_v51  ;;  %v1018_v31 = vshrl.u32 %v8363_v51, 16 }
 0x147   : > { %10459 = vst [vmem:[#allocation15_spill] sm:$0xff] %v8368_v14  ;;  %v10376_v45 = vxor.u32 2147483648, %v8368_v14  ;;  %v810_v49 = vsel %vm808_vm3, %v10375_v44, %v8368_v14  ;;  %v919_v35 = vclz %v918_v17  ;;  %v1011_v42 = vsel %vm1001_vm5, %v1008_v53, %v1010_v36 }
 0x148   : > { %v1015_v57 = vsel %vm1001_vm5, %v1012_v58, %v1014_v20  ;;  %vm8414_vm6 = vcmp.le.f32.partialorder %v813_v33, 0.7853982  ;;  %v938_v53 = vsel %vm815_vm11, %v937_v4, %v913_v15  ;;  %v1042_v33 = vshrl.u32 %v1011_v42, 16 }
 0x149   : > { %v807_v54 = vsel %vm805_vm9, %v8353_v1, %v10376_v45  ;;  %v7009_v24 = vadd.s32 4294967294, %v919_v35  ;;  %v1019_v12 = vand.u32 65535, %v1015_v57  ;;  %v1020_v38 = vshrl.u32 %v1015_v57, 16  ;;  %v8422_v17 = vld.sshfl [vmem:[#allocation1 + $0x30] sm:$0xff pattern:$0x75316420] }
 0x14a   : > { %v811_v3 = vsel %vm804_vm15, %v807_v54, %v810_v49  ;;  %v1041_v49 = vand.u32 65535, %v1011_v42  ;;  %v8424_v18 = vld.sshfl [vmem:[#allocation1 + $0x38] sm:$0xff pattern:$0x75316420]  ;;  %v8429_v39 = vsel %vm8414_vm6, 0, %v938_v53  ;;  %v984_v37 = vshrl.u32 %v10400_v62, %v8323_v41 }
 0x14b   : > { %v812_v19 = vsel %vm10427_vm14, nan, %v811_v3  ;;  %vm7010_vm4 = vcmp.lt.s32.totalorder %v7009_v24, 0  ;;  %v1021_v35 = vmul.u32 %v1019_v12, %v1017_v8  ;;  %v1022_v36 = vmul.u32 %v1020_v38, %v1017_v8  ;;  %451 = vst [vmem:[#allocation1 + $0x30] ss:$2 sm:$0xff] %v343_v61 }
 0x14c   : > { %5541 = vmatpush.msra.mxu1 %v812_v19  ;;  %v922_v58 = vsel %vm7010_vm4, 0, %v7009_v24  ;;  %v1023_v57 = vmul.u32 %v1019_v12, %v1018_v31  ;;  %10462 = vst [vmem:[#allocation16_spill] sm:$0xff] %v8429_v39  ;;  %v1005_v15 = vsel %vm1003_vm8, %v993_v34, 2102212464  ;;  %v1024_v42 = vmul.u32 %v1020_v38, %v1018_v31 }
 0x14d   : > { %v923_v54 = vsub.s32 32, %v922_v58  ;;  %v924_v20 = vshll.u32 %v8356_v21, %v922_v58  ;;  %v927_v3 = vsub.s32 4294967266, %v922_v58  ;;  %v1025_v19 = vshll.u32 %v1022_v36, 16 }
 0x14e   : > { %v1026_v44 = vshrl.u32 %v1022_v36, 16  ;;  %v1027_v45 = vshll.u32 %v1023_v57, 16  ;;  %v1043_v21 = vmul.u32 %v1041_v49, %v1017_v8  ;;  %v1044_v58 = vmul.u32 %v1042_v33, %v1017_v8 }
 0x14f   : > { %v925_v4 = vshrl.u32 %v907_v60, %v923_v54  ;;  %v928_v24 = vadd.s32 127, %v927_v3  ;;  %vm1029_vm9 = vc.u32 %v1021_v35, %v1025_v19  ;;  %v1031_v22 = vadd.s32 %v1025_v19, %v1021_v35 }
 0x150   : > { %v1030_v53 = vsel %vm1029_vm9, 1, %v10393_v9  ;;  %v1045_v6 = vmul.u32 %v1041_v49, %v1018_v31  ;;  %v1046_v46 = vmul.u32 %v1042_v33, %v1018_v31  ;;  %v1047_v41 = vshll.u32 %v1044_v58, 16 }
 0x151   : > { %v926_v12 = vor.u32 %v925_v4, %v924_v20  ;;  %v929_v61 = vshll.u32 %v928_v24, 23  ;;  %v1032_v34 = vadd.s32 %v1030_v53, %v1024_v42  ;;  %vm1033_vm15 = vc.u32 %v1031_v22, %v1027_v45 }
 0x152   : > { %v1028_v60 = vshrl.u32 %v1023_v57, 16  ;;  %v1034_v38 = vsel %vm1033_vm15, 1, %v10393_v9  ;;  %v1048_v36 = vshrl.u32 %v1044_v58, 16  ;;  %v1049_v54 = vshll.u32 %v1045_v6, 16 }
 0x153   : > { %v930_v7 = vor.u32 4788187, %v929_v61  ;;  %v933_v2 = vcvt.s32.f32 %v926_v12  ;;  %v1036_v8 = vadd.s32 %v1034_v38, %v1032_v34  ;;  %vm1051_vm3 = vc.u32 %v1043_v21, %v1047_v41  ;;  %v459_v4 = vld.sshfl [vmem:[#allocation1 + $0x38] sm:$0xff pattern:$0x75316420] }
 0x154   : > { %v1053_v20 = vadd.s32 %v1047_v41, %v1043_v21  ;;  %v1052_v35 = vsel %vm1051_vm3, 1, %v10393_v9  ;;  %v10384_v49 = vrot.slane %v8424_v18, 2  ;;  %v467_v31 = vrot.slane %v459_v4, 7  ;;  %v458_v33 = vld.sshfl [vmem:[#allocation1 + $0x30] sm:$0xff pattern:$0x75316420] }
 0x155   : > { %v931_v3 = vand.u32 2147483647, %v930_v7  ;;  %v1037_v19 = vadd.s32 %v1036_v8, %v1026_v44  ;;  %v1054_v42 = vadd.s32 %v1052_v35, %v1046_v46  ;;  %5739 = vst [vmem:[#allocation1 + $0x30] ss:$2 sm:$0xff] %v8276_v26  ;;  %v8443_v7 = vld [vmem:[%s10362_s0 + $0x10] sm:$0x77]  ;;  %v1004_v22 = vsel %vm1000_vm2, %v984_v37, %v8347_v29 }
 0x156   : > { %vm1055_vm8 = vc.u32 %v1053_v20, %v1049_v54  ;;  %v1006_v45 = vsel %vm1002_vm0, %v8349_v32, %v1005_v15  ;;  %vm10463_vm12 = vcmask 1040384   ;;  %v1050_v44 = vshrl.u32 %v1045_v6, 16 }
 0x157   : > { %v934_v24 = vmul.f32 %v933_v2, %v931_v3  ;;  %v1056_v2 = vsel %vm1055_vm8, 1, %v10393_v9  ;;  %v8455_v46 = vsel %vm10463_vm12, %v10384_v49, %v467_v31  ;;  %v8457_v21 = vadd.s32 %v1037_v19, %v1028_v60  ;;  %vm10464_vm2 = vmmov %vm10463_vm12 }
 0x158   : > { %v1058_v57 = vadd.s32 %v1056_v2, %v1054_v42  ;;  %v8459_v58 = vadd.s32 %v1053_v20, %v1049_v54  ;;  %v2831_v29 = vand.u32 2139095040, %v8455_v46  ;;  %v330_v37 = vmul.f32 3.1415927, %v8443_v7 }
 0x159   : > { %v935_v26 = vxor.u32 2147483648, %v934_v24  ;;  %v957_v15 = vadd.s32 3, %v8429_v39  ;;  %v1007_v12 = vsel %vm1001_vm5, %v1004_v22, %v1006_v45  ;;  %v10385_v41 = vrot.slane %v8422_v17, 2 }
 0x15a   : > { %v1059_v61 = vadd.s32 %v1058_v57, %v1048_v36  ;;  %v2832_v53 = vshrl.u32 %v2831_v29, 23  ;;  %v466_v34 = vrot.slane %v458_v33, 7  ;;  %352 = vst [vmem:[#allocation1 + $0x20] ss:$2 sm:$0xff] %v330_v37  ;;  %v1061_v54 = vmul.u32 %v8363_v51, %v1007_v12 }
 0x15b   : > { %v936_v32 = vsel %vm815_vm11, %v935_v26, %v934_v24  ;;  %vm1063_vm11 = vc.u32 %v8457_v21, %v8459_v58  ;;  %v10386_v23 = vand.u32 2147483647, %v8455_v46  ;;  %v8480_v20 = vand.u32 3, %v957_v15 }
 0x15c   : > { %v8471_v6 = vsel %vm8414_vm6, %v8067_v13, %v936_v32  ;;  %v1060_v38 = vadd.s32 %v1059_v61, %v1050_v44  ;;  %v7047_v36 = vadd.s32 4294967169, %v2832_v53  ;;  %v8485_v35 = vsel %vm10464_vm2, %v10385_v41, %v466_v34 }
 0x15d   : > { %v941_v60 = vmul.f32 %v8471_v6, %v8471_v6  ;;  %v2835_v19 = vand.u32 8388607, %v10386_v23  ;;  %v334_v42 = vmul.f32 6.2831855, %v8443_v7  ;;  %v2676_v26 = vand.u32 2139095040, %v8485_v35 }
 0x15e   : > { %v1064_v8 = vadd.s32 1, %v1060_v38  ;;  %v2838_v4 = vadd.s32 1, %v7047_v36  ;;  %vm960_vm5 = vcmp.eq.s32.totalorder %v8480_v20, 0  ;;  %vm963_vm6 = vcmp.eq.s32.totalorder %v8480_v20, 2 }
 0x15f   : > { %v942_v52 = vmul.f32 -0.001358992, %v941_v60  ;;  %v949_v3 = vmul.f32 -0.00019511016, %v941_v60  ;;  %vm959_vm4 = vcmp.lt.s32.totalorder %v8480_v20, 2  ;;  %vm10426_vm9 = vweird.f32 %v8067_v13 }
 0x160   : > { %v1065_v51 = vsel %vm1063_vm11, %v1064_v8, %v1060_v38  ;;  %vm2839_vm0 = vcmp.gt.s32.totalorder %v2838_v4, 0  ;;  %v338_v15 = vmul.f32 12.566371, %v8443_v7  ;;  %v2836_v61 = vor.u32 8388608, %v2835_v19 }
 0x161   : > { %v943_v31 = vadd.f32 0.041655596, %v942_v52  ;;  %v950_v33 = vadd.f32 0.008332121, %v949_v3  ;;  %v1066_v24 = vadd.s32 %v1065_v51, %v1061_v54  ;;  %v2840_v2 = vsel %vm2839_vm0, %v2838_v4, 0 }
 0x162   : > { %v2842_v57 = vand.u32 31, %v2840_v2  ;;  %v8493_v29 = vld.sshfl [vmem:[#allocation1 + $0x20] sm:$0xff pattern:$0x75316420]  ;;  %v2677_v52 = vshrl.u32 %v2676_v26, 23  ;;  %v8512_v19 = vshrl.u32 %v2840_v2, 5 }
 0x163   : > { %v944_v22 = vmul.f32 %v943_v31, %v941_v60  ;;  %v951_v45 = vmul.f32 %v950_v33, %v941_v60  ;;  %v1067_v44 = vadd.s32 536870912, %v1066_v24  ;;  %v8502_v34 = vld.sshfl [vmem:[#allocation1 + $0x28] sm:$0xff pattern:$0x75316420]  ;;  %vm970_vm12 = vcmp.lt.s32.totalorder %v8270_v50, 0 }
 0x164   : > { %v8500_v53 = vsub.s32 32, %v2842_v57  ;;  %v2845_v36 = vshll.u32 %v10400_v62, %v2842_v57  ;;  %379 = vst [vmem:[#allocation1 + $0x20] ss:$2 sm:$0xff] %v334_v42  ;;  %v2848_v4 = vshll.u32 %v10391_v0, %v2842_v57  ;;  %v2854_v31 = vshll.u32 %v10389_v5, %v2842_v57  ;;  %v7298_v42 = vld [vmem:[%s10364_s2 + $0x10] sm:$0xff] }
 0x165   : > { %v945_v37 = vadd.f32 -0.4999988, %v944_v22  ;;  %v952_v32 = vadd.f32 -0.16666654, %v951_v45  ;;  %v8498_v12 = vshrl.u32 %v1067_v44, 30  ;;  %6009 = vrot.lane.b32.xlu0 %v7298_v42, %s7338_s28  ;;  %v7299_v45 = vld [vmem:[%s10364_s2 + $0x18] sm:$0xff] }
 0x166   : > { %v2846_v8 = vshrl.u32 %v10391_v0, %v8500_v53  ;;  %6011 = vrot.lane.b32.xlu1 %v7299_v45, %s7338_s28  ;;  %v2852_v44 = vshrl.u32 %v10389_v5, %v8500_v53  ;;  %v8541_v42 = vshll.u32 %v2836_v61, 8  ;;  %v2858_v61 = vshrl.u32 %v10440_v56, %v8500_v53 }
 0x167   : > { %v946_v38 = vmul.f32 %v945_v37, %v941_v60  ;;  %v953_v54 = vmul.f32 %v952_v32, %v941_v60  ;;  %v1069_v3 = vshll.u32 %v8498_v12, 30  ;;  %v10466_v60 = vmov 2131351028  }
 0x168   : > { %v2849_v22 = vshrl.u32 %v10466_v60, %v8500_v53  ;;  %v2851_v2 = vshll.u32 %v10466_v60, %v2842_v57  ;;  %v10467_v37 = vmov 920167782   ;;  %vm2860_vm3 = vcmp.lt.s32.totalorder %v8512_v19, 1 }
 0x169   : > { %v8510_v33 = vadd.f32 1.0, %v946_v38  ;;  %v954_v51 = vadd.f32 1.0, %v953_v54  ;;  %v8524_v26 = vsub.s32 %v1066_v24, %v1069_v3  ;;  %v2855_v32 = vshrl.u32 %v10467_v37, %v8500_v53  ;;  %v7300_v38 = vld [vmem:[%s10364_s2] sm:$0xff] }
 0x16a   : > { %6005 = vrot.lane.b32.xlu2 %v7300_v38, %s7338_s28  ;;  %v8539_v3 = vor.u32 %v2846_v8, %v2845_v36  ;;  %v8545_v49 = vor.u32 %v2849_v22, %v2848_v4  ;;  %v2857_v36 = vshll.u32 %v10467_v37, %v2842_v57  ;;  %vm2862_vm8 = vcmp.lt.s32.totalorder %v8512_v19, 3 }
 0x16b   : > { %10465 = vst [vmem:[#allocation17_spill] sm:$0xff] %v8510_v33  ;;  %v8536_v54 = vmul.f32 %v954_v51, %v8471_v6  ;;  %v10387_v24 = vxor.u32 2147483648, %v8510_v33  ;;  %vm1071_vm15 = vcmp.lt.s32.totalorder %v8524_v26, 0  ;;  %v1072_v45 = vsub.s32 0, %v8524_v26 }
 0x16c   : > { %v2856_v41 = vor.u32 %v2855_v32, %v2854_v31  ;;  %v2853_v51 = vor.u32 %v2852_v44, %v2851_v2  ;;  %v8559_v4 = vld.sshfl [vmem:[#allocation1 + $0x20] sm:$0xff pattern:$0x75316420]  ;;  %v2859_v22 = vor.u32 %v2858_v61, %v2857_v36  ;;  %vm2863_vm11 = vcmp.lt.s32.totalorder %v8512_v19, 4 }
 0x16d   : > { %10468 = vst [vmem:[#allocation18_spill] sm:$0xff] %v8536_v54  ;;  %v10388_v23 = vxor.u32 2147483648, %v8536_v54  ;;  %v965_v6 = vsel %vm963_vm6, %v10387_v24, %v8536_v54  ;;  %v1073_v8 = vsel %vm1071_vm15, %v1072_v45, %v8524_v26  ;;  %v8568_v32 = vld.sshfl [vmem:[#allocation1 + $0x28] sm:$0xff pattern:$0x75316420]  ;;  %v1062_v44 = vadd.s32 %v8459_v58, %v8457_v21 }
 0x16e   : > { %v1074_v57 = vclz %v1073_v8  ;;  %vm2861_vm2 = vcmp.lt.s32.totalorder %v8512_v19, 2  ;;  %v2868_v38 = vsel %vm2860_vm3, %v8539_v3, %v8545_v49  ;;  %414 = vst [vmem:[#allocation1 + $0x20] ss:$2 sm:$0xff] %v338_v15  ;;  %v2869_v61 = vsel %vm2863_vm11, %v2856_v41, 920167782  ;;  %v7301_v8 = vld [vmem:[%s10364_s2 + $0x8] sm:$0xff] }
 0x16f   : > { %v962_v31 = vsel %vm960_vm5, %v8510_v33, %v10388_v23  ;;  %v342_v20 = vmul.f32 25.132742, %v8443_v7  ;;  %v2870_v21 = vsel %vm2862_vm8, %v2853_v51, %v2869_v61  ;;  %v2872_v58 = vsel %vm2860_vm3, %v8545_v49, %v2853_v51 }
 0x170   : > { %v966_v2 = vsel %vm959_vm4, %v962_v31, %v965_v6  ;;  %v7012_v36 = vadd.s32 4294967294, %v1074_v57  ;;  %v2877_v6 = vand.u32 65535, %v8541_v42  ;;  %v7044_v15 = vadd.s32 4294967169, %v2677_v52 }
 0x171   : > { %v967_v45 = vsel %vm10426_vm9, nan, %v966_v2  ;;  %v2871_v31 = vsel %vm2861_vm2, %v2868_v38, %v2870_v21  ;;  %v2873_v57 = vsel %vm2863_vm11, %v2859_v22, 1326507024  ;;  %v2878_v2 = vshrl.u32 %v8541_v42, 16  ;;  %v8605_v38 = vpop.permute.xlu0 %5455 }
 0x172   : > { %5570 = vmatpush.msra.mxu2 %v967_v45  ;;  %6007 = vrot.lane.b32.xlu2 %v7301_v8, %s7338_s28  ;;  %vm7013_vm0 = vcmp.lt.s32.totalorder %v7012_v36, 0  ;;  %v1092_v61 = vsub.s32 4, %v8498_v12  ;;  %v2874_v52 = vsel %vm2862_vm8, %v2856_v41, %v2873_v57  ;;  %v2901_v24 = vand.u32 65535, %v2871_v31  ;;  %10469 = vst [vmem:[#allocation19_spill] sm:$0xff] %v8605_v38 }
 0x173   : > { %v1077_v45 = vsel %vm7013_vm0, 0, %v7012_v36  ;;  %v2875_v0 = vsel %vm2861_vm2, %v2872_v58, %v2874_v52  ;;  %v2844_v22 = vshrl.u32 %v10400_v62, %v8500_v53  ;;  %v2683_v9 = vadd.s32 1, %v7044_v15 }
 0x174   : > { %v1078_v23 = vsub.s32 32, %v1077_v45  ;;  %v1079_v5 = vshll.u32 %v8524_v26, %v1077_v45  ;;  %v1082_v8 = vsub.s32 4294967266, %v1077_v45  ;;  %v2879_v21 = vand.u32 65535, %v2875_v0 }
 0x175   : > { %v2880_v41 = vshrl.u32 %v2875_v0, 16  ;;  %v2902_v57 = vshrl.u32 %v2871_v31, 16  ;;  %v8610_v54 = vld.sshfl [vmem:[#allocation1 + $0x20] sm:$0xff pattern:$0x75316420]  ;;  %v1093_v26 = vsel %vm970_vm12, %v1092_v61, %v8498_v12  ;;  %v8617_v52 = vmul.u32 %v2901_v24, %v2878_v2 }
 0x176   : > { %v1080_v13 = vshrl.u32 %v1062_v44, %v1078_v23  ;;  %v1083_v33 = vadd.s32 127, %v1082_v8  ;;  %v2865_v58 = vsel %vm2863_vm11, %v2853_v51, 2102212464  ;;  %v2883_v45 = vmul.u32 %v2879_v21, %v2878_v2  ;;  %v8619_v53 = vld.sshfl [vmem:[#allocation1 + $0x28] sm:$0xff pattern:$0x75316420] }
 0x177   : > { %v10470_v15 = vand.u32 2147483647, %v8270_v50  ;;  %v2881_v31 = vmul.u32 %v2879_v21, %v2877_v6  ;;  %v2882_v8 = vmul.u32 %v2880_v41, %v2877_v6  ;;  %449 = vst [vmem:[#allocation1 + $0x20] ss:$2 sm:$0xff] %v342_v20  ;;  %vm10429_vm6 = vcmask 97280  }
 0x178   : > { %v1081_v0 = vor.u32 %v1080_v13, %v1079_v5  ;;  %v1084_v44 = vshll.u32 %v1083_v33, 23  ;;  %v2884_v12 = vmul.u32 %v2880_v41, %v2878_v2  ;;  %v2903_v61 = vmul.u32 %v2901_v24, %v2877_v6  ;;  %7099 = vmatmul.msk.f32.vlgmr.msra.gmra.mxu0 %vm10429_vm6, %v8605_v38  ;;  %7104 = vmatmul.msk.f32.vlgmr.msra.gmra.mxu1 %vm10429_vm6, %v8605_v38 }
 0x179   : > { %vm8623_vm5 = vcmp.le.f32.partialorder %v10470_v15, 0.7853982  ;;  %v2904_v51 = vmul.u32 %v2902_v57, %v2877_v6  ;;  %v2885_v15 = vshll.u32 %v2882_v8, 16  ;;  %v2887_v30 = vshll.u32 %v2883_v45, 16  ;;  %7109 = vmatmul.msk.f32.vlgmr.msra.gmra.mxu2 %vm10429_vm6, %v8605_v38 }
 0x17a   : > { %v1085_v62 = vor.u32 4788187, %v1084_v44  ;;  %v1088_v36 = vcvt.s32.f32 %v1081_v0  ;;  %v2864_v5 = vsel %vm2860_vm3, %v2844_v22, %v8539_v3  ;;  %v2906_v13 = vmul.u32 %v2902_v57, %v2878_v2  ;;  %v8642_v2 = vpop.permute.xlu0 %5457 }
 0x17b   : > { %v2907_v33 = vshll.u32 %v2904_v51, 16  ;;  %v2909_v24 = vshll.u32 %v8617_v52, 16  ;;  %v2866_v6 = vsel %vm2862_vm8, %v8545_v49, %v2865_v58  ;;  %vm2889_vm4 = vc.u32 %v2881_v31, %v2885_v15 }
 0x17c   : > { %v1086_v20 = vand.u32 2147483647, %v1085_v62  ;;  %v2891_v21 = vadd.s32 %v2885_v15, %v2881_v31  ;;  %v2886_v41 = vshrl.u32 %v2882_v8, 16  ;;  %v10473_v0 = vmov 0  }
 0x17d   : > { %v2890_v44 = vsel %vm2889_vm4, 1, %v10473_v0  ;;  %vm2911_vm15 = vc.u32 %v2903_v61, %v2907_v33  ;;  %v2913_v10 = vadd.s32 %v2907_v33, %v2903_v61  ;;  %v2908_v22 = vshrl.u32 %v2904_v51, 16 }
 0x17e   : > { %v1089_v1 = vmul.f32 %v1088_v36, %v1086_v20  ;;  %v2892_v14 = vadd.s32 %v2890_v44, %v2884_v12  ;;  %vm2893_vm11 = vc.u32 %v2891_v21, %v2887_v30  ;;  %v2912_v3 = vsel %vm2911_vm15, 1, %v10473_v0 }
 0x17f   : > { %v2894_v62 = vsel %vm2893_vm11, 1, %v10473_v0  ;;  %v2914_v57 = vadd.s32 %v2912_v3, %v2906_v13  ;;  %vm2915_vm3 = vc.u32 %v2913_v10, %v2909_v24  ;;  %v2888_v58 = vshrl.u32 %v2883_v45, 16 }
 0x180   : > { %v1090_v49 = vxor.u32 2147483648, %v1089_v1  ;;  %v2896_v31 = vadd.s32 %v2894_v62, %v2892_v14  ;;  %v2916_v8 = vsel %vm2915_vm3, 1, %v10473_v0  ;;  %v8648_v61 = vsel %vm8623_vm5, 0, %v1093_v26  ;;  %7100 = vmatmul.msk.f32.gmra.mxu0 %vm10429_vm6, %v8642_v2  ;;  %7105 = vmatmul.msk.f32.gmra.mxu1 %vm10429_vm6, %v8642_v2 }
 0x181   : > { %10474 = vst [vmem:[#allocation20_spill] sm:$0xff] %v8648_v61  ;;  %v2910_v30 = vshrl.u32 %v8617_v52, 16  ;;  %v2918_v36 = vadd.s32 %v2916_v8, %v2914_v57  ;;  %vm2684_vm8 = vcmp.gt.s32.totalorder %v2683_v9, 0  ;;  %v8657_v45 = vadd.s32 %v2913_v10, %v2909_v24  ;;  %7110 = vmatmul.msk.f32.gmra.mxu2 %vm10429_vm6, %v8642_v2  ;;  %v8673_v10 = vpop.permute.xlu1 %5459 }
 0x182   : > { %v1091_v12 = vsel %vm970_vm12, %v1090_v49, %v1089_v1  ;;  %v2897_v14 = vadd.s32 %v2896_v31, %v2886_v41  ;;  %v2685_v51 = vsel %vm2684_vm8, %v2683_v9, 0  ;;  %v2867_v1 = vsel %vm2861_vm2, %v2864_v5, %v2866_v6 }
 0x183   : > { %v8662_v26 = vsel %vm8623_vm5, %v8270_v50, %v1091_v12  ;;  %v2919_v52 = vadd.s32 %v2918_v36, %v2908_v22  ;;  %v2687_v15 = vand.u32 31, %v2685_v51  ;;  %v1112_v9 = vadd.s32 3, %v8648_v61 }
 0x184   : > { %v1096_v13 = vmul.f32 %v8662_v26, %v8662_v26  ;;  %v8670_v33 = vadd.s32 %v2897_v14, %v2888_v58  ;;  %v10475_v24 = vand.u32 2147483647, %v8485_v35  ;;  %v2921_v5 = vmul.u32 %v8541_v42, %v2867_v1 }
 0x185   : > { %v2920_v23 = vadd.s32 %v2919_v52, %v2910_v30  ;;  %v8677_v21 = vsub.s32 32, %v2687_v15  ;;  %v8682_v44 = vshrl.u32 %v2685_v51, 5  ;;  %v10476_v3 = vmov 683565275  }
 0x186   : > { %v2680_v20 = vand.u32 8388607, %v10475_v24  ;;  %v1097_v41 = vmul.f32 -0.001358992, %v1096_v13  ;;  %v1104_v19 = vmul.f32 -0.00019511016, %v1096_v13  ;;  %vm2923_vm12 = vc.u32 %v8670_v33, %v8657_v45 }
 0x187   : > { %v2924_v6 = vadd.s32 1, %v2920_v23  ;;  %v2690_v62 = vshll.u32 %v10476_v3, %v2687_v15  ;;  %v10477_v22 = vmov 2475754826   ;;  %v2694_v8 = vshrl.u32 %v10466_v60, %v8677_v21 }
 0x188   : > { %v2691_v57 = vshrl.u32 %v10477_v22, %v8677_v21  ;;  %v1098_v49 = vadd.f32 0.041655596, %v1097_v41  ;;  %v1105_v58 = vadd.f32 0.008332121, %v1104_v19  ;;  %v2693_v31 = vshll.u32 %v10477_v22, %v2687_v15  ;;  %7101 = vmatmul.msk.f32.gmra.mxu0 %vm10429_vm6, %v8673_v10  ;;  %7106 = vmatmul.msk.f32.gmra.mxu1 %vm10429_vm6, %v8673_v10 }
 0x189   : > { %v2925_v30 = vsel %vm2923_vm12, %v2924_v6, %v2920_v23  ;;  %v2696_v42 = vshll.u32 %v10466_v60, %v2687_v15  ;;  %v10478_v36 = vmov 2102212464   ;;  %v2681_v24 = vor.u32 8388608, %v2680_v20  ;;  %7111 = vmatmul.msk.f32.gmra.mxu2 %vm10429_vm6, %v8673_v10 }
 0x18a   : > { %v2697_v12 = vshrl.u32 %v10478_v36, %v8677_v21  ;;  %v2699_v14 = vshll.u32 %v10478_v36, %v2687_v15  ;;  %v1099_v51 = vmul.f32 %v1098_v49, %v1096_v13  ;;  %v1106_v1 = vmul.f32 %v1105_v58, %v1096_v13 }
 0x18b   : > { %v2926_v52 = vadd.s32 %v2925_v30, %v2921_v5  ;;  %v1113_v41 = vand.u32 3, %v1112_v9  ;;  %v8700_v23 = vor.u32 %v2691_v57, %v2690_v62  ;;  %v2700_v19 = vshrl.u32 %v10467_v37, %v8677_v21 }
 0x18c   : > { %v2702_v6 = vshll.u32 %v10467_v37, %v2687_v15  ;;  %v1100_v49 = vadd.f32 -0.4999988, %v1099_v51  ;;  %v1107_v58 = vadd.f32 -0.16666654, %v1106_v1  ;;  %v2703_v27 = vshrl.u32 %v10440_v56, %v8677_v21  ;;  %v8712_v15 = vpop.permute.xlu1 %5461 }
 0x18d   : > { %v2927_v43 = vadd.s32 536870912, %v2926_v52  ;;  %v8707_v61 = vor.u32 %v2694_v8, %v2693_v31  ;;  %v2698_v20 = vor.u32 %v2697_v12, %v2696_v42  ;;  %v2701_v9 = vor.u32 %v2700_v19, %v2699_v14  ;;  %v8743_v19 = vld.sshfl [vmem:[#allocation1 + $0x20] sm:$0xff pattern:$0x75316420] }
 0x18e   : > { %vm2705_vm2 = vcmp.lt.s32.totalorder %v8682_v44, 1  ;;  %v1101_v5 = vmul.f32 %v1100_v49, %v1096_v13  ;;  %v1108_v62 = vmul.f32 %v1107_v58, %v1096_v13  ;;  %v2704_v30 = vor.u32 %v2703_v27, %v2702_v6 }
 0x18f   : > { %v8710_v57 = vshrl.u32 %v2927_v43, 30  ;;  %vm1114_vm0 = vcmp.lt.s32.totalorder %v1113_v41, 2  ;;  %vm1118_vm5 = vcmp.eq.s32.totalorder %v1113_v41, 2  ;;  %vm2708_vm4 = vcmp.lt.s32.totalorder %v8682_v44, 4 }
 0x190   : > { %v8715_v51 = vshll.u32 %v2681_v24, 8  ;;  %v8717_v1 = vadd.f32 1.0, %v1101_v5  ;;  %v1109_v31 = vadd.f32 1.0, %v1108_v62  ;;  %vm2707_vm15 = vcmp.lt.s32.totalorder %v8682_v44, 3  ;;  %7102 = vmatmul.msk.f32.gmra.mxu0 %vm10429_vm6, %v8712_v15  ;;  %7107 = vmatmul.msk.f32.gmra.mxu1 %vm10429_vm6, %v8712_v15 }
 0x191   : > { %v2929_v8 = vshll.u32 %v8710_v57, 30  ;;  %vm2706_vm11 = vcmp.lt.s32.totalorder %v8682_v44, 2  ;;  %v2713_v43 = vsel %vm2705_vm2, %v8700_v23, %v8707_v61  ;;  %v2714_v27 = vsel %vm2708_vm4, %v2701_v9, 920167782  ;;  %7112 = vmatmul.msk.f32.gmra.mxu2 %vm10429_vm6, %v8712_v15 }
 0x192   : > { %10479 = vst [vmem:[#allocation21_spill] sm:$0xff] %v8717_v1  ;;  %v2718_v13 = vsel %vm2708_vm4, %v2704_v30, 1326507024  ;;  %v8731_v42 = vmul.f32 %v1109_v31, %v8662_v26  ;;  %v10413_v12 = vxor.u32 2147483648, %v8717_v1  ;;  %v2717_v24 = vsel %vm2705_vm2, %v8707_v61, %v2698_v20 }
 0x193   : > { %v8738_v14 = vsub.s32 %v2926_v52, %v2929_v8  ;;  %vm1115_vm3 = vcmp.eq.s32.totalorder %v1113_v41, 0  ;;  %v2715_v26 = vsel %vm2707_vm15, %v2698_v20, %v2714_v27  ;;  %v2719_v6 = vsel %vm2707_vm15, %v2701_v9, %v2718_v13  ;;  %v8752_v52 = vld.sshfl [vmem:[#allocation1 + $0x28] sm:$0xff pattern:$0x75316420] }
 0x194   : > { %10480 = vst [vmem:[#allocation22_spill] sm:$0xff] %v8731_v42  ;;  %v2723_v49 = vshrl.u32 %v8715_v51, 16  ;;  %v10419_v58 = vxor.u32 2147483648, %v8731_v42  ;;  %v1120_v5 = vsel %vm1118_vm5, %v10413_v12, %v8731_v42  ;;  %vm10425_vm12 = vweird.f32 %v8270_v50 }
 0x195   : > { %vm2931_vm8 = vcmp.lt.s32.totalorder %v8738_v14, 0  ;;  %v2932_v62 = vsub.s32 0, %v8738_v14  ;;  %5737 = vst [vmem:[#allocation1 + $0x20] ss:$2 sm:$0xff] %v8443_v7  ;;  %v2716_v9 = vsel %vm2706_vm11, %v2713_v43, %v2715_v26  ;;  %v2720_v30 = vsel %vm2706_vm11, %v2717_v24, %v2719_v6 }
 0x196   : > { %v2722_v31 = vand.u32 65535, %v8715_v51  ;;  %v1117_v8 = vsel %vm1115_vm3, %v8717_v1, %v10419_v58  ;;  %v2724_v13 = vand.u32 65535, %v2720_v30  ;;  %v2725_v39 = vshrl.u32 %v2720_v30, 16 }
 0x197   : > { %v2933_v27 = vsel %vm2931_vm8, %v2932_v62, %v8738_v14  ;;  %v1121_v12 = vsel %vm1114_vm0, %v1117_v8, %v1120_v5  ;;  %v2746_v26 = vand.u32 65535, %v2716_v9  ;;  %v2747_v24 = vshrl.u32 %v2716_v9, 16 }
 0x198   : > { %v2934_v7 = vclz %v2933_v27  ;;  %v1122_v55 = vsel %vm10425_vm12, nan, %v1121_v12  ;;  %v8775_v43 = vmul.u32 %v2724_v13, %v2723_v49  ;;  %v2726_v63 = vmul.u32 %v2724_v13, %v2722_v31 }
 0x199   : > { %5599 = vmatpush.msra.mxu3 %v1122_v55  ;;  %v2727_v42 = vmul.u32 %v2725_v39, %v2722_v31  ;;  %vm2830_vm5 = vcmp.lt.s32.totalorder %v8455_v46, 0  ;;  %v2922_v41 = vadd.s32 %v8657_v45, %v8670_v33  ;;  %v2689_v5 = vshrl.u32 %v10476_v3, %v8677_v21 }
 0x19a   : > { %v7048_v6 = vadd.s32 4294967294, %v2934_v7  ;;  %7114 = vmatmul.msk.f32.vlgmr.msra.gmra.mxu3 %vm10429_vm6, %v8605_v38  ;;  %v2710_v55 = vsel %vm2708_vm4, %v2698_v20, 2102212464  ;;  %v2729_v62 = vmul.u32 %v2725_v39, %v2723_v49  ;;  %v2732_v8 = vshll.u32 %v8775_v43, 16 }
 0x19b   : > { %v2730_v9 = vshll.u32 %v2727_v42, 16  ;;  %v2749_v27 = vmul.u32 %v2747_v24, %v2722_v31  ;;  %v2750_v13 = vmul.u32 %v2746_v26, %v2723_v49  ;;  %v10481_v7 = vand.u32 2147483647, %v8455_v46 }
 0x19c   : > { %vm7049_vm0 = vcmp.lt.s32.totalorder %v7048_v6, 0  ;;  %v2709_v39 = vsel %vm2705_vm2, %v2689_v5, %v8700_v23  ;;  %v464_v12 = vrot.slane %v8743_v19, 7  ;;  %v2751_v23 = vmul.u32 %v2747_v24, %v2723_v49 }
 0x19d   : > { %v2937_v30 = vsel %vm7049_vm0, 0, %v7048_v6  ;;  %vm8790_vm3 = vcmp.le.f32.partialorder %v10481_v7, 0.7853982  ;;  %vm2734_vm8 = vc.u32 %v2726_v63, %v2730_v9  ;;  %v2748_v6 = vmul.u32 %v2746_v26, %v2722_v31 }
 0x19e   : > { %v2938_v33 = vsub.s32 32, %v2937_v30  ;;  %v2939_v21 = vshll.u32 %v8738_v14, %v2937_v30  ;;  %v2942_v58 = vsub.s32 4294967266, %v2937_v30  ;;  %v2735_v20 = vsel %vm2734_vm8, 1, %v10473_v0 }
 0x19f   : > { %v2952_v7 = vsub.s32 4, %v8710_v57  ;;  %v2736_v59 = vadd.s32 %v2730_v9, %v2726_v63  ;;  %v2711_v14 = vsel %vm2707_vm15, %v8707_v61, %v2710_v55  ;;  %v2737_v30 = vadd.s32 %v2735_v20, %v2729_v62 }
 0x1a0   : > { %v2940_v50 = vshrl.u32 %v2922_v41, %v2938_v33  ;;  %v2943_v1 = vadd.s32 127, %v2942_v58  ;;  %v2752_v40 = vshll.u32 %v2749_v27, 16  ;;  %v2754_v28 = vshll.u32 %v2750_v13, 16 }
 0x1a1   : > { %vm2738_vm2 = vc.u32 %v2736_v59, %v2732_v8  ;;  %v2731_v19 = vshrl.u32 %v2727_v42, 16  ;;  %v2953_v61 = vsel %vm2830_vm5, %v2952_v7, %v8710_v57  ;;  %v10484_v41 = vrot.slane %v8610_v54, 2 }
 0x1a2   : > { %v2941_v16 = vor.u32 %v2940_v50, %v2939_v21  ;;  %v2944_v38 = vshll.u32 %v2943_v1, 23  ;;  %7115 = vmatmul.msk.f32.gmra.mxu3 %vm10429_vm6, %v8642_v2  ;;  %v2739_v58 = vsel %vm2738_vm2, 1, %v10473_v0  ;;  %vm2756_vm4 = vc.u32 %v2748_v6, %v2752_v40 }
 0x1a3   : > { %v2758_v31 = vadd.s32 %v2752_v40, %v2748_v6  ;;  %vm10485_vm15 = vcmask 1040384   ;;  %v2733_v59 = vshrl.u32 %v8775_v43, 16  ;;  %v2741_v1 = vadd.s32 %v2739_v58, %v2737_v30 }
 0x1a4   : > { %v2945_v63 = vor.u32 4788187, %v2944_v38  ;;  %v2948_v26 = vcvt.s32.f32 %v2941_v16  ;;  %v8813_v50 = vsel %vm10485_vm15, %v10484_v41, %v464_v12  ;;  %v2757_v42 = vsel %vm2756_vm4, 1, %v10473_v0  ;;  %vm10486_vm2 = vmmov %vm10485_vm15 }
 0x1a5   : > { %vm2760_vm0 = vc.u32 %v2758_v31, %v2754_v28  ;;  %v2753_v24 = vshrl.u32 %v2749_v27, 16  ;;  %v2759_v40 = vadd.s32 %v2757_v42, %v2751_v23  ;;  %v2955_v38 = vsel %vm8790_vm3, 0, %v2953_v61 }
 0x1a6   : > { %v2946_v49 = vand.u32 2147483647, %v2945_v63  ;;  %v2761_v16 = vsel %vm2760_vm0, 1, %v10473_v0  ;;  %v2742_v57 = vadd.s32 %v2741_v1, %v2731_v19  ;;  %v2366_v5 = vand.u32 2139095040, %v8813_v50 }
 0x1a7   : > { %v2712_v12 = vsel %vm2706_vm11, %v2709_v39, %v2711_v14  ;;  %v2755_v43 = vshrl.u32 %v2750_v13, 16  ;;  %v2763_v62 = vadd.s32 %v2761_v16, %v2759_v40  ;;  %v2762_v8 = vadd.s32 %v2758_v31, %v2754_v28 }
 0x1a8   : > { %v2949_v55 = vmul.f32 %v2948_v26, %v2946_v49  ;;  %v2743_v9 = vadd.s32 %v2742_v57, %v2733_v59  ;;  %v2363_v33 = vand.u32 2147483647, %v8813_v50  ;;  %v2367_v27 = vshrl.u32 %v2366_v5, 23 }
 0x1a9   : > { %v2972_v20 = vadd.s32 3, %v2955_v38  ;;  %v2764_v6 = vadd.s32 %v2763_v62, %v2753_v24  ;;  %v2766_v44 = vmul.u32 %v8715_v51, %v2712_v12  ;;  %v8836_v31 = vand.u32 3, %v2955_v38 }
 0x1aa   : > { %v2950_v21 = vxor.u32 2147483648, %v2949_v55  ;;  %7116 = vmatmul.msk.f32.gmra.mxu3 %vm10429_vm6, %v8673_v10  ;;  %v7038_v7 = vadd.s32 4294967169, %v2367_v27  ;;  %vm2768_vm11 = vc.u32 %v2743_v9, %v2762_v8  ;;  %v2370_v13 = vand.u32 8388607, %v2363_v33 }
 0x1ab   : > { %v2765_v23 = vadd.s32 %v2764_v6, %v2755_v43  ;;  %v8834_v19 = vand.u32 3, %v2972_v20  ;;  %v430_v63 = vrot.slane %v8619_v53, 2  ;;  %v465_v51 = vrot.slane %v8752_v52, 7 }
 0x1ac   : > { %v2951_v30 = vsel %vm2830_vm5, %v2950_v21, %v2949_v55  ;;  %v2373_v39 = vadd.s32 1, %v7038_v7  ;;  %v2371_v1 = vor.u32 8388608, %v2370_v13  ;;  %vm5439_vm15 = vcmp.eq.s32.totalorder %v8836_v31, 0 }
 0x1ad   : > { %v2954_v28 = vsel %vm8790_vm3, %v8455_v46, %v2951_v30  ;;  %v2769_v58 = vadd.s32 1, %v2765_v23  ;;  %vm2978_vm5 = vcmp.eq.s32.totalorder %v8834_v19, 2  ;;  %vm5442_vm3 = vcmp.eq.s32.totalorder %v8836_v31, 2 }
 0x1ae   : > { %v2956_v14 = vmul.f32 %v2954_v28, %v2954_v28  ;;  %vm2374_vm8 = vcmp.gt.s32.totalorder %v2373_v39, 0  ;;  %v8847_v52 = vsel %vm10486_vm2, %v430_v63, %v465_v51  ;;  %vm2975_vm4 = vcmp.eq.s32.totalorder %v8834_v19, 0 }
 0x1af   : > { %v2770_v45 = vsel %vm2768_vm11, %v2769_v58, %v2765_v23  ;;  %v2375_v41 = vsel %vm2374_vm8, %v2373_v39, 0  ;;  %v8851_v5 = vadd.s32 %v2762_v8, %v2743_v9  ;;  %v8855_v12 = vshll.u32 %v2371_v1, 8 }
 0x1b0   : > { %v2957_v26 = vmul.f32 -0.001358992, %v2956_v14  ;;  %v2964_v61 = vmul.f32 -0.00019511016, %v2956_v14  ;;  %v2771_v59 = vadd.s32 %v2770_v45, %v2766_v44  ;;  %v2377_v42 = vand.u32 31, %v2375_v41 }
 0x1b1   : > { %v10430_v43 = vand.u32 2147483647, %v8847_v52  ;;  %vm2974_vm0 = vcmp.lt.s32.totalorder %v8834_v19, 2  ;;  %vm5438_vm11 = vcmp.lt.s32.totalorder %v8836_v31, 2  ;;  %vm2971_vm8 = vweird.f32 %v8455_v46 }
 0x1b2   : > { %v2958_v49 = vadd.f32 0.041655596, %v2957_v26  ;;  %v2965_v24 = vadd.f32 0.008332121, %v2964_v61  ;;  %7117 = vmatmul.msk.f32.gmra.mxu3 %vm10429_vm6, %v8712_v15  ;;  %v2772_v40 = vadd.s32 536870912, %v2771_v59  ;;  %v2378_v16 = vsub.s32 32, %v2377_v42 }
 0x1b3   : > { %v2380_v21 = vshll.u32 %v10476_v3, %v2377_v42  ;;  %v2389_v8 = vshll.u32 %v10478_v36, %v2377_v42  ;;  %v2521_v7 = vand.u32 2139095040, %v8847_v52  ;;  %v8867_v44 = vshrl.u32 %v2375_v41, 5 }
 0x1b4   : > { %v2959_v38 = vmul.f32 %v2958_v49, %v2956_v14  ;;  %v2966_v57 = vmul.f32 %v2965_v24, %v2956_v14  ;;  %v8853_v55 = vshrl.u32 %v2772_v40, 30  ;;  %v2381_v20 = vshrl.u32 %v10477_v22, %v2378_v16 }
 0x1b5   : > { %v2390_v6 = vshrl.u32 %v10467_v37, %v2378_v16  ;;  %v2383_v13 = vshll.u32 %v10477_v22, %v2377_v42  ;;  %v2384_v58 = vshrl.u32 %v10466_v60, %v2378_v16  ;;  %v2386_v51 = vshll.u32 %v10466_v60, %v2377_v42 }
 0x1b6   : > { %v2960_v62 = vadd.f32 -0.4999988, %v2959_v38  ;;  %v2967_v27 = vadd.f32 -0.16666654, %v2966_v57  ;;  %v2774_v9 = vshll.u32 %v8853_v55, 30  ;;  %v2387_v26 = vshrl.u32 %v10478_v36, %v2378_v16 }
 0x1b7   : > { %vm2675_vm2 = vcmp.lt.s32.totalorder %v8485_v35, 0  ;;  %v2382_v1 = vor.u32 %v2381_v20, %v2380_v21  ;;  %v8877_v49 = vand.u32 65535, %v8855_v12  ;;  %v2391_v41 = vor.u32 %v2390_v6, %v2389_v8 }
 0x1b8   : > { %v2961_v30 = vmul.f32 %v2960_v62, %v2956_v14  ;;  %v2968_v23 = vmul.f32 %v2967_v27, %v2956_v14  ;;  %v8870_v39 = vsub.s32 %v2771_v59, %v2774_v9  ;;  %v2392_v59 = vshll.u32 %v10467_v37, %v2377_v42 }
 0x1b9   : > { %v2393_v38 = vshrl.u32 %v10440_v56, %v2378_v16  ;;  %vm2398_vm9 = vcmp.lt.s32.totalorder %v8867_v44, 4  ;;  %v10487_v57 = vand.u32 2147483647, %v8485_v35  ;;  %v2385_v21 = vor.u32 %v2384_v58, %v2383_v13 }
 0x1ba   : > { %v2962_v61 = vadd.f32 1.0, %v2961_v30  ;;  %v2969_v45 = vadd.f32 1.0, %v2968_v23  ;;  %vm2776_vm12 = vcmp.lt.s32.totalorder %v8870_v39, 0  ;;  %v2777_v14 = vsub.s32 0, %v8870_v39 }
 0x1bb   : > { %vm8886_vm14 = vcmp.le.f32.partialorder %v10487_v57, 0.7853982  ;;  %v2388_v20 = vor.u32 %v2387_v26, %v2386_v51  ;;  %vm2395_vm10 = vcmp.lt.s32.totalorder %v8867_v44, 1  ;;  %v2797_v6 = vsub.s32 4, %v8853_v55 }
 0x1bc   : > { %v2970_v24 = vmul.f32 %v2969_v45, %v2954_v28  ;;  %v2979_v40 = vxor.u32 2147483648, %v2962_v61  ;;  %v2778_v27 = vsel %vm2776_vm12, %v2777_v14, %v8870_v39  ;;  %v2379_v30 = vshrl.u32 %v10476_v3, %v2378_v16 }
 0x1bd   : > { %v2779_v8 = vclz %v2778_v27  ;;  %vm2397_vm6 = vcmp.lt.s32.totalorder %v8867_v44, 3  ;;  %v2404_v23 = vsel %vm2398_vm9, %v2391_v41, 920167782  ;;  %v2394_v26 = vor.u32 %v2393_v38, %v2392_v59 }
 0x1be   : > { %v2976_v9 = vxor.u32 2147483648, %v2970_v24  ;;  %v2980_v28 = vsel %vm2978_vm5, %v2979_v40, %v2970_v24  ;;  %v5444_v42 = vsel %vm5442_vm3, %v2979_v40, %v2970_v24  ;;  %vm2396_vm12 = vcmp.lt.s32.totalorder %v8867_v44, 2 }
 0x1bf   : > { %v7045_v51 = vadd.s32 4294967294, %v2779_v8  ;;  %v2403_v16 = vsel %vm2395_vm10, %v2382_v1, %v2385_v21  ;;  %v2405_v19 = vsel %vm2397_vm6, %v2388_v20, %v2404_v23  ;;  %v2400_v59 = vsel %vm2398_vm9, %v2388_v20, 2102212464 }
 0x1c0   : > { %v2977_v13 = vsel %vm2975_vm4, %v2962_v61, %v2976_v9  ;;  %v5441_v58 = vsel %vm5439_vm15, %v2962_v61, %v2976_v9  ;;  %v2798_v61 = vsel %vm2675_vm2, %v2797_v6, %v8853_v55  ;;  %v2407_v38 = vsel %vm2395_vm10, %v2385_v21, %v2388_v20 }
 0x1c1   : > { %v2981_v45 = vsel %vm2974_vm0, %v2977_v13, %v2980_v28  ;;  %v5445_v14 = vsel %vm5438_vm11, %v5441_v58, %v5444_v42  ;;  %vm7046_vm5 = vcmp.lt.s32.totalorder %v7045_v51, 0  ;;  %v2408_v9 = vsel %vm2398_vm9, %v2394_v26, 1326507024 }
 0x1c2   : > { %v2982_v24 = vsel %vm2971_vm8, nan, %v2981_v45  ;;  %v8916_v40 = vsel %vm2971_vm8, nan, %v5445_v14  ;;  %v2782_v31 = vsel %vm7046_vm5, 0, %v7045_v51  ;;  %v2406_v28 = vsel %vm2396_vm12, %v2403_v16, %v2405_v19 }
 0x1c3   : > { %7133 = vmatpush.msk.msrb.mxu3 %vm5472_vm13, %v2982_v24  ;;  %v2783_v46 = vsub.s32 32, %v2782_v31  ;;  %v2784_v57 = vshll.u32 %v8870_v39, %v2782_v31  ;;  %v2787_v27 = vsub.s32 4294967266, %v2782_v31  ;;  %v2409_v42 = vsel %vm2397_vm6, %v2391_v41, %v2408_v9 }
 0x1c4   : > { %v2413_v55 = vshrl.u32 %v8855_v12, 16  ;;  %v2522_v8 = vshrl.u32 %v2521_v7, 23  ;;  %v8939_v20 = vsel %vm8886_vm14, 0, %v2798_v61  ;;  %v2410_v39 = vsel %vm2396_vm12, %v2407_v38, %v2409_v42 }
 0x1c5   : > { %v2785_v6 = vshrl.u32 %v8851_v5, %v2783_v46  ;;  %v2788_v23 = vadd.s32 127, %v2787_v27  ;;  %v2399_v13 = vsel %vm2395_vm10, %v2379_v30, %v2382_v1  ;;  %v2401_v58 = vsel %vm2397_vm6, %v2385_v21, %v2400_v59 }
 0x1c6   : > { %v2414_v41 = vand.u32 65535, %v2410_v39  ;;  %v2415_v51 = vshrl.u32 %v2410_v39, 16  ;;  %v2436_v45 = vand.u32 65535, %v2406_v28  ;;  %v2437_v5 = vshrl.u32 %v2406_v28, 16 }
 0x1c7   : > { %v2786_v26 = vor.u32 %v2785_v6, %v2784_v57  ;;  %v2789_v7 = vshll.u32 %v2788_v23, 23  ;;  %v7041_v19 = vadd.s32 4294967169, %v2522_v8  ;;  %v8951_v1 = vsel %vm2396_vm12, %v2399_v13, %v2401_v58 }
 0x1c8   : > { %v2416_v14 = vmul.u32 %v2414_v41, %v8877_v49  ;;  %v2417_v16 = vmul.u32 %v2415_v51, %v8877_v49  ;;  %v2418_v24 = vmul.u32 %v2414_v41, %v2413_v55  ;;  %v8955_v21 = vand.u32 8388607, %v10430_v43 }
 0x1c9   : > { %v2790_v31 = vor.u32 4788187, %v2789_v7  ;;  %v2793_v61 = vcvt.s32.f32 %v2786_v26  ;;  %v2817_v30 = vadd.s32 3, %v8939_v20  ;;  %v2419_v59 = vmul.u32 %v2415_v51, %v2413_v55 }
 0x1ca   : > { %v2420_v38 = vshll.u32 %v2417_v16, 16  ;;  %v2422_v46 = vshll.u32 %v2418_v24, 16  ;;  %v2438_v27 = vmul.u32 %v2436_v45, %v8877_v49  ;;  %v2439_v9 = vmul.u32 %v2437_v5, %v8877_v49 }
 0x1cb   : > { %v2791_v57 = vand.u32 2147483647, %v2790_v31  ;;  %v2440_v28 = vmul.u32 %v2436_v45, %v2413_v55  ;;  %v2421_v42 = vshrl.u32 %v2417_v16, 16  ;;  %v2528_v8 = vadd.s32 1, %v7041_v19 }
 0x1cc   : > { %vm2424_vm10 = vc.u32 %v2416_v14, %v2420_v38  ;;  %v2426_v44 = vadd.s32 %v2420_v38, %v2416_v14  ;;  %v2441_v39 = vmul.u32 %v2437_v5, %v2413_v55  ;;  %v2442_v13 = vshll.u32 %v2439_v9, 16 }
 0x1cd   : > { %v2794_v6 = vmul.f32 %v2793_v61, %v2791_v57  ;;  %v2425_v23 = vsel %vm2424_vm10, 1, %v10473_v0  ;;  %v2423_v58 = vshrl.u32 %v2418_v24, 16  ;;  %v2444_v51 = vshll.u32 %v2440_v28, 16 }
 0x1ce   : > { %v2427_v41 = vadd.s32 %v2425_v23, %v2419_v59  ;;  %vm2428_vm9 = vc.u32 %v2426_v44, %v2422_v46  ;;  %vm2446_vm6 = vc.u32 %v2438_v27, %v2442_v13  ;;  %v2448_v31 = vadd.s32 %v2442_v13, %v2438_v27 }
 0x1cf   : > { %v2795_v26 = vxor.u32 2147483648, %v2794_v6  ;;  %v2429_v7 = vsel %vm2428_vm9, 1, %v10473_v0  ;;  %v2443_v45 = vshrl.u32 %v2439_v9, 16  ;;  %v2447_v16 = vsel %vm2446_vm6, 1, %v10473_v0 }
 0x1d0   : > { %v2431_v49 = vadd.s32 %v2429_v7, %v2427_v41  ;;  %vm2529_vm3 = vcmp.gt.s32.totalorder %v2528_v8, 0  ;;  %v2449_v19 = vadd.s32 %v2447_v16, %v2441_v39  ;;  %vm2450_vm4 = vc.u32 %v2448_v31, %v2444_v51 }
 0x1d1   : > { %v2796_v14 = vsel %vm2675_vm2, %v2795_v26, %v2794_v6  ;;  %v8965_v55 = vadd.s32 %v2448_v31, %v2444_v51  ;;  %v2451_v61 = vsel %vm2450_vm4, 1, %v10473_v0  ;;  %v2530_v59 = vsel %vm2529_vm3, %v2528_v8, 0 }
 0x1d2   : > { %v2799_v5 = vsel %vm8886_vm14, %v8485_v35, %v2796_v14  ;;  %v2432_v24 = vadd.s32 %v2431_v49, %v2421_v42  ;;  %v2445_v46 = vshrl.u32 %v2440_v28, 16  ;;  %v2453_v57 = vadd.s32 %v2451_v61, %v2449_v19 }
 0x1d3   : > { %v2801_v38 = vmul.f32 %v2799_v5, %v2799_v5  ;;  %v2532_v27 = vand.u32 31, %v2530_v59  ;;  %v2526_v44 = vor.u32 8388608, %v8955_v21  ;;  %v8976_v41 = vand.u32 3, %v2817_v30 }
 0x1d4   : > { %v8971_v9 = vadd.s32 %v2432_v24, %v2423_v58  ;;  %v2454_v39 = vadd.s32 %v2453_v57, %v2443_v45  ;;  %v2456_v62 = vmul.u32 %v8855_v12, %v8951_v1  ;;  %v5283_v45 = vand.u32 3, %v8939_v20 }
 0x1d5   : > { %v2802_v6 = vmul.f32 -0.001358992, %v2801_v38  ;;  %v2809_v23 = vmul.f32 -0.00019511016, %v2801_v38  ;;  %v8974_v13 = vsub.s32 32, %v2532_v27  ;;  %v2535_v28 = vshll.u32 %v10476_v3, %v2532_v27 }
 0x1d6   : > { %vm2458_vm14 = vc.u32 %v8971_v9, %v8965_v55  ;;  %v2455_v58 = vadd.s32 %v2454_v39, %v2445_v46  ;;  %v2538_v21 = vshll.u32 %v10477_v22, %v2532_v27  ;;  %v2541_v26 = vshll.u32 %v10466_v60, %v2532_v27 }
 0x1d7   : > { %v2803_v42 = vadd.f32 0.041655596, %v2802_v6  ;;  %v2810_v8 = vadd.f32 0.008332121, %v2809_v23  ;;  %v2536_v51 = vshrl.u32 %v10477_v22, %v8974_v13  ;;  %v2539_v30 = vshrl.u32 %v10466_v60, %v8974_v13 }
 0x1d8   : > { %v2542_v12 = vshrl.u32 %v10478_v36, %v8974_v13  ;;  %v2459_v31 = vadd.s32 1, %v2455_v58  ;;  %v2544_v49 = vshll.u32 %v10478_v36, %v2532_v27  ;;  %vm2820_vm15 = vcmp.eq.s32.totalorder %v8976_v41, 0 }
 0x1d9   : > { %v2804_v1 = vmul.f32 %v2803_v42, %v2801_v38  ;;  %v2811_v7 = vmul.f32 %v2810_v8, %v2801_v38  ;;  %vm2823_vm0 = vcmp.eq.s32.totalorder %v8976_v41, 2  ;;  %v8995_v16 = vshrl.u32 %v2530_v59, 5 }
 0x1da   : > { %v2545_v14 = vshrl.u32 %v10467_v37, %v8974_v13  ;;  %vm2819_vm11 = vcmp.lt.s32.totalorder %v8976_v41, 2  ;;  %v2460_v61 = vsel %vm2458_vm14, %v2459_v31, %v2455_v58  ;;  %v9003_v46 = vor.u32 %v2536_v51, %v2535_v28 }
 0x1db   : > { %v2805_v19 = vadd.f32 -0.4999988, %v2804_v1  ;;  %v2812_v24 = vadd.f32 -0.16666654, %v2811_v7  ;;  %vm2816_vm8 = vweird.f32 %v8485_v35  ;;  %v2461_v57 = vadd.s32 %v2460_v61, %v2456_v62 }
 0x1dc   : > { %v2546_v6 = vor.u32 %v2545_v14, %v2544_v49  ;;  %v2547_v20 = vshll.u32 %v10467_v37, %v2532_v27  ;;  %v2548_v59 = vshrl.u32 %v10440_v56, %v8974_v13  ;;  %v9009_v42 = vor.u32 %v2539_v30, %v2538_v21 }
 0x1dd   : > { %v2806_v23 = vmul.f32 %v2805_v19, %v2801_v38  ;;  %v2813_v39 = vmul.f32 %v2812_v24, %v2801_v38  ;;  %v9011_v8 = vor.u32 %v2542_v12, %v2541_v26  ;;  %v2462_v1 = vadd.s32 536870912, %v2461_v57 }
 0x1de   : > { %vm2550_vm2 = vcmp.lt.s32.totalorder %v8995_v16, 1  ;;  %vm2552_vm12 = vcmp.lt.s32.totalorder %v8995_v16, 3  ;;  %v9015_v28 = vshll.u32 %v2526_v44, 8  ;;  %vm5288_vm5 = vcmp.eq.s32.totalorder %v5283_v45, 2 }
 0x1df   : > { %v2807_v62 = vadd.f32 1.0, %v2806_v23  ;;  %v2814_v58 = vadd.f32 1.0, %v2813_v39  ;;  %vm2553_vm10 = vcmp.lt.s32.totalorder %v8995_v16, 4  ;;  %v9018_v27 = vshrl.u32 %v2462_v1, 30 }
 0x1e0   : > { %v2549_v51 = vor.u32 %v2548_v59, %v2547_v20  ;;  %vm2551_vm9 = vcmp.lt.s32.totalorder %v8995_v16, 2  ;;  %v2559_v38 = vsel %vm2553_vm10, %v2546_v6, 920167782  ;;  %v2558_v44 = vsel %vm2550_vm2, %v9003_v46, %v9009_v42 }
 0x1e1   : > { %v2815_v21 = vmul.f32 %v2814_v58, %v2799_v5  ;;  %v2824_v30 = vxor.u32 2147483648, %v2807_v62  ;;  %v2560_v26 = vsel %vm2552_vm12, %v9011_v8, %v2559_v38  ;;  %vm5284_vm6 = vcmp.lt.s32.totalorder %v5283_v45, 2 }
 0x1e2   : > { %vm5285_vm3 = vcmp.eq.s32.totalorder %v5283_v45, 0  ;;  %v2464_v12 = vshll.u32 %v9018_v27, 30  ;;  %v2567_v7 = vand.u32 65535, %v9015_v28  ;;  %v2568_v14 = vshrl.u32 %v9015_v28, 16 }
 0x1e3   : > { %v2821_v31 = vxor.u32 2147483648, %v2815_v21  ;;  %v2825_v5 = vsel %vm2823_vm0, %v2824_v30, %v2815_v21  ;;  %v5290_v49 = vsel %vm5288_vm5, %v2824_v30, %v2815_v21  ;;  %v2561_v24 = vsel %vm2551_vm9, %v2558_v44, %v2560_v26 }
 0x1e4   : > { %v2465_v19 = vsub.s32 %v2461_v57, %v2464_v12  ;;  %v2562_v61 = vsel %vm2550_vm2, %v9009_v42, %v9011_v8  ;;  %v2563_v20 = vsel %vm2553_vm10, %v2549_v51, 1326507024  ;;  %v2534_v39 = vshrl.u32 %v10476_v3, %v8974_v13 }
 0x1e5   : > { %v2822_v59 = vsel %vm2820_vm15, %v2807_v62, %v2821_v31  ;;  %v5287_v23 = vsel %vm5285_vm3, %v2807_v62, %v2821_v31  ;;  %v2564_v57 = vsel %vm2552_vm12, %v2546_v6, %v2563_v20  ;;  %v2592_v62 = vshrl.u32 %v2561_v24, 16 }
 0x1e6   : > { %v2826_v1 = vsel %vm2819_vm11, %v2822_v59, %v2825_v5  ;;  %v5291_v58 = vsel %vm5284_vm6, %v5287_v23, %v5290_v49  ;;  %vm2466_vm4 = vcmp.lt.s32.totalorder %v2465_v19, 0  ;;  %v2467_v38 = vsub.s32 0, %v2465_v19 }
 0x1e7   : > { %v2827_v51 = vsel %vm2816_vm8, nan, %v2826_v1  ;;  %v9057_v21 = vsel %vm2816_vm8, nan, %v5291_v58  ;;  %v2565_v13 = vsel %vm2551_vm9, %v2562_v61, %v2564_v57  ;;  %v2591_v45 = vand.u32 65535, %v2561_v24 }
 0x1e8   : > { %7128 = vmatpush.msk.msrb.mxu2 %vm5472_vm13, %v2827_v51  ;;  %v2468_v6 = vsel %vm2466_vm4, %v2467_v38, %v2465_v19  ;;  %v2569_v41 = vand.u32 65535, %v2565_v13  ;;  %v2570_v30 = vshrl.u32 %v2565_v13, 16  ;;  %v2594_v26 = vmul.u32 %v2592_v62, %v2567_v7 }
 0x1e9   : > { %v2469_v44 = vclz %v2468_v6  ;;  %vm2365_vm14 = vcmp.lt.s32.totalorder %v8813_v50, 0  ;;  %v2457_v35 = vadd.s32 %v8965_v55, %v8971_v9  ;;  %v394_v61 = vrot.slane %v8559_v4, 5 }
 0x1ea   : > { %v2571_v12 = vmul.u32 %v2569_v41, %v2567_v7  ;;  %v2572_v31 = vmul.u32 %v2570_v30, %v2567_v7  ;;  %v2573_v5 = vmul.u32 %v2569_v41, %v2568_v14  ;;  %v2554_v20 = vsel %vm2550_vm2, %v2534_v39, %v9003_v46 }
 0x1eb   : > { %v7039_v49 = vadd.s32 4294967294, %v2469_v44  ;;  %v2574_v59 = vmul.u32 %v2570_v30, %v2568_v14  ;;  %v2595_v24 = vmul.u32 %v2591_v45, %v2568_v14  ;;  %vm9071_vm15 = vcmp.le.f32.partialorder %v2363_v33, 0.7853982 }
 0x1ec   : > { %v2575_v23 = vshll.u32 %v2572_v31, 16  ;;  %v2577_v1 = vshll.u32 %v2573_v5, 16  ;;  %v2593_v58 = vmul.u32 %v2591_v45, %v2567_v7  ;;  %v2597_v55 = vshll.u32 %v2594_v26, 16 }
 0x1ed   : > { %vm7040_vm0 = vcmp.lt.s32.totalorder %v7039_v49, 0  ;;  %v2487_v4 = vsub.s32 4, %v9018_v27  ;;  %v2555_v33 = vsel %vm2553_vm10, %v9011_v8, 2102212464  ;;  %v2596_v41 = vmul.u32 %v2592_v62, %v2568_v14 }
 0x1ee   : > { %v2472_v9 = vsel %vm7040_vm0, 0, %v7039_v49  ;;  %vm2579_vm11 = vc.u32 %v2571_v12, %v2575_v23  ;;  %v2581_v38 = vadd.s32 %v2575_v23, %v2571_v12  ;;  %v2599_v30 = vshll.u32 %v2595_v24, 16 }
 0x1ef   : > { %v2473_v51 = vsub.s32 32, %v2472_v9  ;;  %v2474_v46 = vshll.u32 %v2465_v19, %v2472_v9  ;;  %v2477_v39 = vsub.s32 4294967266, %v2472_v9  ;;  %v2580_v13 = vsel %vm2579_vm11, 1, %v10473_v0 }
 0x1f0   : > { %v2582_v6 = vadd.s32 %v2580_v13, %v2574_v59  ;;  %vm2583_vm8 = vc.u32 %v2581_v38, %v2577_v1  ;;  %vm2601_vm2 = vc.u32 %v2593_v58, %v2597_v55  ;;  %v2576_v45 = vshrl.u32 %v2572_v31, 16 }
 0x1f1   : > { %v2475_v44 = vshrl.u32 %v2457_v35, %v2473_v51  ;;  %v2478_v7 = vadd.s32 127, %v2477_v39  ;;  %v2584_v49 = vsel %vm2583_vm8, 1, %v10473_v0  ;;  %v2602_v12 = vsel %vm2601_vm2, 1, %v10473_v0 }
 0x1f2   : > { %v2603_v19 = vadd.s32 %v2597_v55, %v2593_v58  ;;  %v2488_v43 = vsel %vm2365_vm14, %v2487_v4, %v9018_v27  ;;  %v2586_v8 = vadd.s32 %v2584_v49, %v2582_v6  ;;  %v2578_v59 = vshrl.u32 %v2573_v5, 16 }
 0x1f3   : > { %v2476_v23 = vor.u32 %v2475_v44, %v2474_v46  ;;  %v2479_v9 = vshll.u32 %v2478_v7, 23  ;;  %v2604_v14 = vadd.s32 %v2602_v12, %v2596_v41  ;;  %v481_v62 = vsel %vm476_vm1, %v8493_v29, %v394_v61 }
 0x1f4   : > { %vm2605_vm5 = vc.u32 %v2603_v19, %v2599_v30  ;;  %v2556_v1 = vsel %vm2552_vm12, %v9009_v42, %v2555_v33  ;;  %v2598_v58 = vshrl.u32 %v2594_v26, 16  ;;  %v2490_v55 = vsel %vm9071_vm15, 0, %v2488_v43 }
 0x1f5   : > { %v2480_v35 = vor.u32 4788187, %v2479_v9  ;;  %v2483_v31 = vcvt.s32.f32 %v2476_v23  ;;  %v2587_v38 = vadd.s32 %v2586_v8, %v2576_v45  ;;  %v2606_v27 = vsel %vm2605_vm5, 1, %v10473_v0 }
 0x1f6   : > { %v10492_v5 = vrot.slane %v8610_v54, 2  ;;  %v2600_v29 = vshrl.u32 %v2595_v24, 16  ;;  %v2608_v61 = vadd.s32 %v2606_v27, %v2604_v14  ;;  %v2607_v13 = vadd.s32 %v2603_v19, %v2599_v30 }
 0x1f7   : > { %v2481_v51 = vand.u32 2147483647, %v2480_v35  ;;  %v2588_v39 = vadd.s32 %v2587_v38, %v2578_v59  ;;  %v2557_v26 = vsel %vm2551_vm9, %v2554_v20, %v2556_v1  ;;  %v2507_v6 = vadd.s32 3, %v2490_v55 }
 0x1f8   : > { %v9096_v4 = vsel %vm485_vm7, %v481_v62, %v10492_v5  ;;  %v2609_v43 = vadd.s32 %v2608_v61, %v2598_v58  ;;  %v2611_v7 = vmul.u32 %v9015_v28, %v2557_v26  ;;  %v9110_v19 = vand.u32 3, %v2490_v55 }
 0x1f9   : > { %v1126_v46 = vand.u32 2139095040, %v9096_v4  ;;  %v2484_v42 = vmul.f32 %v2483_v31, %v2481_v51  ;;  %vm2613_vm12 = vc.u32 %v2588_v39, %v2607_v13  ;;  %v1123_v24 = vand.u32 2147483647, %v9096_v4 }
 0x1fa   : > { %v2610_v44 = vadd.s32 %v2609_v43, %v2600_v29  ;;  %v9108_v20 = vand.u32 3, %v2507_v6  ;;  %v395_v59 = vrot.slane %v8568_v32, 5  ;;  %vm4980_vm6 = vcmp.eq.s32.totalorder %v9110_v19, 2 }
 0x1fb   : > { %v1127_v33 = vshrl.u32 %v1126_v46, 23  ;;  %v2485_v41 = vxor.u32 2147483648, %v2484_v42  ;;  %v1130_v9 = vand.u32 8388607, %v1123_v24  ;;  %v9119_v55 = vadd.s32 %v2607_v13, %v2588_v39 }
 0x1fc   : > { %v2614_v49 = vadd.s32 1, %v2610_v44  ;;  %vm2513_vm9 = vcmp.eq.s32.totalorder %v9108_v20, 2  ;;  %v482_v27 = vsel %vm476_vm1, %v8502_v34, %v395_v59  ;;  %vm2510_vm3 = vcmp.eq.s32.totalorder %v9108_v20, 0 }
 0x1fd   : > { %v7014_v54 = vadd.s32 4294967169, %v1127_v33  ;;  %v2486_v45 = vsel %vm2365_vm14, %v2485_v41, %v2484_v42  ;;  %v1131_v51 = vor.u32 8388608, %v1130_v9  ;;  %vm4977_vm4 = vcmp.eq.s32.totalorder %v9110_v19, 0 }
 0x1fe   : > { %v2489_v16 = vsel %vm9071_vm15, %v8813_v50, %v2486_v45  ;;  %v2615_v23 = vsel %vm2613_vm12, %v2614_v49, %v2610_v44  ;;  %vm2509_vm14 = vcmp.lt.s32.totalorder %v9108_v20, 2  ;;  %vm4976_vm15 = vcmp.lt.s32.totalorder %v9110_v19, 2 }
 0x1ff   : > { %v1133_v30 = vadd.s32 1, %v7014_v54  ;;  %v2491_v12 = vmul.f32 %v2489_v16, %v2489_v16  ;;  %v2616_v28 = vadd.s32 %v2615_v23, %v2611_v7  ;;  %vm2506_vm0 = vweird.f32 %v8813_v50 }
 0x200   : > { %v9150_v49 = vsel %vm485_vm7, %v482_v27, %v430_v63  ;;  %vm2520_vm2 = vcmp.lt.s32.totalorder %v8847_v52, 0 }
 0x201   : > { %vm1134_vm10 = vcmp.gt.s32.totalorder %v1133_v30, 0  ;;  %v2492_v14 = vmul.f32 -0.001358992, %v2491_v12  ;;  %v2499_v62 = vmul.f32 -0.00019511016, %v2491_v12  ;;  %v2617_v31 = vadd.s32 536870912, %v2616_v28 }
 0x202   : > { %v1135_v8 = vsel %vm1134_vm10, %v1133_v30, 0  ;;  %v1278_v27 = vand.u32 2147483647, %v9150_v49 }
 0x203   : > { %v1137_v35 = vand.u32 31, %v1135_v8  ;;  %v2493_v57 = vadd.f32 0.041655596, %v2492_v14  ;;  %v2500_v1 = vadd.f32 0.008332121, %v2499_v62  ;;  %v9121_v38 = vshrl.u32 %v2617_v31, 30 }
 0x204   : > { %v9129_v46 = vshrl.u32 %v1135_v8, 5 }
 0x205   : > { %v9115_v58 = vsub.s32 32, %v1137_v35  ;;  %v2494_v32 = vmul.f32 %v2493_v57, %v2491_v12  ;;  %v2501_v5 = vmul.f32 %v2500_v1, %v2491_v12  ;;  %v1149_v29 = vshll.u32 %v10478_v36, %v1137_v35 }
 0x206   : > { %v2619_v61 = vshll.u32 %v9121_v38, 30  ;;  %v1140_v39 = vshll.u32 %v10476_v3, %v1137_v35  ;;  %v1143_v13 = vshll.u32 %v10477_v22, %v1137_v35  ;;  %v1146_v41 = vshll.u32 %v10466_v60, %v1137_v35 }
 0x207   : > { %v2495_v42 = vadd.f32 -0.4999988, %v2494_v32  ;;  %v2502_v26 = vadd.f32 -0.16666654, %v2501_v5  ;;  %v1141_v34 = vshrl.u32 %v10477_v22, %v9115_v58  ;;  %v1150_v43 = vshrl.u32 %v10467_v37, %v9115_v58 }
 0x208   : > { %v9140_v33 = vsub.s32 %v2616_v28, %v2619_v61  ;;  %v1144_v6 = vshrl.u32 %v10466_v60, %v9115_v58  ;;  %v1147_v44 = vshrl.u32 %v10478_v36, %v9115_v58  ;;  %v1152_v23 = vshll.u32 %v10467_v37, %v1137_v35 }
 0x209   : > { %v2496_v54 = vmul.f32 %v2495_v42, %v2491_v12  ;;  %v2503_v7 = vmul.f32 %v2502_v26, %v2491_v12  ;;  %v1151_v45 = vor.u32 %v1150_v43, %v1149_v29  ;;  %v1153_v28 = vshrl.u32 %v10440_v56, %v9115_v58 }
 0x20a   : > { %vm2621_vm11 = vcmp.lt.s32.totalorder %v9140_v33, 0  ;;  %v2622_v30 = vsub.s32 0, %v9140_v33  ;;  %v9157_v59 = vor.u32 %v1141_v34, %v1140_v39  ;;  %v9159_v12 = vshll.u32 %v1131_v51, 8 }
 0x20b   : > { %v2497_v9 = vadd.f32 1.0, %v2496_v54  ;;  %v2504_v8 = vadd.f32 1.0, %v2503_v7  ;;  %v9162_v14 = vor.u32 %v1144_v6, %v1143_v13  ;;  %v1148_v63 = vor.u32 %v1147_v44, %v1146_v41 }
 0x20c   : > { %v2623_v53 = vsel %vm2621_vm11, %v2622_v30, %v9140_v33  ;;  %vm1158_vm8 = vcmp.lt.s32.totalorder %v9129_v46, 4  ;;  %vm1155_vm5 = vcmp.lt.s32.totalorder %v9129_v46, 1  ;;  %v1154_v57 = vor.u32 %v1153_v28, %v1152_v23 }
 0x20d   : > { %v2505_v62 = vmul.f32 %v2504_v8, %v2489_v16  ;;  %v2514_v31 = vxor.u32 2147483648, %v2497_v9  ;;  %v2624_v35 = vclz %v2623_v53  ;;  %vm1157_vm12 = vcmp.lt.s32.totalorder %v9129_v46, 3 }
 0x20e   : > { %v1164_v1 = vsel %vm1158_vm8, %v1151_v45, 920167782  ;;  %v2642_v29 = vsub.s32 4, %v9121_v38  ;;  %vm1156_vm10 = vcmp.lt.s32.totalorder %v9129_v46, 2  ;;  %v1163_v61 = vsel %vm1155_vm5, %v9157_v59, %v9162_v14 }
 0x20f   : > { %v2511_v32 = vxor.u32 2147483648, %v2505_v62  ;;  %v2515_v5 = vsel %vm2513_vm9, %v2514_v31, %v2505_v62  ;;  %v4982_v16 = vsel %vm4980_vm6, %v2514_v31, %v2505_v62  ;;  %v7042_v51 = vadd.s32 4294967294, %v2624_v35 }
 0x210   : > { %v1281_v39 = vand.u32 2139095040, %v9150_v49  ;;  %v1165_v26 = vsel %vm1157_vm12, %v1148_v63, %v1164_v1  ;;  %v1168_v41 = vsel %vm1158_vm8, %v1154_v57, 1326507024  ;;  %v1167_v23 = vsel %vm1155_vm5, %v9162_v14, %v1148_v63 }
 0x211   : > { %v2512_v13 = vsel %vm2510_vm3, %v2497_v9, %v2511_v32  ;;  %v4979_v42 = vsel %vm4977_vm4, %v2497_v9, %v2511_v32  ;;  %vm7043_vm9 = vcmp.lt.s32.totalorder %v7042_v51, 0  ;;  %v1166_v19 = vsel %vm1156_vm10, %v1163_v61, %v1165_v26 }
 0x212   : > { %v2516_v34 = vsel %vm2509_vm14, %v2512_v13, %v2515_v5  ;;  %v4983_v43 = vsel %vm4976_vm15, %v4979_v42, %v4982_v16  ;;  %v2627_v6 = vsel %vm7043_vm9, 0, %v7042_v51  ;;  %v1172_v28 = vand.u32 65535, %v9159_v12 }
 0x213   : > { %v2517_v44 = vsel %vm2506_vm0, nan, %v2516_v34  ;;  %v9198_v54 = vsel %vm2506_vm0, nan, %v4983_v43  ;;  %v2628_v7 = vsub.s32 32, %v2627_v6  ;;  %v2629_v30 = vshll.u32 %v9140_v33, %v2627_v6 }
 0x214   : > { %7118 = vmatpush.msk.msrb.mxu0 %vm5472_vm13, %v2517_v44  ;;  %v2632_v20 = vsub.s32 4294967266, %v2627_v6  ;;  %v1169_v50 = vsel %vm1157_vm12, %v1151_v45, %v1168_v41  ;;  %v1197_v8 = vshrl.u32 %v1166_v19, 16  ;;  %v1282_v53 = vshrl.u32 %v1281_v39, 23 }
 0x215   : > { %v2630_v9 = vshrl.u32 %v9119_v55, %v2628_v7  ;;  %v2643_v62 = vsel %vm2520_vm2, %v2642_v29, %v9121_v38  ;;  %v1173_v31 = vshrl.u32 %v9159_v12, 16  ;;  %v1196_v35 = vand.u32 65535, %v1166_v19 }
 0x216   : > { %v2633_v33 = vadd.s32 127, %v2632_v20  ;;  %v10493_v57 = vand.u32 2147483647, %v8847_v52  ;;  %v1139_v45 = vshrl.u32 %v10476_v3, %v9115_v58  ;;  %v1170_v32 = vsel %vm1156_vm10, %v1167_v23, %v1169_v50 }
 0x217   : > { %v2631_v55 = vor.u32 %v2630_v9, %v2629_v30  ;;  %v1174_v16 = vand.u32 65535, %v1170_v32  ;;  %v1175_v51 = vshrl.u32 %v1170_v32, 16  ;;  %v1199_v38 = vmul.u32 %v1197_v8, %v1172_v28 }
 0x218   : > { %vm9217_vm6 = vcmp.le.f32.partialorder %v10493_v57, 0.7853982  ;;  %v2634_v5 = vshll.u32 %v2633_v33, 23  ;;  %v1160_v61 = vsel %vm1158_vm8, %v1148_v63, 2102212464  ;;  %v7017_v39 = vadd.s32 4294967169, %v1282_v53 }
 0x219   : > { %v2645_v29 = vsel %vm9217_vm6, 0, %v2643_v62  ;;  %v9231_v13 = vand.u32 8388607, %v1278_v27  ;;  %v2638_v58 = vcvt.s32.f32 %v2631_v55  ;;  %v1198_v26 = vmul.u32 %v1196_v35, %v1172_v28 }
 0x21a   : > { %v2635_v42 = vor.u32 4788187, %v2634_v5  ;;  %v1200_v34 = vmul.u32 %v1196_v35, %v1173_v31  ;;  %v1159_v43 = vsel %vm1155_vm5, %v1139_v45, %v9157_v59  ;;  %v1176_v6 = vmul.u32 %v1174_v16, %v1172_v28 }
 0x21b   : > { %v1177_v41 = vmul.u32 %v1175_v51, %v1172_v28  ;;  %v1178_v44 = vmul.u32 %v1174_v16, %v1173_v31  ;;  %v1161_v63 = vsel %vm1157_vm12, %v9162_v14, %v1160_v61  ;;  %v1201_v30 = vmul.u32 %v1197_v8, %v1173_v31 }
 0x21c   : > { %v2636_v7 = vand.u32 2147483647, %v2635_v42  ;;  %v1202_v20 = vshll.u32 %v1199_v38, 16  ;;  %v2662_v19 = vadd.s32 3, %v2645_v29  ;;  %v1179_v23 = vmul.u32 %v1175_v51, %v1173_v31 }
 0x21d   : > { %v1180_v9 = vshll.u32 %v1177_v41, 16  ;;  %v1182_v50 = vshll.u32 %v1178_v44, 16  ;;  %v1203_v33 = vshrl.u32 %v1199_v38, 16  ;;  %v1204_v62 = vshll.u32 %v1200_v34, 16 }
 0x21e   : > { %v2639_v53 = vmul.f32 %v2638_v58, %v2636_v7  ;;  %vm1206_vm3 = vc.u32 %v1198_v26, %v1202_v20  ;;  %v1208_v35 = vadd.s32 %v1202_v20, %v1198_v26  ;;  %v1181_v55 = vshrl.u32 %v1177_v41, 16 }
 0x21f   : > { %vm1184_vm4 = vc.u32 %v1176_v6, %v1180_v9  ;;  %v1186_v59 = vadd.s32 %v1180_v9, %v1176_v6  ;;  %v1207_v28 = vsel %vm1206_vm3, 1, %v10473_v0  ;;  %v1183_v8 = vshrl.u32 %v1178_v44, 16 }
 0x220   : > { %v2640_v57 = vxor.u32 2147483648, %v2639_v53  ;;  %v1185_v45 = vsel %vm1184_vm4, 1, %v10473_v0  ;;  %v1209_v14 = vadd.s32 %v1207_v28, %v1201_v30  ;;  %vm1210_vm15 = vc.u32 %v1208_v35, %v1204_v62 }
 0x221   : > { %v1187_v32 = vadd.s32 %v1185_v45, %v1179_v23  ;;  %vm1188_vm14 = vc.u32 %v1186_v59, %v1182_v50  ;;  %v1211_v16 = vsel %vm1210_vm15, 1, %v10473_v0  ;;  %v1288_v51 = vadd.s32 1, %v7017_v39 }
 0x222   : > { %v2641_v31 = vsel %vm2520_vm2, %v2640_v57, %v2639_v53  ;;  %v1189_v5 = vsel %vm1188_vm14, 1, %v10473_v0  ;;  %v1205_v42 = vshrl.u32 %v1200_v34, 16  ;;  %v1213_v58 = vadd.s32 %v1211_v16, %v1209_v14 }
 0x223   : > { %v2644_v38 = vsel %vm9217_vm6, %v8847_v52, %v2641_v31  ;;  %v1191_v61 = vadd.s32 %v1189_v5, %v1187_v32  ;;  %v1162_v6 = vsel %vm1156_vm10, %v1159_v43, %v1161_v63  ;;  %vm1289_vm0 = vcmp.gt.s32.totalorder %v1288_v51, 0 }
 0x224   : > { %v2646_v26 = vmul.f32 %v2644_v38, %v2644_v38  ;;  %v9250_v44 = vadd.s32 %v1208_v35, %v1204_v62  ;;  %v1214_v7 = vadd.s32 %v1213_v58, %v1203_v33  ;;  %v1290_v30 = vsel %vm1289_vm0, %v1288_v51, 0 }
 0x225   : > { %v1192_v41 = vadd.s32 %v1191_v61, %v1181_v55  ;;  %v1292_v39 = vand.u32 31, %v1290_v30  ;;  %v9252_v9 = vand.u32 3, %v2662_v19  ;;  %v1286_v34 = vor.u32 8388608, %v9231_v13 }
 0x226   : > { %v2647_v20 = vmul.f32 -0.001358992, %v2646_v26  ;;  %v2654_v23 = vmul.f32 -0.00019511016, %v2646_v26  ;;  %v1215_v50 = vadd.s32 %v1214_v7, %v1205_v42  ;;  %v1216_v46 = vmul.u32 %v9159_v12, %v1162_v6 }
 0x227   : > { %v9254_v1 = vadd.s32 %v1192_v41, %v1183_v8  ;;  %v9258_v43 = vsub.s32 32, %v1292_v39  ;;  %v5129_v63 = vand.u32 3, %v2645_v29  ;;  %v1295_v62 = vshll.u32 %v10476_v3, %v1292_v39 }
 0x228   : > { %v2648_v53 = vadd.f32 0.041655596, %v2647_v20  ;;  %v2655_v59 = vadd.f32 0.008332121, %v2654_v23  ;;  %v1219_v33 = vadd.s32 1, %v1215_v50  ;;  %v1298_v13 = vshll.u32 %v10477_v22, %v1292_v39 }
 0x229   : > { %vm1218_vm11 = vc.u32 %v9254_v1, %v9250_v44  ;;  %v1296_v35 = vshrl.u32 %v10477_v22, %v9258_v43  ;;  %v1299_v12 = vshrl.u32 %v10466_v60, %v9258_v43  ;;  %v1301_v55 = vshll.u32 %v10466_v60, %v1292_v39 }
 0x22a   : > { %v2649_v19 = vmul.f32 %v2648_v53, %v2646_v26  ;;  %v2656_v28 = vmul.f32 %v2655_v59, %v2646_v26  ;;  %v1220_v57 = vsel %vm1218_vm11, %v1219_v33, %v1215_v50  ;;  %v1302_v29 = vshrl.u32 %v10478_v36, %v9258_v43 }
 0x22b   : > { %vm2664_vm8 = vcmp.lt.s32.totalorder %v9252_v9, 2  ;;  %vm2665_vm2 = vcmp.eq.s32.totalorder %v9252_v9, 0  ;;  %v1221_v8 = vadd.s32 %v1220_v57, %v1216_v46  ;;  %vm2661_vm5 = vweird.f32 %v8847_v52 }
 0x22c   : > { %v2650_v45 = vadd.f32 -0.4999988, %v2649_v19  ;;  %v2657_v14 = vadd.f32 -0.16666654, %v2656_v28  ;;  %vm2668_vm12 = vcmp.eq.s32.totalorder %v9252_v9, 2  ;;  %vm5130_vm10 = vcmp.lt.s32.totalorder %v5129_v63, 2 }
 0x22d   : > { %vm5134_vm9 = vcmp.eq.s32.totalorder %v5129_v63, 2  ;;  %v9275_v32 = vshrl.u32 %v1290_v30, 5  ;;  %v1222_v16 = vadd.s32 536870912, %v1221_v8  ;;  %v1304_v51 = vshll.u32 %v10478_v36, %v1292_v39 }
 0x22e   : > { %v2651_v31 = vmul.f32 %v2650_v45, %v2646_v26  ;;  %v2658_v5 = vmul.f32 %v2657_v14, %v2646_v26  ;;  %v9278_v61 = vor.u32 %v1296_v35, %v1295_v62  ;;  %v9280_v42 = vor.u32 %v1299_v12, %v1298_v13 }
 0x22f   : > { %v1303_v58 = vor.u32 %v1302_v29, %v1301_v55  ;;  %v1305_v6 = vshrl.u32 %v10467_v37, %v9258_v43  ;;  %v1223_v20 = vshrl.u32 %v1222_v16, 30  ;;  %v1307_v23 = vshll.u32 %v10467_v37, %v1292_v39 }
 0x230   : > { %v2652_v41 = vadd.f32 1.0, %v2651_v31  ;;  %v2659_v7 = vadd.f32 1.0, %v2658_v5  ;;  %v1308_v26 = vshrl.u32 %v10440_v56, %v9258_v43  ;;  %vm1310_vm6 = vcmp.lt.s32.totalorder %v9275_v32, 1 }
 0x231   : > { %v1306_v30 = vor.u32 %v1305_v6, %v1304_v51  ;;  %vm1313_vm3 = vcmp.lt.s32.totalorder %v9275_v32, 4  ;;  %v1224_v59 = vshll.u32 %v1223_v20, 30  ;;  %vm1312_vm4 = vcmp.lt.s32.totalorder %v9275_v32, 3 }
 0x232   : > { %v2660_v50 = vmul.f32 %v2659_v7, %v2644_v38  ;;  %v2669_v53 = vxor.u32 2147483648, %v2652_v41  ;;  %vm5131_vm14 = vcmp.eq.s32.totalorder %v5129_v63, 0  ;;  %v9292_v33 = vshll.u32 %v1286_v34, 8 }
 0x233   : > { %v1319_v46 = vsel %vm1313_vm3, %v1306_v30, 920167782  ;;  %v396_v39 = vrot.slane %v8359_v11, 5  ;;  %v1225_v35 = vsub.s32 %v1221_v8, %v1224_v59  ;;  %v1309_v38 = vor.u32 %v1308_v26, %v1307_v23 }
 0x234   : > { %v2666_v62 = vxor.u32 2147483648, %v2660_v50  ;;  %v2670_v19 = vsel %vm2668_vm12, %v2669_v53, %v2660_v50  ;;  %v5136_v28 = vsel %vm5134_vm9, %v2669_v53, %v2660_v50  ;;  %vm1311_vm15 = vcmp.lt.s32.totalorder %v9275_v32, 2 }
 0x235   : > { %v1318_v13 = vsel %vm1310_vm6, %v9278_v61, %v9280_v42  ;;  %v1320_v34 = vsel %vm1312_vm4, %v1303_v58, %v1319_v46  ;;  %vm1226_vm0 = vcmp.lt.s32.totalorder %v1225_v35, 0  ;;  %v1227_v12 = vsub.s32 0, %v1225_v35 }
 0x236   : > { %v2667_v11 = vsel %vm2665_vm2, %v2652_v41, %v2666_v62  ;;  %v5133_v57 = vsel %vm5131_vm14, %v2652_v41, %v2666_v62  ;;  %v1322_v45 = vsel %vm1310_vm6, %v9280_v42, %v1303_v58  ;;  %v1327_v14 = vand.u32 65535, %v9292_v33 }
 0x237   : > { %v2671_v55 = vsel %vm2664_vm8, %v2667_v11, %v2670_v19  ;;  %v5137_v29 = vsel %vm5130_vm10, %v5133_v57, %v5136_v28  ;;  %v1228_v5 = vsel %vm1226_vm0, %v1227_v12, %v1225_v35  ;;  %v1321_v9 = vsel %vm1311_vm15, %v1318_v13, %v1320_v34 }
 0x238   : > { %v2672_v8 = vsel %vm2661_vm5, nan, %v2671_v55  ;;  %v9318_v31 = vsel %vm2661_vm5, nan, %v5137_v29  ;;  %v1229_v63 = vclz %v1228_v5  ;;  %v1247_v16 = vsub.s32 4, %v1223_v20 }
 0x239   : > { %7123 = vmatpush.msk.msrb.mxu1 %vm5472_vm13, %v2672_v8  ;;  %v1323_v51 = vsel %vm1313_vm3, %v1309_v38, 1326507024  ;;  %v1352_v6 = vshrl.u32 %v1321_v9, 16  ;;  %v1328_v7 = vshrl.u32 %v9292_v33, 16  ;;  %v1351_v52 = vand.u32 65535, %v1321_v9 }
 0x23a   : > { %v1324_v41 = vsel %vm1312_vm4, %v1306_v30, %v1323_v51  ;;  %vm1125_vm11 = vcmp.lt.s32.totalorder %v9096_v4, 0  ;;  %v7015_v23 = vadd.s32 4294967294, %v1229_v63  ;;  %v483_v50 = vsel %vm476_vm1, %v8317_v48, %v396_v39 }
 0x23b   : > { %v1325_v26 = vsel %vm1311_vm15, %v1322_v45, %v1324_v41  ;;  %v1217_v53 = vadd.s32 %v9250_v44, %v9254_v1  ;;  %v1354_v62 = vmul.u32 %v1352_v6, %v1327_v14  ;;  %v1248_v30 = vsel %vm1125_vm11, %v1247_v16, %v1223_v20 }
 0x23c   : > { %v1329_v59 = vand.u32 65535, %v1325_v26  ;;  %v1330_v46 = vshrl.u32 %v1325_v26, 16  ;;  %vm7016_vm8 = vcmp.lt.s32.totalorder %v7015_v23, 0  ;;  %v1294_v19 = vshrl.u32 %v10476_v3, %v9258_v43 }
 0x23d   : > { %v1315_v28 = vsel %vm1313_vm3, %v1303_v58, 2102212464  ;;  %v1232_v38 = vsel %vm7016_vm8, 0, %v7015_v23  ;;  %v1355_v48 = vmul.u32 %v1351_v52, %v1328_v7  ;;  %vm9343_vm2 = vcmp.le.f32.partialorder %v1123_v24, 0.7853982 }
 0x23e   : > { %v1331_v13 = vmul.u32 %v1329_v59, %v1327_v14  ;;  %v1332_v34 = vmul.u32 %v1330_v46, %v1327_v14  ;;  %v1233_v1 = vsub.s32 32, %v1232_v38  ;;  %v1234_v39 = vshll.u32 %v1225_v35, %v1232_v38 }
 0x23f   : > { %v1237_v11 = vsub.s32 4294967266, %v1232_v38  ;;  %v1333_v20 = vmul.u32 %v1329_v59, %v1328_v7  ;;  %v1353_v57 = vmul.u32 %v1351_v52, %v1327_v14  ;;  %v1357_v12 = vshll.u32 %v1354_v62, 16 }
 0x240   : > { %v10498_v43 = vrot.slane %v8422_v17, 2  ;;  %v397_v55 = vrot.slane %v8365_v25, 5  ;;  %v1235_v29 = vshrl.u32 %v1217_v53, %v1233_v1  ;;  %v1334_v8 = vmul.u32 %v1330_v46, %v1328_v7 }
 0x241   : > { %v1238_v45 = vadd.s32 127, %v1237_v11  ;;  %v1335_v24 = vshll.u32 %v1332_v34, 16  ;;  %v1336_v5 = vshrl.u32 %v1332_v34, 16  ;;  %v1337_v9 = vshll.u32 %v1333_v20, 16 }
 0x242   : > { %v9350_v58 = vsel %vm485_vm7, %v483_v50, %v10498_v43  ;;  %v1356_v63 = vmul.u32 %v1352_v6, %v1328_v7  ;;  %v1359_v16 = vshll.u32 %v1355_v48, 16  ;;  %v1236_v35 = vor.u32 %v1235_v29, %v1234_v39 }
 0x243   : > { %v1239_v51 = vshll.u32 %v1238_v45, 23  ;;  %vm1339_vm5 = vc.u32 %v1331_v13, %v1335_v24  ;;  %v1341_v14 = vadd.s32 %v1335_v24, %v1331_v13  ;;  %v1338_v41 = vshrl.u32 %v1333_v20, 16 }
 0x244   : > { %v1340_v17 = vsel %vm1339_vm5, 1, %v10473_v0  ;;  %vm1361_vm12 = vc.u32 %v1353_v57, %v1357_v12  ;;  %v1363_v52 = vadd.s32 %v1357_v12, %v1353_v57  ;;  %v1243_v26 = vcvt.s32.f32 %v1236_v35 }
 0x245   : > { %v1240_v23 = vor.u32 4788187, %v1239_v51  ;;  %v1342_v25 = vadd.s32 %v1340_v17, %v1334_v8  ;;  %vm1343_vm10 = vc.u32 %v1341_v14, %v1337_v9  ;;  %v1358_v53 = vshrl.u32 %v1354_v62, 16 }
 0x246   : > { %v1344_v50 = vsel %vm1343_vm10, 1, %v10473_v0  ;;  %v1362_v59 = vsel %vm1361_vm12, 1, %v10473_v0  ;;  %vm1365_vm9 = vc.u32 %v1363_v52, %v1359_v16  ;;  %v9359_v13 = vsel %vm9343_vm2, 0, %v1248_v30 }
 0x247   : > { %v1241_v6 = vand.u32 2147483647, %v1240_v23  ;;  %v1346_v7 = vadd.s32 %v1344_v50, %v1342_v25  ;;  %v1364_v46 = vadd.s32 %v1362_v59, %v1356_v63  ;;  %v1366_v38 = vsel %vm1365_vm9, 1, %v10473_v0 }
 0x248   : > { %v1314_v34 = vsel %vm1310_vm6, %v1294_v19, %v9278_v61  ;;  %v1316_v62 = vsel %vm1312_vm4, %v9280_v42, %v1315_v28  ;;  %v1436_v1 = vand.u32 2139095040, %v9350_v58  ;;  %v1360_v20 = vshrl.u32 %v1355_v48, 16 }
 0x249   : > { %v1244_v39 = vmul.f32 %v1243_v26, %v1241_v6  ;;  %v1347_v11 = vadd.s32 %v1346_v7, %v1336_v5  ;;  %v1368_v57 = vadd.s32 %v1366_v38, %v1364_v46  ;;  %v1367_v12 = vadd.s32 %v1363_v52, %v1359_v16 }
 0x24a   : > { %v1437_v43 = vshrl.u32 %v1436_v1, 23  ;;  %v484_v30 = vsel %vm476_vm1, %v8321_v47, %v397_v55  ;;  %v1317_v45 = vsel %vm1311_vm15, %v1314_v34, %v1316_v62  ;;  %v1267_v8 = vadd.s32 3, %v9359_v13 }
 0x24b   : > { %v1245_v29 = vxor.u32 2147483648, %v1244_v39  ;;  %v1348_v61 = vadd.s32 %v1347_v11, %v1338_v41  ;;  %v1369_v19 = vadd.s32 %v1368_v57, %v1358_v53  ;;  %v1433_v42 = vand.u32 2147483647, %v9350_v58 }
 0x24c   : > { %v7020_v28 = vadd.s32 4294967169, %v1437_v43  ;;  %v10499_v5 = vrot.slane %v8424_v18, 2  ;;  %v1371_v32 = vmul.u32 %v9292_v33, %v1317_v45  ;;  %v9385_v35 = vand.u32 3, %v1267_v8 }
 0x24d   : > { %v1246_v48 = vsel %vm1125_vm11, %v1245_v29, %v1244_v39  ;;  %v1370_v24 = vadd.s32 %v1369_v19, %v1360_v20  ;;  %vm1373_vm6 = vc.u32 %v1348_v61, %v1367_v12  ;;  %v1440_v51 = vand.u32 8388607, %v1433_v42 }
 0x24e   : > { %v9379_v9 = vsel %vm485_vm7, %v484_v30, %v10499_v5  ;;  %v1249_v47 = vsel %vm9343_vm2, %v9096_v4, %v1246_v48  ;;  %v1443_v55 = vadd.s32 1, %v7020_v28  ;;  %vm1273_vm7 = vcmp.eq.s32.totalorder %v9385_v35, 2 }
 0x24f   : > { %v1251_v63 = vmul.f32 %v1249_v47, %v1249_v47  ;;  %v1374_v16 = vadd.s32 1, %v1370_v24  ;;  %v1591_v18 = vand.u32 2139095040, %v9379_v9  ;;  %v1588_v25 = vand.u32 2147483647, %v9379_v9 }
 0x250   : > { %vm1444_vm3 = vcmp.gt.s32.totalorder %v1443_v55, 0  ;;  %v1441_v53 = vor.u32 8388608, %v1440_v51  ;;  %v9394_v38 = vadd.s32 %v1367_v12, %v1348_v61  ;;  %vm1270_vm4 = vcmp.eq.s32.totalorder %v9385_v35, 0 }
 0x251   : > { %v1252_v14 = vmul.f32 -0.001358992, %v1251_v63  ;;  %v1259_v41 = vmul.f32 -0.00019511016, %v1251_v63  ;;  %v1375_v17 = vsel %vm1373_vm6, %v1374_v16, %v1370_v24  ;;  %v1445_v52 = vsel %vm1444_vm3, %v1443_v55, 0 }
 0x252   : > { %v1376_v44 = vadd.s32 %v1375_v17, %v1371_v32  ;;  %v1447_v23 = vand.u32 31, %v1445_v52  ;;  %v1592_v6 = vshrl.u32 %v1591_v18, 23  ;;  %vm1269_vm14 = vcmp.lt.s32.totalorder %v9385_v35, 2 }
 0x253   : > { %v1253_v26 = vadd.f32 0.041655596, %v1252_v14  ;;  %v1260_v33 = vadd.f32 0.008332121, %v1259_v41  ;;  %vm1266_vm15 = vweird.f32 %v9096_v4  ;;  %v9414_v61 = vshll.u32 %v1441_v53, 8 }
 0x254   : > { %v1377_v50 = vadd.s32 536870912, %v1376_v44  ;;  %v9392_v59 = vsub.s32 32, %v1447_v23  ;;  %v1450_v34 = vshll.u32 %v10476_v3, %v1447_v23  ;;  %v1453_v39 = vshll.u32 %v10477_v22, %v1447_v23 }
 0x255   : > { %v1254_v7 = vmul.f32 %v1253_v26, %v1251_v63  ;;  %v1261_v46 = vmul.f32 %v1260_v33, %v1251_v63  ;;  %v1456_v11 = vshll.u32 %v10466_v60, %v1447_v23  ;;  %v1459_v29 = vshll.u32 %v10478_v36, %v1447_v23 }
 0x256   : > { %v9398_v62 = vshrl.u32 %v1377_v50, 30  ;;  %v1451_v1 = vshrl.u32 %v10477_v22, %v9392_v59  ;;  %v1454_v12 = vshrl.u32 %v10466_v60, %v9392_v59  ;;  %v1457_v43 = vshrl.u32 %v10478_v36, %v9392_v59 }
 0x257   : > { %v1255_v20 = vadd.f32 -0.4999988, %v1254_v7  ;;  %v1262_v57 = vadd.f32 -0.16666654, %v1261_v46  ;;  %v1460_v45 = vshrl.u32 %v10467_v37, %v9392_v59  ;;  %v9416_v28 = vshrl.u32 %v1445_v52, 5 }
 0x258   : > { %v1379_v30 = vshll.u32 %v9398_v62, 30  ;;  %v7023_v48 = vadd.s32 4294967169, %v1592_v6  ;;  %v1452_v5 = vor.u32 %v1451_v1, %v1450_v34  ;;  %v1462_v32 = vshll.u32 %v10467_v37, %v1447_v23 }
 0x259   : > { %v1256_v19 = vmul.f32 %v1255_v20, %v1251_v63  ;;  %v1263_v8 = vmul.f32 %v1262_v57, %v1251_v63  ;;  %v1463_v55 = vshrl.u32 %v10440_v56, %v9392_v59  ;;  %vm1280_vm0 = vcmp.lt.s32.totalorder %v9150_v49, 0 }
 0x25a   : > { %v9418_v24 = vsub.s32 %v1376_v44, %v1379_v30  ;;  %v1455_v18 = vor.u32 %v1454_v12, %v1453_v39  ;;  %v1458_v14 = vor.u32 %v1457_v43, %v1456_v11  ;;  %v1461_v41 = vor.u32 %v1460_v45, %v1459_v29 }
 0x25b   : > { %v9423_v16 = vadd.f32 1.0, %v1256_v19  ;;  %v1264_v51 = vadd.f32 1.0, %v1263_v8  ;;  %v1464_v17 = vor.u32 %v1463_v55, %v1462_v32  ;;  %vm1465_vm8 = vcmp.lt.s32.totalorder %v9416_v28, 1 }
 0x25c   : > { %vm1381_vm11 = vcmp.lt.s32.totalorder %v9418_v24, 0  ;;  %v1382_v63 = vsub.s32 0, %v9418_v24  ;;  %vm1468_vm2 = vcmp.lt.s32.totalorder %v9416_v28, 4  ;;  %v1402_v26 = vsub.s32 4, %v9398_v62 }
 0x25d   : > { %v9428_v52 = vmul.f32 %v1264_v51, %v1249_v47  ;;  %v1274_v44 = vxor.u32 2147483648, %v9423_v16  ;;  %vm1467_vm5 = vcmp.lt.s32.totalorder %v9416_v28, 3  ;;  %v1598_v33 = vadd.s32 1, %v7023_v48 }
 0x25e   : > { %v1383_v23 = vsel %vm1381_vm11, %v1382_v63, %v9418_v24  ;;  %vm9444_vm12 = vcmp.le.f32.partialorder %v1278_v27, 0.7853982  ;;  %vm1466_vm10 = vcmp.lt.s32.totalorder %v9416_v28, 2  ;;  %v1473_v7 = vsel %vm1465_vm8, %v1452_v5, %v1455_v18 }
 0x25f   : > { %v1271_v50 = vxor.u32 2147483648, %v9428_v52  ;;  %v1275_v47 = vsel %vm1273_vm7, %v1274_v44, %v9428_v52  ;;  %v1384_v6 = vclz %v1383_v23  ;;  %v1474_v46 = vsel %vm1468_vm2, %v1461_v41, 920167782 }
 0x260   : > { %v1477_v34 = vsel %vm1465_vm8, %v1455_v18, %v1458_v14  ;;  %v1478_v1 = vsel %vm1468_vm2, %v1464_v17, 1326507024  ;;  %v1475_v11 = vsel %vm1467_vm5, %v1458_v14, %v1474_v46  ;;  %v1482_v43 = vand.u32 65535, %v9414_v61 }
 0x261   : > { %v1272_v27 = vsel %vm1270_vm4, %v9423_v16, %v1271_v50  ;;  %v7018_v39 = vadd.s32 4294967294, %v1384_v6  ;;  %v1479_v20 = vsel %vm1467_vm5, %v1461_v41, %v1478_v1  ;;  %v1483_v30 = vshrl.u32 %v9414_v61, 16  ;;  %v10502_v41 = vld [vmem:[#allocation19_spill] sm:$0xff] }
 0x262   : > { %v1276_v57 = vsel %vm1269_vm14, %v1272_v27, %v1275_v47  ;;  %v1480_v12 = vsel %vm1466_vm10, %v1477_v34, %v1479_v20  ;;  %v1449_v45 = vshrl.u32 %v10476_v3, %v9392_v59  ;;  %vm1599_vm6 = vcmp.gt.s32.totalorder %v1598_v33, 0 }
 0x263   : > { %v1277_v29 = vsel %vm1266_vm15, nan, %v1276_v57  ;;  %vm7019_vm9 = vcmp.lt.s32.totalorder %v7018_v39, 0  ;;  %v1403_v35 = vsel %vm1280_vm0, %v1402_v26, %v9398_v62  ;;  %v1476_v8 = vsel %vm1466_vm10, %v1473_v7, %v1475_v11 }
 0x264   : > { %5628 = vmatpush.msrb.mxu0 %v1277_v29  ;;  %v1387_v19 = vsel %vm7019_vm9, 0, %v7018_v39  ;;  %v1484_v48 = vand.u32 65535, %v1480_v12  ;;  %v1485_v63 = vshrl.u32 %v1480_v12, 16  ;;  %vm10503_vm3 = vcmask 97280  }
 0x265   : > { %v1388_v32 = vsub.s32 32, %v1387_v19  ;;  %v1389_v55 = vshll.u32 %v9418_v24, %v1387_v19  ;;  %v1392_v51 = vsub.s32 4294967266, %v1387_v19  ;;  %7119 = vmatmul.msk.f32.vlgmr.msrb.gmra.mxu0 %vm10503_vm3, %v10502_v41  ;;  %v1470_v59 = vsel %vm1468_vm2, %v1458_v14, 2102212464  ;;  %vm10504_vm14 = vmmov %vm10503_vm3 }
 0x266   : > { %v1486_v17 = vmul.u32 %v1484_v48, %v1482_v43  ;;  %v9488_v23 = vand.u32 8388607, %v1588_v25  ;;  %v9490_v62 = vsel %vm1599_vm6, %v1598_v33, 0  ;;  %v1487_v6 = vmul.u32 %v1485_v63, %v1482_v43 }
 0x267   : > { %v1390_v26 = vshrl.u32 %v9394_v38, %v1388_v32  ;;  %v1393_v47 = vadd.s32 127, %v1392_v51  ;;  %v1488_v24 = vmul.u32 %v1484_v48, %v1483_v30  ;;  %v9495_v7 = vsel %vm9444_vm12, 0, %v1403_v35 }
 0x268   : > { %v1469_v46 = vsel %vm1465_vm8, %v1449_v45, %v1452_v5  ;;  %v1506_v14 = vand.u32 65535, %v1476_v8  ;;  %v1507_v34 = vshrl.u32 %v1476_v8, 16  ;;  %v1489_v39 = vmul.u32 %v1485_v63, %v1483_v30 }
 0x269   : > { %v1391_v1 = vor.u32 %v1390_v26, %v1389_v55  ;;  %v1394_v27 = vshll.u32 %v1393_v47, 23  ;;  %v1490_v11 = vshll.u32 %v1487_v6, 16  ;;  %v1471_v33 = vsel %vm1467_vm5, %v1455_v18, %v1470_v59 }
 0x26a   : > { %v1492_v38 = vshll.u32 %v1488_v24, 16  ;;  %v1508_v20 = vmul.u32 %v1506_v14, %v1482_v43  ;;  %v1509_v57 = vmul.u32 %v1507_v34, %v1482_v43  ;;  %v1510_v48 = vmul.u32 %v1506_v14, %v1483_v30 }
 0x26b   : > { %v1395_v12 = vor.u32 4788187, %v1394_v27  ;;  %v1398_v29 = vcvt.s32.f32 %v1391_v1  ;;  %vm1494_vm7 = vc.u32 %v1486_v17, %v1490_v11  ;;  %v1496_v19 = vadd.s32 %v1490_v11, %v1486_v17 }
 0x26c   : > { %v1495_v35 = vsel %vm1494_vm7, 1, %v10473_v0  ;;  %v1511_v5 = vmul.u32 %v1507_v34, %v1483_v30  ;;  %v1512_v45 = vshll.u32 %v1509_v57, 16  ;;  %v1491_v32 = vshrl.u32 %v1487_v6, 16 }
 0x26d   : > { %v1396_v8 = vand.u32 2147483647, %v1395_v12  ;;  %v1497_v55 = vadd.s32 %v1495_v35, %v1489_v39  ;;  %vm1498_vm4 = vc.u32 %v1496_v19, %v1492_v38  ;;  %7120 = vmatmul.msk.f32.gmra.mxu0 %vm10504_vm14, %v8642_v2  ;;  %v1472_v18 = vsel %vm1466_vm10, %v1469_v46, %v1471_v33 }
 0x26e   : > { %v1499_v43 = vsel %vm1498_vm4, 1, %v10473_v0  ;;  %v1514_v51 = vshll.u32 %v1510_v48, 16  ;;  %vm1516_vm11 = vc.u32 %v1508_v20, %v1512_v45  ;;  %v1518_v30 = vadd.s32 %v1512_v45, %v1508_v20 }
 0x26f   : > { %v1399_v63 = vmul.f32 %v1398_v29, %v1396_v8  ;;  %v1501_v59 = vadd.s32 %v1499_v43, %v1497_v55  ;;  %v1517_v17 = vsel %vm1516_vm11, 1, %v10473_v0  ;;  %v1493_v26 = vshrl.u32 %v1488_v24, 16 }
 0x270   : > { %v1519_v47 = vadd.s32 %v1517_v17, %v1511_v5  ;;  %v1596_v6 = vor.u32 8388608, %v9488_v23  ;;  %v1602_v14 = vand.u32 31, %v9490_v62  ;;  %v1513_v27 = vshrl.u32 %v1509_v57, 16 }
 0x271   : > { %v1400_v34 = vxor.u32 2147483648, %v1399_v63  ;;  %v1502_v1 = vadd.s32 %v1501_v59, %v1491_v32  ;;  %vm1520_vm8 = vc.u32 %v1518_v30, %v1514_v51  ;;  %v1422_v28 = vadd.s32 3, %v9495_v7 }
 0x272   : > { %v1521_v46 = vsel %vm1520_vm8, 1, %v10473_v0  ;;  %v1526_v39 = vmul.u32 %v9414_v61, %v1472_v18  ;;  %v9513_v11 = vsub.s32 32, %v1602_v14  ;;  %v1515_v33 = vshrl.u32 %v1510_v48, 16 }
 0x273   : > { %v1401_v24 = vsel %vm1280_vm0, %v1400_v34, %v1399_v63  ;;  %v9517_v38 = vadd.s32 %v1518_v30, %v1514_v51  ;;  %v1523_v23 = vadd.s32 %v1521_v46, %v1519_v47  ;;  %v9522_v57 = vadd.s32 %v1502_v1, %v1493_v26  ;;  %vm10505_vm0 = vmmov %vm10503_vm3 }
 0x274   : > { %v1404_v20 = vsel %vm9444_vm12, %v9150_v49, %v1401_v24  ;;  %v1605_v12 = vshll.u32 %v10476_v3, %v1602_v14  ;;  %v1606_v61 = vshrl.u32 %v10477_v22, %v9513_v11  ;;  %v1608_v35 = vshll.u32 %v10477_v22, %v1602_v14  ;;  %vm10506_vm6 = vmmov %vm10505_vm0 }
 0x275   : > { %v1406_v29 = vmul.f32 %v1404_v20, %v1404_v20  ;;  %v1524_v19 = vadd.s32 %v1523_v23, %v1513_v27  ;;  %v1609_v48 = vshrl.u32 %v10466_v60, %v9513_v11  ;;  %7121 = vmatmul.msk.f32.gmra.mxu0 %vm10505_vm0, %v8673_v10  ;;  %v9533_v53 = vshrl.u32 %v9490_v62, 5 }
 0x276   : > { %v1611_v5 = vshll.u32 %v10466_v60, %v1602_v14  ;;  %v1612_v45 = vshrl.u32 %v10478_v36, %v9513_v11  ;;  %v1614_v8 = vshll.u32 %v10478_v36, %v1602_v14  ;;  %v1615_v22 = vshrl.u32 %v10467_v37, %v9513_v11 }
 0x277   : > { %v1407_v32 = vmul.f32 -0.001358992, %v1406_v29  ;;  %v1414_v55 = vmul.f32 -0.00019511016, %v1406_v29  ;;  %v1525_v18 = vadd.s32 %v1524_v19, %v1515_v33  ;;  %vm1528_vm2 = vc.u32 %v9522_v57, %v9517_v38 }
 0x278   : > { %v9543_v43 = vor.u32 %v1606_v61, %v1605_v12  ;;  %v1617_v62 = vshll.u32 %v10467_v37, %v1602_v14  ;;  %v1618_v60 = vshrl.u32 %v10440_v56, %v9513_v11  ;;  %v9548_v36 = vor.u32 %v1609_v48, %v1608_v35 }
 0x279   : > { %v1408_v51 = vadd.f32 0.041655596, %v1407_v32  ;;  %v1415_v63 = vadd.f32 0.008332121, %v1414_v55  ;;  %v1529_v59 = vadd.s32 1, %v1525_v18  ;;  %v9550_v17 = vor.u32 %v1612_v45, %v1611_v5 }
 0x27a   : > { %v1616_v30 = vor.u32 %v1615_v22, %v1614_v8  ;;  %v1619_v26 = vor.u32 %v1618_v60, %v1617_v62  ;;  %vm1620_vm5 = vcmp.lt.s32.totalorder %v9533_v53, 1  ;;  %vm1623_vm12 = vcmp.lt.s32.totalorder %v9533_v53, 4 }
 0x27b   : > { %v1409_v47 = vmul.f32 %v1408_v51, %v1406_v29  ;;  %v1416_v34 = vmul.f32 %v1415_v63, %v1406_v29  ;;  %v1530_v1 = vsel %vm1528_vm2, %v1529_v59, %v1525_v18  ;;  %v1423_v37 = vand.u32 3, %v1422_v28  ;;  %vm10507_vm2 = vmmov %vm10506_vm6 }
 0x27c   : > { %v1531_v14 = vadd.s32 %v1530_v1, %v1526_v39  ;;  %vm1622_vm10 = vcmp.lt.s32.totalorder %v9533_v53, 3  ;;  %v9555_v56 = vshll.u32 %v1596_v6, 8  ;;  %vm1621_vm9 = vcmp.lt.s32.totalorder %v9533_v53, 2 }
 0x27d   : > { %v1410_v27 = vadd.f32 -0.4999988, %v1409_v47  ;;  %v1417_v46 = vadd.f32 -0.16666654, %v1416_v34  ;;  %7122 = vmatmul.msk.f32.gmra.mxu0 %vm10506_vm6, %v8712_v15  ;;  %vm1421_vm3 = vweird.f32 %v9150_v49  ;;  %v1628_v28 = vsel %vm1620_vm5, %v9543_v43, %v9548_v36 }
 0x27e   : > { %v1532_v24 = vadd.s32 536870912, %v1531_v14  ;;  %v1629_v39 = vsel %vm1623_vm12, %v1616_v30, 920167782  ;;  %v1632_v6 = vsel %vm1620_vm5, %v9548_v36, %v9550_v17  ;;  %v1633_v61 = vsel %vm1623_vm12, %v1619_v26, 1326507024 }
 0x27f   : > { %v1411_v33 = vmul.f32 %v1410_v27, %v1406_v29  ;;  %v1418_v23 = vmul.f32 %v1417_v46, %v1406_v29  ;;  %v1630_v12 = vsel %vm1622_vm10, %v9550_v17, %v1629_v39  ;;  %vm1428_vm7 = vcmp.eq.s32.totalorder %v1423_v37, 2 }
 0x280   : > { %v9576_v19 = vshrl.u32 %v1532_v24, 30  ;;  %v1634_v35 = vsel %vm1622_vm10, %v1616_v30, %v1633_v61  ;;  %v1637_v48 = vand.u32 65535, %v9555_v56  ;;  %v1638_v8 = vshrl.u32 %v9555_v56, 16 }
 0x281   : > { %v9581_v5 = vadd.f32 1.0, %v1411_v33  ;;  %v1419_v45 = vadd.f32 1.0, %v1418_v23  ;;  %v1635_v29 = vsel %vm1621_vm9, %v1632_v6, %v1634_v35  ;;  %v1631_v55 = vsel %vm1621_vm9, %v1628_v28, %v1630_v12 }
 0x282   : > { %v1534_v32 = vshll.u32 %v9576_v19, 30  ;;  %v1639_v18 = vand.u32 65535, %v1635_v29  ;;  %v1640_v22 = vshrl.u32 %v1635_v29, 16  ;;  %vm1424_vm4 = vcmp.lt.s32.totalorder %v1423_v37, 2 }
 0x283   : > { %v9589_v62 = vmul.f32 %v1419_v45, %v1404_v20  ;;  %vm1425_vm14 = vcmp.eq.s32.totalorder %v1423_v37, 0  ;;  %v1429_v60 = vxor.u32 2147483648, %v9581_v5  ;;  %v1661_v30 = vand.u32 65535, %v1631_v55 }
 0x284   : > { %v1535_v51 = vsub.s32 %v1531_v14, %v1534_v32  ;;  %v1641_v63 = vmul.u32 %v1639_v18, %v1637_v48  ;;  %v1642_v59 = vmul.u32 %v1640_v22, %v1637_v48  ;;  %v1643_v34 = vmul.u32 %v1639_v18, %v1638_v8 }
 0x285   : > { %v1426_v26 = vxor.u32 2147483648, %v9589_v62  ;;  %v1430_v47 = vsel %vm1428_vm7, %v1429_v60, %v9589_v62  ;;  %v1662_v1 = vshrl.u32 %v1631_v55, 16  ;;  %v1644_v27 = vmul.u32 %v1640_v22, %v1638_v8 }
 0x286   : > { %vm1536_vm11 = vcmp.lt.s32.totalorder %v1535_v51, 0  ;;  %v1537_v20 = vsub.s32 0, %v1535_v51  ;;  %v1645_v46 = vshll.u32 %v1642_v59, 16  ;;  %v1647_v24 = vshll.u32 %v1643_v34, 16 }
 0x287   : > { %v1427_v14 = vsel %vm1425_vm14, %v9581_v5, %v1426_v26  ;;  %v1663_v61 = vmul.u32 %v1661_v30, %v1637_v48  ;;  %v1664_v45 = vmul.u32 %v1662_v1, %v1637_v48  ;;  %v1665_v29 = vmul.u32 %v1661_v30, %v1638_v8  ;;  %vm10508_vm14 = vmmov %vm10507_vm2 }
 0x288   : > { %v1431_v28 = vsel %vm1424_vm4, %v1427_v14, %v1430_v47  ;;  %v1538_v39 = vsel %vm1536_vm11, %v1537_v20, %v1535_v51  ;;  %vm1649_vm8 = vc.u32 %v1641_v63, %v1645_v46  ;;  %v1651_v6 = vadd.s32 %v1645_v46, %v1641_v63  ;;  %vm10509_vm11 = vmmov %vm10507_vm2 }
 0x289   : > { %v1432_v33 = vsel %vm1421_vm3, nan, %v1431_v28  ;;  %v1539_v23 = vclz %v1538_v39  ;;  %v1650_v12 = vsel %vm1649_vm8, 1, %v10473_v0  ;;  %v1667_v37 = vshll.u32 %v1664_v45, 16 }
 0x28a   : > { %5657 = vmatpush.msrb.mxu1 %v1432_v33  ;;  %v1652_v35 = vadd.s32 %v1650_v12, %v1644_v27  ;;  %vm1653_vm0 = vc.u32 %v1651_v6, %v1647_v24  ;;  %v1527_v18 = vadd.s32 %v9517_v38, %v9522_v57  ;;  %v1646_v22 = vshrl.u32 %v1642_v59, 16 }
 0x28b   : > { %v7021_v32 = vadd.s32 4294967294, %v1539_v23  ;;  %v1654_v55 = vsel %vm1653_vm0, 1, %v10473_v0  ;;  %7124 = vmatmul.msk.f32.vlgmr.msrb.gmra.mxu1 %vm10507_vm2, %v10502_v41  ;;  %v1666_v63 = vmul.u32 %v1662_v1, %v1638_v8  ;;  %v1669_v46 = vshll.u32 %v1665_v29, 16 }
 0x28c   : > { %v1656_v20 = vadd.s32 %v1654_v55, %v1652_v35  ;;  %vm1671_vm7 = vc.u32 %v1663_v61, %v1667_v37  ;;  %v1604_v24 = vshrl.u32 %v10476_v3, %v9513_v11  ;;  %v1625_v28 = vsel %vm1623_vm12, %v9550_v17, 2102212464 }
 0x28d   : > { %vm7022_vm6 = vcmp.lt.s32.totalorder %v7021_v32, 0  ;;  %v1672_v14 = vsel %vm1671_vm7, 1, %v10473_v0  ;;  %v1673_v59 = vadd.s32 %v1667_v37, %v1663_v61  ;;  %v1648_v1 = vshrl.u32 %v1643_v34, 16 }
 0x28e   : > { %v1542_v47 = vsel %vm7022_vm6, 0, %v7021_v32  ;;  %v1674_v8 = vadd.s32 %v1672_v14, %v1666_v63  ;;  %v1657_v39 = vadd.s32 %v1656_v20, %v1646_v22  ;;  %v1668_v23 = vshrl.u32 %v1664_v45, 16 }
 0x28f   : > { %v1543_v27 = vsub.s32 32, %v1542_v47  ;;  %v1544_v48 = vshll.u32 %v1535_v51, %v1542_v47  ;;  %v1547_v30 = vsub.s32 4294967266, %v1542_v47  ;;  %vm1675_vm4 = vc.u32 %v1673_v59, %v1669_v46 }
 0x290   : > { %v1624_v3 = vsel %vm1620_vm5, %v1604_v24, %v9543_v43  ;;  %v1626_v11 = vsel %vm1622_vm10, %v9548_v36, %v1625_v28  ;;  %v1676_v17 = vsel %vm1675_vm4, 1, %v10473_v0  ;;  %v1670_v12 = vshrl.u32 %v1665_v29, 16 }
 0x291   : > { %v1545_v38 = vshrl.u32 %v1527_v18, %v1543_v27  ;;  %v1548_v57 = vadd.s32 127, %v1547_v30  ;;  %v1678_v61 = vadd.s32 %v1676_v17, %v1674_v8  ;;  %v1658_v35 = vadd.s32 %v1657_v39, %v1648_v1 }
 0x292   : > { %v1677_v45 = vadd.s32 %v1673_v59, %v1669_v46  ;;  %v1627_v55 = vsel %vm1621_vm9, %v1624_v3, %v1626_v11  ;;  %vm1435_vm5 = vcmp.lt.s32.totalorder %v9350_v58, 0  ;;  %v1557_v43 = vsub.s32 4, %v9576_v19  ;;  %vm10510_vm9 = vmmov %vm10507_vm2 }
 0x293   : > { %v1546_v6 = vor.u32 %v1545_v38, %v1544_v48  ;;  %v1549_v33 = vshll.u32 %v1548_v57, 23  ;;  %7125 = vmatmul.msk.f32.gmra.mxu1 %vm10508_vm14, %v8642_v2  ;;  %v1679_v37 = vadd.s32 %v1678_v61, %v1668_v23  ;;  %v1681_v36 = vmul.u32 %v9555_v56, %v1627_v55  ;;  %vm10511_vm14 = vmmov %vm10510_vm9 }
 0x294   : > { %vm1683_vm12 = vc.u32 %v1658_v35, %v1677_v45  ;;  %vm1434_vm10 = vcmp.le.f32.partialorder %v1433_v42, 0.7853982  ;;  %v1558_v47 = vsel %vm1435_vm5, %v1557_v43, %v9576_v19  ;;  %vm1576_vm4 = vweird.f32 %v9350_v58 }
 0x295   : > { %v1550_v51 = vor.u32 4788187, %v1549_v33  ;;  %v1553_v34 = vcvt.s32.f32 %v1546_v6  ;;  %v1680_v22 = vadd.s32 %v1679_v37, %v1670_v12  ;;  %v9635_v30 = vsel %vm1434_vm10, 0, %v1558_v47 }
 0x296   : > { %v1577_v38 = vadd.s32 3, %v9635_v30 }
 0x297   : > { %v1551_v32 = vand.u32 2147483647, %v1550_v51  ;;  %v1684_v29 = vadd.s32 1, %v1680_v22 }
 0x298   : > { %v1578_v6 = vand.u32 3, %v1577_v38 }
 0x299   : > { %v1554_v18 = vmul.f32 %v1553_v34, %v1551_v32  ;;  %v1685_v63 = vsel %vm1683_vm12, %v1684_v29, %v1680_v22  ;;  %vm1589_vm12 = vcmp.le.f32.partialorder %v1588_v25, 0.7853982 }
 0x29a   : > { %v1686_v46 = vadd.s32 %v1685_v63, %v1681_v36  ;;  %vm1583_vm0 = vcmp.eq.s32.totalorder %v1578_v6, 2  ;;  %vm1579_vm2 = vcmp.lt.s32.totalorder %v1578_v6, 2  ;;  %vm1580_vm6 = vcmp.eq.s32.totalorder %v1578_v6, 0 }
 0x29b   : > { %v1555_v0 = vxor.u32 2147483648, %v1554_v18  ;;  %7126 = vmatmul.msk.f32.gmra.mxu1 %vm10509_vm11, %v8673_v10  ;;  %vm10513_vm11 = vmmov %vm10510_vm9 }
 0x29c   : > { %v1687_v48 = vadd.s32 536870912, %v1686_v46 }
 0x29d   : > { %v1556_v53 = vsel %vm1435_vm5, %v1555_v0, %v1554_v18  ;;  %v1682_v18 = vadd.s32 %v1677_v45, %v1658_v35  ;;  %vm1590_vm5 = vcmp.lt.s32.totalorder %v9379_v9, 0 }
 0x29e   : > { %v1559_v20 = vsel %vm1434_vm10, %v9350_v58, %v1556_v53  ;;  %v1688_v24 = vshrl.u32 %v1687_v48, 30  ;;  %vm10512_vm10 = vmmov %vm10510_vm9 }
 0x29f   : > { %v1561_v27 = vmul.f32 %v1559_v20, %v1559_v20 }
 0x2a0   : > { %v1689_v57 = vshll.u32 %v1688_v24, 30 }
 0x2a1   : > { %v1562_v56 = vmul.f32 -0.001358992, %v1561_v27  ;;  %v1569_v14 = vmul.f32 -0.00019511016, %v1561_v27 }
 0x2a2   : > { %v1690_v8 = vsub.s32 %v1686_v46, %v1689_v57 }
 0x2a3   : > { %v1563_v42 = vadd.f32 0.041655596, %v1562_v56  ;;  %v1570_v28 = vadd.f32 0.008332121, %v1569_v14  ;;  %7127 = vmatmul.msk.f32.gmra.mxu1 %vm10510_vm9, %v8712_v15  ;;  %v1712_v14 = vsub.s32 4, %v1688_v24 }
 0x2a4   : > { %vm1691_vm8 = vcmp.lt.s32.totalorder %v1690_v8, 0  ;;  %v1692_v33 = vsub.s32 0, %v1690_v8 }
 0x2a5   : > { %v1564_v59 = vmul.f32 %v1563_v42, %v1561_v27  ;;  %v1571_v19 = vmul.f32 %v1570_v28, %v1561_v27  ;;  %v1713_v38 = vsel %vm1590_vm5, %v1712_v14, %v1688_v24  ;;  %v10518_v14 = vld [vmem:[#allocation5_spill] sm:$0xff] }
 0x2a6   : > { %v1693_v11 = vsel %vm1691_vm8, %v1692_v33, %v1690_v8 }
 0x2a7   : > { %v1565_v1 = vadd.f32 -0.4999988, %v1564_v59  ;;  %v1572_v39 = vadd.f32 -0.16666654, %v1571_v19  ;;  %v1694_v34 = vclz %v1693_v11  ;;  %v9663_v19 = vsel %vm1589_vm12, 0, %v1713_v38  ;;  %v9785_v38 = vpop.f32.mrf.mxu0 }
 0x2a8   : > { %v1732_v25 = vadd.s32 3, %v9663_v19 }
 0x2a9   : > { %v1566_v23 = vmul.f32 %v1565_v1, %v1561_v27  ;;  %v1573_v3 = vmul.f32 %v1572_v39, %v1561_v27  ;;  %v7024_v32 = vadd.s32 4294967294, %v1694_v34 }
 0x2ab   : > { %v9640_v17 = vadd.f32 1.0, %v1566_v23  ;;  %v1574_v51 = vadd.f32 1.0, %v1573_v3  ;;  %vm7025_vm7 = vcmp.lt.s32.totalorder %v7024_v32, 0 }
 0x2ac   : > { %v1697_v22 = vsel %vm7025_vm7, 0, %v7024_v32  ;;  %vm1731_vm7 = vweird.f32 %v9379_v9 }
 0x2ad   : > { %v9642_v12 = vmul.f32 %v1574_v51, %v1559_v20  ;;  %v1584_v61 = vxor.u32 2147483648, %v9640_v17  ;;  %v1698_v36 = vsub.s32 32, %v1697_v22  ;;  %v1699_v0 = vshll.u32 %v1690_v8, %v1697_v22 }
 0x2ae   : > { %v1702_v29 = vsub.s32 4294967266, %v1697_v22  ;;  %v1733_v51 = vand.u32 3, %v1732_v25 }
 0x2af   : > { %v1581_v55 = vxor.u32 2147483648, %v9642_v12  ;;  %v1585_v37 = vsel %vm1583_vm0, %v1584_v61, %v9642_v12  ;;  %v1700_v47 = vshrl.u32 %v1682_v18, %v1698_v36  ;;  %v5740_v36 = vld.sshfl [vmem:[#allocation1] sm:$0xff pattern:$0x75316420] }
 0x2b0   : > { %v1703_v20 = vadd.s32 127, %v1702_v29  ;;  %vm1738_vm8 = vcmp.eq.s32.totalorder %v1733_v51, 2  ;;  %vm1735_vm0 = vcmp.eq.s32.totalorder %v1733_v51, 0  ;;  %7138 = vmatpush.msk.msra.mxu0 %vm476_vm1, %v5740_v36 }
 0x2b1   : > { %v1582_v43 = vsel %vm1580_vm6, %v9640_v17, %v1581_v55  ;;  %v1701_v46 = vor.u32 %v1700_v47, %v1699_v0  ;;  %vm1734_vm6 = vcmp.lt.s32.totalorder %v1733_v51, 2 }
 0x2b2   : > { %v1586_v53 = vsel %vm1579_vm2, %v1582_v43, %v1585_v37  ;;  %v1704_v35 = vshll.u32 %v1703_v20, 23  ;;  %vm5748_vm2 = vcmask 23552   ;;  %v5742_v43 = vld.sshfl [vmem:[#allocation1 + $0x10] sm:$0xff pattern:$0x75316420] }
 0x2b3   : > { %v1587_v63 = vsel %vm1576_vm4, nan, %v1586_v53  ;;  %v1708_v27 = vcvt.s32.f32 %v1701_v46  ;;  %v5741_v53 = vld.sshfl [vmem:[#allocation1 + $0x8] sm:$0xff pattern:$0x75316420] }
 0x2b4   : > { %5686 = vmatpush.msrb.mxu2 %v1587_v63  ;;  %v1705_v45 = vor.u32 4788187, %v1704_v35  ;;  %7143 = vmatpush.msk.msra.mxu1 %vm476_vm1, %v5741_v53  ;;  %v9686_v63 = vld [vmem:[%s10364_s2] sm:$0xff]  ;;  %v5743_v35 = vld.sshfl [vmem:[#allocation1 + $0x18] sm:$0xff pattern:$0x75316420] }
 0x2b5   : > { %7129 = vmatmul.msk.f32.vlgmr.msrb.gmra.mxu2 %vm10511_vm14, %v10502_v41  ;;  %7139 = vmatmul.msk.f32.vlgmr.msra.gmra.mxu0 %vm5748_vm2, %v9686_v63  ;;  %vm10514_vm14 = vmmov %vm10510_vm9 }
 0x2b6   : > { %v1706_v48 = vand.u32 2147483647, %v1705_v45  ;;  %7148 = vmatpush.msk.msra.mxu2 %vm476_vm1, %v5742_v43  ;;  %7144 = vmatmul.msk.f32.vlgmr.msra.gmra.mxu1 %vm5748_vm2, %v9686_v63  ;;  %v9705_v45 = vld [vmem:[%s10364_s2 + $0x8] sm:$0xff] }
 0x2b8   : > { %v1709_v56 = vmul.f32 %v1708_v27, %v1706_v48  ;;  %v5747_v27 = vld.sshfl [vmem:[#allocation1 + $0x38] sm:$0xff pattern:$0x75316420]  ;;  %v5746_v48 = vld.sshfl [vmem:[#allocation1 + $0x30] sm:$0xff pattern:$0x75316420] }
 0x2b9   : > { %7168 = vmatpush.msk.msrb.mxu2 %vm476_vm1, %v5746_v48 }
 0x2ba   : > { %v1710_v42 = vxor.u32 2147483648, %v1709_v56 }
 0x2bc   : > { %v1711_v28 = vsel %vm1590_vm5, %v1710_v42, %v1709_v56  ;;  %vm10515_vm5 = vmmov %vm10510_vm9  ;;  %v5745_v56 = vld.sshfl [vmem:[#allocation1 + $0x28] sm:$0xff pattern:$0x75316420]  ;;  %v10520_v42 = vld [vmem:[#allocation4_spill] sm:$0xff] }
 0x2bd   : > { %7130 = vmatmul.msk.f32.gmra.mxu2 %vm10512_vm10, %v8642_v2  ;;  %v1714_v57 = vsel %vm1589_vm12, %v9379_v9, %v1711_v28  ;;  %7140 = vmatmul.msk.f32.gmra.mxu0 %vm5748_vm2, %v9705_v45  ;;  %vm10516_vm12 = vmmov %vm10515_vm5  ;;  %v10521_v28 = vld [vmem:[#allocation8_spill] sm:$0xff] }
 0x2be   : > { %v1716_v59 = vmul.f32 %v1714_v57, %v1714_v57  ;;  %7145 = vmatmul.msk.f32.gmra.mxu1 %vm5748_vm2, %v9705_v45  ;;  %vm10517_vm10 = vmmov %vm10515_vm5 }
 0x2bf   : > { %7163 = vmatpush.msk.msrb.mxu1 %vm476_vm1, %v5745_v56  ;;  %v10536_v56 = vld [vmem:[#allocation6_spill] sm:$0xff] }
 0x2c0   : > { %v1717_v8 = vmul.f32 -0.001358992, %v1716_v59  ;;  %v1724_v1 = vmul.f32 -0.00019511016, %v1716_v59 }
 0x2c1   : > { %7183 = vmatpush.msk.msra.mxu1 %vm5472_vm13, %v10520_v42 }
 0x2c2   : > { %v1718_v39 = vadd.f32 0.041655596, %v1717_v8  ;;  %v1725_v6 = vadd.f32 0.008332121, %v1724_v1  ;;  %v10523_v1 = vld [vmem:[#allocation13_spill] sm:$0xff] }
 0x2c4   : > { %v1719_v33 = vmul.f32 %v1718_v39, %v1716_v59  ;;  %v1726_v23 = vmul.f32 %v1725_v6, %v1716_v59  ;;  %v3281_v39 = vand.u32 3, %v10523_v1  ;;  %v10524_v6 = vld [vmem:[#allocation16_spill] sm:$0xff] }
 0x2c5   : > { %7131 = vmatmul.msk.f32.gmra.mxu2 %vm10513_vm11, %v8673_v10  ;;  %v3435_v25 = vand.u32 3, %v10524_v6  ;;  %v10543_v6 = vld [vmem:[#allocation7_spill] sm:$0xff] }
 0x2c6   : > { %v1720_v3 = vadd.f32 -0.4999988, %v1719_v33  ;;  %v1727_v11 = vadd.f32 -0.16666654, %v1726_v23  ;;  %v10525_v33 = vld [vmem:[#allocation20_spill] sm:$0xff] }
 0x2c7   : > { %v3589_v23 = vand.u32 3, %v10525_v33  ;;  %v10545_v33 = vld [vmem:[#allocation22_spill] sm:$0xff] }
 0x2c8   : > { %v1721_v24 = vmul.f32 %v1720_v3, %v1716_v59  ;;  %v1728_v34 = vmul.f32 %v1727_v11, %v1716_v59  ;;  %v10522_v59 = vld [vmem:[#allocation9_spill] sm:$0xff]  ;;  %v9793_v3 = vpop.permute.xlu2 %6005  ;;  %v10526_v11 = vld [vmem:[#allocation11_spill] sm:$0xff] }
 0x2c9   : > { %v3127_v8 = vand.u32 3, %v10522_v59  ;;  %v10527_v51 = vxor.u32 2147483648, %v10526_v11 }
 0x2ca   : > { %v9668_v32 = vadd.f32 1.0, %v1721_v24  ;;  %v1729_v37 = vadd.f32 1.0, %v1728_v34  ;;  %v10528_v24 = vld [vmem:[#allocation10_spill] sm:$0xff] }
 0x2cb   : > { %vm3129_vm11 = vcmp.eq.s32.totalorder %v3127_v8, 0 }
 0x2cc   : > { %v9672_v18 = vmul.f32 %v1729_v37, %v1714_v57  ;;  %v1739_v22 = vxor.u32 2147483648, %v9668_v32  ;;  %v9787_v57 = vpop.f32.mrf.mxu1  ;;  %v3131_v34 = vsel %vm3129_vm11, %v10528_v24, %v10527_v51  ;;  %v10529_v37 = vxor.u32 2147483648, %v10528_v24  ;;  %v10547_v51 = vld [vmem:[#allocation21_spill] sm:$0xff] }
 0x2cd   : > { %7132 = vmatmul.msk.f32.gmra.mxu2 %vm10510_vm9, %v8712_v15  ;;  %vm3132_vm9 = vcmp.eq.s32.totalorder %v3127_v8, 2  ;;  %vm10537_vm11 = vweird.f32 %v10536_v56  ;;  %v3743_v56 = vand.u32 3, %v9359_v13  ;;  %v9916_v13 = vpop.f32.mrf.mxu3 }
 0x2ce   : > { %v1736_v0 = vxor.u32 2147483648, %v9672_v18  ;;  %v1740_v29 = vsel %vm1738_vm8, %v1739_v22, %v9672_v18  ;;  %vm3282_vm8 = vcmp.lt.s32.totalorder %v3281_v39, 2  ;;  %v3134_v43 = vsel %vm3132_vm9, %v10529_v37, %v10526_v11 }
 0x2cf   : > { %vm3591_vm9 = vcmp.eq.s32.totalorder %v3589_v23, 0  ;;  %v10546_v11 = vxor.u32 2147483648, %v10545_v33 }
 0x2d0   : > { %v1737_v47 = vsel %vm1735_vm0, %v9668_v32, %v1736_v0  ;;  %vm3283_vm0 = vcmp.eq.s32.totalorder %v3281_v39, 0 }
 0x2d1   : > { %v1741_v20 = vsel %vm1734_vm6, %v1737_v47, %v1740_v29  ;;  %vm3286_vm6 = vcmp.eq.s32.totalorder %v3281_v39, 2  ;;  %v10530_v29 = vld [vmem:[#allocation15_spill] sm:$0xff]  ;;  %v10532_v47 = vld [vmem:[#allocation14_spill] sm:$0xff]  ;;  %v3593_v24 = vsel %vm3591_vm9, %v10547_v51, %v10546_v11 }
 0x2d2   : > { %v1742_v46 = vsel %vm1731_vm7, nan, %v1741_v20  ;;  %v10531_v53 = vxor.u32 2147483648, %v10530_v29 }
 0x2d3   : > { %5715 = vmatpush.msrb.mxu3 %v1742_v46  ;;  %v10533_v46 = vxor.u32 2147483648, %v10532_v47 }
 0x2d4   : > { %7134 = vmatmul.msk.f32.vlgmr.msrb.gmra.mxu3 %vm10514_vm14, %v10502_v41  ;;  %v9718_v41 = vld [vmem:[%s10364_s2 + $0x10] sm:$0xff]  ;;  %v3285_v20 = vsel %vm3283_vm0, %v10532_v47, %v10531_v53  ;;  %vm3436_vm14 = vcmp.lt.s32.totalorder %v3435_v25, 2  ;;  %vm10542_vm0 = vcmask 97280   ;;  %v9848_v47 = vpop.permute.xlu2 %6007 }
 0x2d5   : > { %7149 = vmatmul.msk.f32.vlgmr.msra.gmra.mxu2 %vm5748_vm2, %v9686_v63  ;;  %7153 = vmatpush.msk.msra.mxu3 %vm476_vm1, %v5743_v35  ;;  %v3288_v35 = vsel %vm3286_vm6, %v10533_v46, %v10530_v29  ;;  %vm10544_vm6 = vweird.f32 %v10543_v6  ;;  %v10550_v29 = vld [vmem:[#allocation12_spill] sm:$0xff]  ;;  %vm10556_vm9 = vmmov %vm10542_vm0 }
 0x2d6   : > { %7141 = vmatmul.msk.f32.gmra.mxu0 %vm5748_vm2, %v9718_v41  ;;  %7146 = vmatmul.msk.f32.gmra.mxu1 %vm5748_vm2, %v9718_v41 }
 0x2d7   : > { %7173 = vmatpush.msk.msrb.mxu3 %vm476_vm1, %v5747_v27  ;;  %7188 = vmatpush.msk.msra.mxu2 %vm5472_vm13, %v10518_v14  ;;  %v10534_v27 = vld [vmem:[#allocation3_spill] sm:$0xff] }
 0x2dc   : > { %7135 = vmatmul.msk.f32.gmra.mxu3 %vm10515_vm5, %v8642_v2  ;;  %v9731_v2 = vld [vmem:[%s10364_s2 + $0x18] sm:$0xff]  ;;  %vm10535_vm5 = vweird.f32 %v10534_v27  ;;  %v9894_v27 = vpop.permute.xlu1 %6011 }
 0x2dd   : > { %7150 = vmatmul.msk.f32.gmra.mxu2 %vm5748_vm2, %v9705_v45 }
 0x2de   : > { %7142 = vmatmul.msk.f32.gmra.mxu0 %vm5748_vm2, %v9731_v2  ;;  %7147 = vmatmul.msk.f32.gmra.mxu1 %vm5748_vm2, %v9731_v2 }
 0x2e4   : > { %7136 = vmatmul.msk.f32.gmra.mxu3 %vm10516_vm12, %v8673_v10  ;;  %v5744_v10 = vld.sshfl [vmem:[#allocation1 + $0x20] sm:$0xff pattern:$0x75316420]  ;;  %vm3437_vm12 = vcmp.eq.s32.totalorder %v3435_v25, 0 }
 0x2e5   : > { %7151 = vmatmul.msk.f32.gmra.mxu2 %vm5748_vm2, %v9718_v41  ;;  %7158 = vmatpush.msk.msrb.mxu0 %vm476_vm1, %v5744_v10  ;;  %vm3128_vm1 = vcmp.lt.s32.totalorder %v3127_v8, 2  ;;  %v3289_v10 = vsel %vm3282_vm8, %v3285_v20, %v3288_v35  ;;  %vm3594_vm8 = vcmp.eq.s32.totalorder %v3589_v23, 2  ;;  %v6310_v20 = vld [vmem:[%s9877_s23 + $0x8] sm:$0xff] }
 0x2e6   : > { %7159 = vmatmul.msk.f32.vlgmr.msrb.gmra.mxu0 %vm5748_vm2, %v9686_v63  ;;  %7164 = vmatmul.msk.f32.vlgmr.msrb.gmra.mxu1 %vm5748_vm2, %v9686_v63  ;;  %v3135_v36 = vsel %vm3128_vm1, %v3131_v34, %v3134_v43  ;;  %v3290_v14 = vsel %vm10537_vm11, nan, %v3289_v10  ;;  %vm3590_vm1 = vcmp.lt.s32.totalorder %v3589_v23, 2  ;;  %v10548_v34 = vxor.u32 2147483648, %v10547_v51  ;;  %v9831_v23 = vpop.f32.mrf.mxu2  ;;  %vm10554_vm11 = vmmov %vm10542_vm0  ;;  %v6311_v10 = vld [vmem:[%s9877_s23 + $0x10] sm:$0xff] }
 0x2e7   : > { %v3136_v48 = vsel %vm10535_vm5, nan, %v3135_v36  ;;  %6089 = vmatpush.msra.mxu1 %v3290_v14  ;;  %v9835_v36 = vpop.f32.mrf.mxu1  ;;  %vm10551_vm5 = vweird.f32 %v10550_v29  ;;  %6320 = vperm.xlu1 %7297, %v6310_v20   ;;  %v3897_v14 = vand.u32 3, %v9495_v7  ;;  %v6403_v51 = vld [vmem:[%s10366_s4 + $0x10] sm:$0xff]  ;;  %v6703_v29 = vld [vmem:[%s10368_s6] sm:$0x7] }
 0x2e8   : > { %v3596_v37 = vsel %vm3594_vm8, %v10548_v34, %v10545_v33  ;;  %vm10557_vm8 = vmmov %vm10542_vm0  ;;  %6325 = vperm.xlu0 %7296, %v6311_v10  }
 0x2e9   : > { %v3597_v43 = vsel %vm3590_vm1, %v3593_v24, %v3596_v37  ;;  %7203 = vmatpush.msk.msrb.mxu1 %vm5472_vm13, %v9318_v31  ;;  %vm10555_vm1 = vmmov %vm10542_vm0 }
 0x2ea   : > { %v3598_v53 = vsel %vm10551_vm5, nan, %v3597_v43  ;;  %vm3744_vm5 = vcmp.lt.s32.totalorder %v3743_v56, 2 }
 0x2ec   : > { %7137 = vmatmul.msk.f32.gmra.mxu3 %vm10517_vm10, %v8712_v15  ;;  %v10519_v15 = vld [vmem:[#allocation2_spill] sm:$0xff]  ;;  %vm3440_vm10 = vcmp.eq.s32.totalorder %v3435_v25, 2 }
 0x2ed   : > { %7152 = vmatmul.msk.f32.gmra.mxu2 %vm5748_vm2, %v9731_v2  ;;  %7178 = vmatpush.msk.msra.mxu0 %vm5472_vm13, %v10519_v15  ;;  %v10538_v15 = vld [vmem:[#allocation18_spill] sm:$0xff] }
 0x2ee   : > { %7160 = vmatmul.msk.f32.gmra.mxu0 %vm5748_vm2, %v9705_v45  ;;  %7165 = vmatmul.msk.f32.gmra.mxu1 %vm5748_vm2, %v9705_v45  ;;  %v10539_v42 = vxor.u32 2147483648, %v10538_v15 }
 0x2ef   : > { %6060 = vmatpush.msra.mxu0 %v3136_v48  ;;  %v9865_v31 = vpop.f32.mrf.mxu1  ;;  %v6312_v48 = vld [vmem:[%s9877_s23 + $0x18] sm:$0xff] }
 0x2f0   : > { %6330 = vperm.xlu2 %7295, %v6312_v48  }
 0x2f1   : > { %7198 = vmatpush.msk.msrb.mxu0 %vm5472_vm13, %v9198_v54  ;;  %v9861_v54 = vpop.f32.mrf.mxu2 }
 0x2f4   : > { %7154 = vmatmul.msk.f32.vlgmr.msra.gmra.mxu3 %vm5748_vm2, %v9686_v63 }
 0x2f5   : > { %7169 = vmatmul.msk.f32.vlgmr.msrb.gmra.mxu2 %vm5748_vm2, %v9686_v63  ;;  %7193 = vmatpush.msk.msra.mxu3 %vm5472_vm13, %v10521_v28  ;;  %v10540_v28 = vld [vmem:[#allocation17_spill] sm:$0xff] }
 0x2f6   : > { %7161 = vmatmul.msk.f32.gmra.mxu0 %vm5748_vm2, %v9718_v41  ;;  %7166 = vmatmul.msk.f32.gmra.mxu1 %vm5748_vm2, %v9718_v41  ;;  %v3439_v59 = vsel %vm3437_vm12, %v10540_v28, %v10539_v42  ;;  %v10541_v8 = vxor.u32 2147483648, %v10540_v28  ;;  %vm10552_vm12 = vmmov %vm10542_vm0 }
 0x2f7   : > { %6147 = vmatpush.msra.mxu3 %v3598_v53  ;;  %v9890_v35 = vpop.f32.mrf.mxu1 }
 0x2f8   : > { %v3442_v1 = vsel %vm3440_vm10, %v10541_v8, %v10538_v15  ;;  %vm10553_vm10 = vmmov %vm10542_vm0  ;;  %v4051_v15 = vand.u32 3, %v9635_v30 }
 0x2f9   : > { %v3443_v39 = vsel %vm3436_vm14, %v3439_v59, %v3442_v1  ;;  %vm10549_vm14 = vmmov %vm10542_vm0 }
 0x2fa   : > { %v3444_v25 = vsel %vm10544_vm6, nan, %v3443_v39  ;;  %vm10558_vm6 = vmmov %vm10542_vm0  ;;  %v6401_v39 = vld [vmem:[%s10366_s4] sm:$0xff] }
 0x2fb   : > { %6118 = vmatpush.msra.mxu2 %v3444_v25 }
 0x2fc   : > { %7155 = vmatmul.msk.f32.gmra.mxu3 %vm5748_vm2, %v9705_v45 }
 0x2fd   : > { %7170 = vmatmul.msk.f32.gmra.mxu2 %vm5748_vm2, %v9705_v45 }
 0x2fe   : > { %7162 = vmatmul.msk.f32.gmra.mxu0 %vm5748_vm2, %v9731_v2  ;;  %7167 = vmatmul.msk.f32.gmra.mxu1 %vm5748_vm2, %v9731_v2 }
 0x2ff   : > { %7208 = vmatpush.msk.msrb.mxu2 %vm5472_vm13, %v9057_v21 }
 0x304   : > { %7156 = vmatmul.msk.f32.gmra.mxu3 %vm5748_vm2, %v9718_v41 }
 0x305   : > { %7171 = vmatmul.msk.f32.gmra.mxu2 %vm5748_vm2, %v9718_v41 }
 0x306   : > { %7179 = vmatmul.msk.f32.vlgmr.msra.gmra.mxu0 %vm10542_vm0, %v9793_v3  ;;  %7184 = vmatmul.msk.f32.vlgmr.msra.gmra.mxu1 %vm10549_vm14, %v9793_v3  ;;  %vm10559_vm14 = vmmov %vm10542_vm0 }
 0x308   : > { %v9911_v28 = vpop.f32.mrf.mxu1 }
 0x30c   : > { %7157 = vmatmul.msk.f32.gmra.mxu3 %vm5748_vm2, %v9731_v2 }
 0x30d   : > { %7172 = vmatmul.msk.f32.gmra.mxu2 %vm5748_vm2, %v9731_v2 }
 0x30e   : > { %7180 = vmatmul.msk.f32.gmra.mxu0 %vm10553_vm10, %v9848_v47  ;;  %7185 = vmatmul.msk.f32.gmra.mxu1 %vm10554_vm11, %v9848_v47  ;;  %vm3748_vm10 = vcmp.eq.s32.totalorder %v3743_v56, 2  ;;  %vm3898_vm11 = vcmp.lt.s32.totalorder %v3897_v14, 2 }
 0x30f   : > { %v3750_v30 = vsel %vm3748_vm10, %v1274_v44, %v9428_v52 }
 0x314   : > { %7174 = vmatmul.msk.f32.vlgmr.msrb.gmra.mxu3 %vm5748_vm2, %v9686_v63  ;;  %v9833_v63 = vpop.f32.mrf.mxu0 }
 0x315   : > { %7189 = vmatmul.msk.f32.vlgmr.msra.gmra.mxu2 %vm10552_vm12, %v9793_v3  ;;  %7213 = vmatpush.msk.msrb.mxu3 %vm5472_vm13, %v8916_v40  ;;  %v9870_v40 = vpop.permute.xlu0 %6009  ;;  %vm3745_vm12 = vcmp.eq.s32.totalorder %v3743_v56, 0 }
 0x316   : > { %7181 = vmatmul.msk.f32.gmra.mxu0 %vm10556_vm9, %v9870_v40  ;;  %7186 = vmatmul.msk.f32.gmra.mxu1 %vm10557_vm8, %v9870_v40  ;;  %v3747_v7 = vsel %vm3745_vm12, %v9423_v16, %v1271_v50  ;;  %vm3902_vm9 = vcmp.eq.s32.totalorder %v3897_v14, 2  ;;  %vm4052_vm8 = vcmp.lt.s32.totalorder %v4051_v15, 2 }
 0x317   : > { %v3904_v8 = vsel %vm3902_vm9, %v1429_v60, %v9589_v62 }
 0x31c   : > { %7175 = vmatmul.msk.f32.gmra.mxu3 %vm5748_vm2, %v9705_v45  ;;  %v9863_v21 = vpop.f32.mrf.mxu0  ;;  %v9885_v45 = vpop.f32.mrf.mxu2 }
 0x31d   : > { %7190 = vmatmul.msk.f32.gmra.mxu2 %vm10555_vm1, %v9848_v47  ;;  %vm3899_vm1 = vcmp.eq.s32.totalorder %v3897_v14, 0 }
 0x31e   : > { %7182 = vmatmul.msk.f32.gmra.mxu0 %vm10558_vm6, %v9894_v27  ;;  %7187 = vmatmul.msk.f32.gmra.mxu1 %vm10559_vm14, %v9894_v27  ;;  %v3901_v59 = vsel %vm3899_vm1, %v9581_v5, %v1426_v26  ;;  %vm4056_vm6 = vcmp.eq.s32.totalorder %v4051_v15, 2 }
 0x31f   : > { %v3905_v50 = vsel %vm3898_vm11, %v3901_v59, %v3904_v8  ;;  %v4058_v44 = vsel %vm4056_vm6, %v1584_v61, %v9642_v12  ;;  %v9962_v12 = vpop.f32.mrf.mxu1  ;;  %v6309_v61 = vld [vmem:[%s9877_s23] sm:$0xff] }
 0x320   : > { %v3906_v16 = vsel %vm1421_vm3, nan, %v3905_v50  ;;  %6315 = vperm.xlu2 %7295, %v6309_v61  }
 0x321   : > { %6205 = vmatpush.msrb.mxu1 %v3906_v16 }
 0x324   : > { %7176 = vmatmul.msk.f32.gmra.mxu3 %vm5748_vm2, %v9718_v41  ;;  %v9888_v46 = vpop.f32.mrf.mxu0  ;;  %v9902_v41 = vpop.f32.mrf.mxu2 }
 0x325   : > { %7191 = vmatmul.msk.f32.gmra.mxu2 %vm10542_vm0, %v9870_v40 }
 0x328   : > { %6417 = vperm.xlu2 %7295, %v6403_v51  }
 0x32c   : > { %7177 = vmatmul.msk.f32.gmra.mxu3 %vm5748_vm2, %v9731_v2  ;;  %v9909_v42 = vpop.f32.mrf.mxu0  ;;  %v4205_v2 = vand.u32 3, %v9663_v19  ;;  %vm10560_vm2 = vmmov %vm10542_vm0  ;;  %v3751_v19 = vsel %vm3744_vm5, %v3747_v7, %v3750_v30  ;;  %vm4053_vm0 = vcmp.eq.s32.totalorder %v4051_v15, 0  ;;  %vm10561_vm5 = vcmask 97280  }
 0x32d   : > { %7192 = vmatmul.msk.f32.gmra.mxu2 %vm10560_vm2, %v9894_v27  ;;  %v3752_v1 = vsel %vm1266_vm15, nan, %v3751_v19  ;;  %v4055_v52 = vsel %vm4053_vm0, %v9640_v17, %v1581_v55  ;;  %vm10562_vm12 = vmmov %vm10561_vm5  ;;  %v9965_v55 = vpop.f32.mrf.mxu3 }
 0x32e   : > { %6176 = vmatpush.msrb.mxu0 %v3752_v1  ;;  %vm4206_vm14 = vcmp.lt.s32.totalorder %v4205_v2, 2  ;;  %v4059_v5 = vsel %vm4052_vm8, %v4055_v52, %v4058_v44  ;;  %vm4207_vm2 = vcmp.eq.s32.totalorder %v4205_v2, 0  ;;  %vm4210_vm15 = vcmp.eq.s32.totalorder %v4205_v2, 2  ;;  %vm10563_vm3 = vmmov %vm10561_vm5  ;;  %10565 = vst [vmem:[#allocation19_spill] sm:$0xff] %v9965_v55 }
 0x32f   : > { %7199 = vmatmul.msk.f32.vlgmr.msrb.gmra.mxu0 %vm10561_vm5, %v9793_v3  ;;  %v4060_v4 = vsel %vm1576_vm4, nan, %v4059_v5  ;;  %v4209_v49 = vsel %vm4207_vm2, %v9668_v32, %v1736_v0  ;;  %v4212_v62 = vsel %vm4210_vm15, %v1739_v22, %v9672_v18  ;;  %7204 = vmatmul.msk.f32.vlgmr.msrb.gmra.mxu1 %vm10563_vm3, %v9793_v3  ;;  %vm10564_vm4 = vmmov %vm10563_vm3  ;;  %v6404_v32 = vld [vmem:[%s10366_s4 + $0x18] sm:$0xff]  ;;  %v9982_v22 = vpop.f32.mrf.mxu1  ;;  %v6402_v0 = vld [vmem:[%s10366_s4 + $0x8] sm:$0xff] }
 0x330   : > { %6234 = vmatpush.msrb.mxu2 %v4060_v4  ;;  %v4213_v60 = vsel %vm4206_vm14, %v4209_v49, %v4212_v62  ;;  %vm10566_vm10 = vmmov %vm10563_vm3  ;;  %6422 = vperm.xlu1 %7297, %v6404_v32  }
 0x331   : > { %v4214_v17 = vsel %vm1731_vm7, nan, %v4213_v60  ;;  %vm10567_vm7 = vmmov %vm10563_vm3  ;;  %6412 = vperm.xlu0 %7296, %v6402_v0   ;;  %6706 = vperm.xlu2 %7295, %v6703_v29  }
 0x332   : > { %6263 = vmatpush.msrb.mxu3 %v4214_v17  ;;  %vm10568_vm11 = vmmov %vm10563_vm3 }
 0x333   : > { %vm10570_vm1 = vmmov %vm10563_vm3 }
 0x334   : > { %7194 = vmatmul.msk.f32.vlgmr.msra.gmra.mxu3 %vm10562_vm12, %v9793_v3  ;;  %v9960_v58 = vpop.f32.mrf.mxu0  ;;  %vm10572_vm9 = vmmov %vm10570_vm1 }
 0x335   : > { %7209 = vmatmul.msk.f32.vlgmr.msrb.gmra.mxu2 %vm10564_vm4, %v9793_v3  ;;  %v9990_v6 = vpop.f32.mrf.mxu3  ;;  %vm10573_vm8 = vmmov %vm10570_vm1 }
 0x336   : > { %10571 = vst [vmem:[#allocation2_spill] sm:$0xff] %v9990_v6  ;;  %vm10574_vm0 = vmmov %vm10570_vm1 }
 0x337   : > { %7200 = vmatmul.msk.f32.gmra.mxu0 %vm10566_vm10, %v9848_v47  ;;  %7205 = vmatmul.msk.f32.gmra.mxu1 %vm10568_vm11, %v9848_v47  ;;  %vm10576_vm6 = vmmov %vm10574_vm0  ;;  %v10004_v11 = vpop.f32.mrf.mxu1 }
 0x338   : > { %v9954_v26 = vpop.f32.mrf.mxu2  ;;  %6407 = vperm.xlu1 %7297, %v6401_v39   ;;  %vm10577_vm14 = vmmov %vm10574_vm0 }
 0x339   : > { %vm10578_vm2 = vmmov %vm10574_vm0 }
 0x33a   : > { %vm10579_vm15 = vmmov %vm10574_vm0 }
 0x33b   : > { %vm10582_vm5 = vmmov %vm10574_vm0 }
 0x33c   : > { %7195 = vmatmul.msk.f32.gmra.mxu3 %vm10567_vm7, %v9848_v47  ;;  %v9980_v18 = vpop.f32.mrf.mxu0  ;;  %vm10583_vm12 = vmmov %vm10574_vm0  ;;  %vm6425_vm7 = vcmask 261120  }
 0x33d   : > { %7210 = vmatmul.msk.f32.gmra.mxu2 %vm10570_vm1, %v9848_v47  ;;  %v10015_v24 = vpop.f32.mrf.mxu3  ;;  %vm10585_vm3 = vmmov %vm10574_vm0 }
 0x33e   : > { %10580 = vst [vmem:[#allocation8_spill] sm:$0xff] %v10015_v24  ;;  %vm10587_vm4 = vmmov %vm10574_vm0 }
 0x33f   : > { %7201 = vmatmul.msk.f32.gmra.mxu0 %vm10572_vm9, %v9870_v40  ;;  %7206 = vmatmul.msk.f32.gmra.mxu1 %vm10574_vm0, %v9870_v40  ;;  %v10021_v43 = vpop.f32.mrf.mxu1  ;;  %vm10589_vm10 = vmmov %vm10574_vm0 }
 0x340   : > { %v9976_v9 = vpop.f32.mrf.mxu2 }
 0x341   : > { %10569 = vst [vmem:[#allocation5_spill] sm:$0xff] %v9976_v9 }
 0x344   : > { %7196 = vmatmul.msk.f32.gmra.mxu3 %vm10573_vm8, %v9870_v40  ;;  %v10002_v33 = vpop.f32.mrf.mxu0 }
 0x345   : > { %7211 = vmatmul.msk.f32.gmra.mxu2 %vm10576_vm6, %v9870_v40 }
 0x347   : > { %7202 = vmatmul.msk.f32.gmra.mxu0 %vm10577_vm14, %v9894_v27  ;;  %7207 = vmatmul.msk.f32.gmra.mxu1 %vm10579_vm15, %v9894_v27  ;;  %v5822_v10 = vpop.f32.mrf.mxu1 }
 0x348   : > { %v9998_v25 = vpop.f32.mrf.mxu2 }
 0x349   : > { %10575 = vst [vmem:[#allocation4_spill] sm:$0xff] %v9998_v25 }
 0x34a   : > { %v10084_v25 = vpop.permute.xlu2 %6330 }
 0x34c   : > { %7197 = vmatmul.msk.f32.gmra.mxu3 %vm10578_vm2, %v9894_v27  ;;  %v5790_v37 = vpop.f32.mrf.mxu0 }
 0x34d   : > { %7212 = vmatmul.msk.f32.gmra.mxu2 %vm10582_vm5, %v9894_v27 }
 0x350   : > { %v10017_v34 = vpop.f32.mrf.mxu2 }
 0x351   : > { %10581 = vst [vmem:[#allocation9_spill] sm:$0xff] %v10017_v34 }
 0x354   : > { %7214 = vmatmul.msk.f32.vlgmr.msrb.gmra.mxu3 %vm10583_vm12, %v9793_v3  ;;  %v5793_v48 = vpop.f32.mrf.mxu0  ;;  %v5825_v3 = vpop.f32.mrf.mxu1 }
 0x357   : > { %v10030_v20 = vpop.f32.mrf.mxu3 }
 0x358   : > { %v10028_v53 = vpop.f32.mrf.mxu2  ;;  %10584 = vst [vmem:[#allocation13_spill] sm:$0xff] %v10030_v20 }
 0x35c   : > { %7215 = vmatmul.msk.f32.gmra.mxu3 %vm10585_vm3, %v9848_v47  ;;  %v5796_v15 = vpop.f32.mrf.mxu0  ;;  %v5828_v19 = vpop.f32.mrf.mxu1 }
 0x35d   : > { %v5797_v24 = vadd.f32 %v5796_v15, %v9863_v21  ;;  %v5829_v55 = vadd.f32 %v5828_v19, %v9890_v35  ;;  %v5791_v21 = vadd.f32 %v5790_v37, %v9785_v38 }
 0x35f   : > { %v10036_v14 = vpop.f32.mrf.mxu3 }
 0x360   : > { %v10034_v56 = vpop.f32.mrf.mxu2  ;;  %10586 = vst [vmem:[#allocation16_spill] sm:$0xff] %v10036_v14 }
 0x364   : > { %7216 = vmatmul.msk.f32.gmra.mxu3 %vm10587_vm4, %v9870_v40  ;;  %v5799_v30 = vpop.f32.mrf.mxu0  ;;  %v10050_v1 = vpop.f32.mrf.mxu1 }
 0x367   : > { %v10040_v7 = vpop.f32.mrf.mxu3 }
 0x368   : > { %v5854_v2 = vpop.f32.mrf.mxu2  ;;  %10588 = vst [vmem:[#allocation20_spill] sm:$0xff] %v10040_v7 }
 0x36c   : > { %7217 = vmatmul.msk.f32.gmra.mxu3 %vm10589_vm10, %v9894_v27  ;;  %v10048_v8 = vpop.f32.mrf.mxu0  ;;  %v10058_v52 = vpop.f32.mrf.mxu1 }
 0x36f   : > { %v10046_v47 = vpop.f32.mrf.mxu3 }
 0x370   : > { %v10044_v59 = vpop.f32.mrf.mxu2  ;;  %10590 = vst [vmem:[#allocation11_spill] sm:$0xff] %v10046_v47 }
 0x374   : > { %v10056_v40 = vpop.f32.mrf.mxu0  ;;  %v10066_v4 = vpop.f32.mrf.mxu1 }
 0x377   : > { %v10054_v16 = vpop.f32.mrf.mxu3 }
 0x378   : > { %v10052_v50 = vpop.f32.mrf.mxu2 }
 0x379   : > { %10591 = vst [vmem:[#allocation10_spill] sm:$0xff] %v10052_v50 }
 0x37c   : > { %v10064_v27 = vpop.f32.mrf.mxu0  ;;  %v10074_v17 = vpop.f32.mrf.mxu1 }
 0x37f   : > { %v10062_v5 = vpop.f32.mrf.mxu3 }
 0x380   : > { %v10060_v44 = vpop.f32.mrf.mxu2  ;;  %10593 = vst [vmem:[#allocation14_spill] sm:$0xff] %v10062_v5  ;;  %v10092_v5 = vpop.permute.xlu0 %6325 }
 0x381   : > { %10592 = vst [vmem:[#allocation15_spill] sm:$0xff] %v10060_v44 }
 0x384   : > { %v10072_v60 = vpop.f32.mrf.mxu0  ;;  %v6091_v39 = vpop.f32.mrf.mxu1 }
 0x387   : > { %v10070_v62 = vpop.f32.mrf.mxu3 }
 0x388   : > { %v10068_v49 = vpop.f32.mrf.mxu2  ;;  %10595 = vst [vmem:[#allocation6_spill] sm:$0xff] %v10070_v62 }
 0x389   : > { %10594 = vst [vmem:[#allocation3_spill] sm:$0xff] %v10068_v49 }
 0x38c   : > { %v6062_v0 = vpop.f32.mrf.mxu0  ;;  %v6094_v47 = vpop.f32.mrf.mxu1 }
 0x38f   : > { %v10076_v61 = vpop.f32.mrf.mxu3 }
 0x390   : > { %10596 = vst [vmem:[#allocation18_spill] sm:$0xff] %v10076_v61  ;;  %v10078_v32 = vpop.f32.mrf.mxu2  ;;  %v5826_v61 = vadd.f32 %v5825_v3, %v9865_v31 }
 0x391   : > { %10597 = vst [vmem:[#allocation17_spill] sm:$0xff] %v10078_v32  ;;  %v5794_v32 = vadd.f32 %v5793_v48, %v9833_v63  ;;  %v5820_v63 = vadd.f32 %v10021_v43, %v9787_v57 }
 0x394   : > { %v6065_v20 = vpop.f32.mrf.mxu0  ;;  %v6097_v49 = vpop.f32.mrf.mxu1 }
 0x395   : > { %v6294_v44 = vadd.f32 %v6097_v49, %v5826_v61  ;;  %v6285_v15 = vadd.f32 %v6065_v20, %v5794_v32  ;;  %v5855_v20 = vadd.f32 %v5854_v2, %v9885_v45 }
 0x397   : > { %v10080_v51 = vpop.f32.mrf.mxu3  ;;  %v6350_v37 = vadd.f32 %v10092_v5, %v6294_v44 }
 0x398   : > { %10598 = vst [vmem:[#allocation7_spill] sm:$0xff] %v10080_v51  ;;  %v6120_v29 = vpop.f32.mrf.mxu2  ;;  %v5800_v51 = vadd.f32 %v5799_v30, %v9888_v46  ;;  %v10099_v46 = vpop.permute.xlu1 %6320 }
 0x399   : > { %v10103_v30 = vpop.permute.xlu2 %6315  ;;  %v6341_v57 = vadd.f32 %v10099_v46, %v6285_v15  ;;  %v6382_v61 = vmax.f32 %v6350_v37, 0.0 }
 0x39c   : > { %v6068_v34 = vpop.f32.mrf.mxu0  ;;  %v6100_v3 = vpop.f32.mrf.mxu1 }
 0x39d   : > { %v6293_v6 = vadd.f32 %v6068_v34, %v5797_v24  ;;  %v6302_v24 = vadd.f32 %v6100_v3, %v5829_v55  ;;  %v6277_v34 = vadd.f32 %v6062_v0, %v5791_v21  ;;  %v5852_v55 = vadd.f32 %v10034_v56, %v9861_v54 }
 0x39e   : > { %v5849_v56 = vadd.f32 %v10028_v53, %v9831_v23  ;;  %v10130_v53 = vld [vmem:[%s10365_s3] sm:$0xff] }
 0x39f   : > { %v10082_v14 = vpop.f32.mrf.mxu3  ;;  %v6349_v35 = vadd.f32 %v10092_v5, %v6293_v6  ;;  %v6358_v38 = vadd.f32 %v10084_v25, %v6302_v24  ;;  %v6333_v44 = vadd.f32 %v10103_v30, %v6277_v34 }
 0x3a0   : > { %10599 = vst [vmem:[#allocation22_spill] sm:$0xff] %v10082_v14  ;;  %v6123_v7 = vpop.f32.mrf.mxu2  ;;  %v5823_v14 = vadd.f32 %v5822_v10, %v9835_v36  ;;  %v6278_v10 = vadd.f32 %v6091_v39, %v5820_v63 }
 0x3a1   : > { %v6381_v49 = vmax.f32 %v6349_v35, 0.0  ;;  %v6287_v32 = vadd.f32 %v6123_v7, %v5852_v55  ;;  %v6365_v15 = vmax.f32 %v6333_v44, 0.0  ;;  %v10159_v55 = vld [vmem:[%s10365_s3 + $0x10] sm:$0xff] }
 0x3a2   : > { %v6286_v48 = vadd.f32 %v6094_v47, %v5823_v14  ;;  %v6390_v14 = vmax.f32 %v6358_v38, 0.0  ;;  %v5858_v47 = vadd.f32 %v10044_v59, %v9902_v41  ;;  %v6334_v54 = vadd.f32 %v10103_v30, %v6278_v10  ;;  %v10144_v10 = vld [vmem:[%s10365_s3 + $0x8] sm:$0xff] }
 0x3a3   : > { %v6373_v41 = vmax.f32 %v6341_v57, 0.0  ;;  %v6279_v59 = vadd.f32 %v6120_v29, %v5849_v56  ;;  %v6343_v3 = vadd.f32 %v10099_v46, %v6287_v32  ;;  %v5913_v57 = vadd.f32 %v10064_v27, %v9980_v18  ;;  %v10603_v32 = vld [vmem:[#allocation19_spill] sm:$0xff] }
 0x3a4   : > { %v6071_v50 = vpop.f32.mrf.mxu0  ;;  %v6342_v6 = vadd.f32 %v10099_v46, %v6286_v48  ;;  %6479 = vmatpush.msra.mxu1 %v6390_v14  ;;  %v5910_v14 = vadd.f32 %v10056_v40, %v9960_v58  ;;  %v5907_v18 = vadd.f32 %v10048_v8, %v9909_v42  ;;  %v5916_v27 = vadd.f32 %v10072_v60, %v10002_v33  ;;  %v10600_v8 = vld [vmem:[#allocation10_spill] sm:$0xff] }
 0x3a5   : > { %v6301_v31 = vadd.f32 %v6071_v50, %v5800_v51  ;;  %v6335_v29 = vadd.f32 %v10103_v30, %v6279_v59  ;;  %v6375_v34 = vmax.f32 %v6343_v3, 0.0  ;;  %v5939_v58 = vadd.f32 %v10058_v52, %v9962_v12  ;;  %v10602_v12 = vld [vmem:[#allocation15_spill] sm:$0xff]  ;;  %v10609_v3 = vld [vmem:[#allocation4_spill] sm:$0xff] }
 0x3a6   : > { %6480 = vmatpush.msra.mxu1 %v6382_v61  ;;  %v5878_v42 = vadd.f32 %v10054_v16, %v9916_v13  ;;  %v5936_v33 = vadd.f32 %v10050_v1, %v9911_v28  ;;  %v5965_v60 = vadd.f32 %v10600_v8, %v9954_v26  ;;  %v10606_v13 = vld [vmem:[#allocation6_spill] sm:$0xff] }
 0x3a7   : > { %v10088_v62 = vpop.f32.mrf.mxu3  ;;  %v6357_v36 = vadd.f32 %v10084_v25, %v6301_v31  ;;  %v6366_v31 = vmax.f32 %v6334_v54, 0.0  ;;  %v6367_v35 = vmax.f32 %v6335_v29, 0.0  ;;  %v10601_v54 = vld [vmem:[#allocation5_spill] sm:$0xff] }
 0x3a8   : > { %v6126_v9 = vpop.f32.mrf.mxu2  ;;  %v5968_v52 = vadd.f32 %v10602_v12, %v10601_v54 }
 0x3a9   : > { %v6389_v19 = vmax.f32 %v6357_v36, 0.0  ;;  %v6295_v50 = vadd.f32 %v6126_v9, %v5855_v20  ;;  %v6374_v9 = vmax.f32 %v6342_v6, 0.0  ;;  %v5942_v6 = vadd.f32 %v10066_v4, %v9982_v22 }
 0x3aa   : > { %v5945_v22 = vadd.f32 %v10074_v17, %v10004_v11 }
 0x3ab   : > { %6450 = vmatpush.msra.mxu0 %v6389_v19  ;;  %v6351_v51 = vadd.f32 %v10092_v5, %v6295_v50  ;;  %6481 = vmatpush.msra.mxu1 %v6374_v9  ;;  %v10605_v9 = vld [vmem:[#allocation2_spill] sm:$0xff] }
 0x3ac   : > { %v10117_v2 = vpop.f32.mrf.mxu0  ;;  %v10122_v39 = vpop.f32.mrf.mxu1  ;;  %v5884_v16 = vadd.f32 %v10606_v13, %v10605_v9 }
 0x3ad   : > { %6451 = vmatpush.msra.mxu0 %v6381_v49  ;;  %6482 = vmatpush.msra.mxu1 %v6366_v31  ;;  %v6383_v63 = vmax.f32 %v6351_v51, 0.0  ;;  %v6281_v11 = vadd.f32 %v10117_v2, %v5907_v18  ;;  %v6282_v26 = vadd.f32 %v10122_v39, %v5936_v33  ;;  %v10611_v39 = vld [vmem:[#allocation9_spill] sm:$0xff] }
 0x3ae   : > { %7222 = vmatmul.msk.f32.vlgmr.msra.gmra.mxu1 %vm6425_vm7, %v10130_v53 }
 0x3af   : > { %v10111_v43 = vpop.f32.mrf.mxu3  ;;  %6452 = vmatpush.msra.mxu0 %v6373_v41 }
 0x3b0   : > { %v6129_v45 = vpop.f32.mrf.mxu2 }
 0x3b1   : > { %v6303_v0 = vadd.f32 %v6129_v45, %v5858_v47  ;;  %6453 = vmatpush.msra.mxu0 %v6365_v15  ;;  %v10608_v15 = vld [vmem:[#allocation18_spill] sm:$0xff] }
 0x3b2   : > { %7218 = vmatmul.msk.f32.vlgmr.msra.gmra.mxu0 %vm6425_vm7, %v10130_v53 }
 0x3b3   : > { %v6359_v21 = vadd.f32 %v10084_v25, %v6303_v0  ;;  %v10604_v0 = vld [vmem:[#allocation14_spill] sm:$0xff] }
 0x3b4   : > { %v6181_v24 = vpop.f32.mrf.mxu0  ;;  %v6210_v36 = vpop.f32.mrf.mxu1  ;;  %v5881_v41 = vadd.f32 %v10604_v0, %v10603_v32 }
 0x3b5   : > { %v6391_v23 = vmax.f32 %v6359_v21, 0.0  ;;  %v6289_v40 = vadd.f32 %v6181_v24, %v5910_v14  ;;  %v6290_v17 = vadd.f32 %v6210_v36, %v5939_v58  ;;  %v10607_v21 = vld [vmem:[#allocation8_spill] sm:$0xff]  ;;  %v10612_v36 = vld [vmem:[#allocation17_spill] sm:$0xff]  ;;  %v6338_v58 = vadd.f32 %v10103_v30, %v6282_v26 }
 0x3b6   : > { %7223 = vmatmul.msk.f32.gmra.mxu1 %vm6425_vm7, %v10144_v10  ;;  %v5887_v31 = vadd.f32 %v10608_v15, %v10607_v21  ;;  %v10616_v21 = vld [vmem:[#allocation11_spill] sm:$0xff] }
 0x3b7   : > { %v10132_v7 = vpop.f32.mrf.mxu3  ;;  %6508 = vmatpush.msra.mxu2 %v6391_v23  ;;  %v6345_v59 = vadd.f32 %v10099_v46, %v6289_v40  ;;  %v10610_v23 = vld [vmem:[#allocation3_spill] sm:$0xff]  ;;  %v6003_v15 = vadd.f32 %v10111_v43, %v10616_v21 }
 0x3b8   : > { %v10139_v48 = vpop.f32.mrf.mxu2  ;;  %v5971_v29 = vadd.f32 %v10610_v23, %v10609_v3  ;;  %v10617_v23 = vld [vmem:[#allocation13_spill] sm:$0xff] }
 0x3b9   : > { %6509 = vmatpush.msra.mxu2 %v6383_v63 }
 0x3ba   : > { %7219 = vmatmul.msk.f32.gmra.mxu0 %vm6425_vm7, %v10144_v10 }
 0x3bb   : > { %6510 = vmatpush.msra.mxu2 %v6375_v34  ;;  %v10205_v34 = vld [vmem:[%s10365_s3 + $0x18] sm:$0xff] }
 0x3bc   : > { %v6184_v20 = vpop.f32.mrf.mxu0  ;;  %v6213_v19 = vpop.f32.mrf.mxu1 }
 0x3bd   : > { %6511 = vmatpush.msra.mxu2 %v6367_v35  ;;  %v6297_v50 = vadd.f32 %v6184_v20, %v5913_v57  ;;  %v6298_v4 = vadd.f32 %v6213_v19, %v5942_v6  ;;  %v5974_v35 = vadd.f32 %v10612_v36, %v10611_v39  ;;  %v6337_v19 = vadd.f32 %v10103_v30, %v6281_v11 }
 0x3be   : > { %7226 = vmatmul.msk.f32.vlgmr.msra.gmra.mxu2 %vm6425_vm7, %v10130_v53  ;;  %7224 = vmatmul.msk.f32.gmra.mxu1 %vm6425_vm7, %v10159_v55  ;;  %v6346_v57 = vadd.f32 %v10099_v46, %v6290_v17  ;;  %v6370_v11 = vmax.f32 %v6338_v58, 0.0 }
 0x3bf   : > { %v6152_v38 = vpop.f32.mrf.mxu3  ;;  %v6353_v28 = vadd.f32 %v10092_v5, %v6297_v50  ;;  %v6354_v51 = vadd.f32 %v10092_v5, %v6298_v4  ;;  %v6280_v50 = vadd.f32 %v10132_v7, %v5878_v42 }
 0x3c0   : > { %v10152_v37 = vpop.f32.mrf.mxu2  ;;  %v6288_v6 = vadd.f32 %v6152_v38, %v5881_v41 }
 0x3c1   : > { %v6385_v18 = vmax.f32 %v6353_v28, 0.0  ;;  %v6386_v40 = vmax.f32 %v6354_v51, 0.0  ;;  %v6291_v38 = vadd.f32 %v10152_v37, %v5968_v52  ;;  %v6336_v17 = vadd.f32 %v10103_v30, %v6280_v50  ;;  %v10615_v51 = vld [vmem:[#allocation22_spill] sm:$0xff]  ;;  %v10283_v50 = vpop.permute.xlu1 %6422 }
 0x3c2   : > { %7220 = vmatmul.msk.f32.gmra.mxu0 %vm6425_vm7, %v10159_v55  ;;  %v6344_v7 = vadd.f32 %v10099_v46, %v6288_v6 }
 0x3c3   : > { %v6347_v52 = vadd.f32 %v10099_v46, %v6291_v38  ;;  %v6368_v41 = vmax.f32 %v6336_v17, 0.0 }
 0x3c4   : > { %v6187_v44 = vpop.f32.mrf.mxu0  ;;  %v6216_v61 = vpop.f32.mrf.mxu1 }
 0x3c5   : > { %v6305_v45 = vadd.f32 %v6187_v44, %v5916_v27  ;;  %v6306_v56 = vadd.f32 %v6216_v61, %v5945_v22  ;;  %v6377_v22 = vmax.f32 %v6345_v59, 0.0  ;;  %v6378_v61 = vmax.f32 %v6346_v57, 0.0  ;;  %v10614_v59 = vld [vmem:[#allocation16_spill] sm:$0xff] }
 0x3c6   : > { %7227 = vmatmul.msk.f32.gmra.mxu2 %vm6425_vm7, %v10144_v10  ;;  %7225 = vmatmul.msk.f32.gmra.mxu1 %vm6425_vm7, %v10205_v34  ;;  %v6379_v9 = vmax.f32 %v6347_v52, 0.0 }
 0x3c7   : > { %v6155_v47 = vpop.f32.mrf.mxu3  ;;  %v6361_v1 = vadd.f32 %v10084_v25, %v6305_v45  ;;  %v6362_v2 = vadd.f32 %v10084_v25, %v6306_v56  ;;  %v6283_v45 = vadd.f32 %v10139_v48, %v5965_v60  ;;  %v6376_v60 = vmax.f32 %v6344_v7, 0.0 }
 0x3c8   : > { %v6242_v49 = vpop.f32.mrf.mxu2  ;;  %v6296_v63 = vadd.f32 %v6155_v47, %v5884_v16 }
 0x3c9   : > { %v6393_v24 = vmax.f32 %v6361_v1, 0.0  ;;  %v6394_v14 = vmax.f32 %v6362_v2, 0.0  ;;  %v6299_v27 = vadd.f32 %v6242_v49, %v5971_v29  ;;  %v6369_v49 = vmax.f32 %v6337_v19, 0.0  ;;  %v10613_v1 = vld [vmem:[#allocation20_spill] sm:$0xff]  ;;  %v10618_v29 = vld [vmem:[#allocation7_spill] sm:$0xff] }
 0x3ca   : > { %7221 = vmatmul.msk.f32.gmra.mxu0 %vm6425_vm7, %v10205_v34  ;;  %v6352_v44 = vadd.f32 %v10092_v5, %v6296_v63  ;;  %v6339_v32 = vadd.f32 %v10103_v30, %v6283_v45  ;;  %v6000_v26 = vadd.f32 %v10088_v62, %v10613_v1  ;;  %v5997_v2 = vadd.f32 %v10615_v51, %v10614_v59 }
 0x3cb   : > { %6566 = vmatpush.msrb.mxu0 %v6393_v24  ;;  %6595 = vmatpush.msrb.mxu1 %v6394_v14  ;;  %v6355_v54 = vadd.f32 %v10092_v5, %v6299_v27  ;;  %v5994_v63 = vadd.f32 %v10618_v29, %v10617_v23 }
 0x3cc   : > { %v6384_v37 = vmax.f32 %v6352_v44, 0.0  ;;  %v6371_v13 = vmax.f32 %v6339_v32, 0.0 }
 0x3cd   : > { %6567 = vmatpush.msrb.mxu0 %v6385_v18  ;;  %6596 = vmatpush.msrb.mxu1 %v6386_v40  ;;  %v6387_v0 = vmax.f32 %v6355_v54, 0.0 }
 0x3ce   : > { %7228 = vmatmul.msk.f32.gmra.mxu2 %vm6425_vm7, %v10159_v55 }
 0x3cf   : > { %v6158_v20 = vpop.f32.mrf.mxu3  ;;  %6568 = vmatpush.msrb.mxu0 %v6377_v22  ;;  %6597 = vmatpush.msrb.mxu1 %v6378_v61 }
 0x3d0   : > { %v6304_v47 = vadd.f32 %v6158_v20, %v5887_v31  ;;  %v6245_v4 = vpop.f32.mrf.mxu2 }
 0x3d1   : > { %v6307_v8 = vadd.f32 %v6245_v4, %v5974_v35  ;;  %6569 = vmatpush.msrb.mxu0 %v6369_v49  ;;  %6598 = vmatpush.msrb.mxu1 %v6370_v11  ;;  %v10289_v4 = vpop.permute.xlu0 %6412 }
 0x3d2   : > { %v6360_v33 = vadd.f32 %v10084_v25, %v6304_v47  ;;  %7234 = vmatmul.msk.f32.vlgmr.msrb.gmra.mxu0 %vm6425_vm7, %v10130_v53  ;;  %7238 = vmatmul.msk.f32.vlgmr.msrb.gmra.mxu1 %vm6425_vm7, %v10130_v53 }
 0x3d3   : > { %v6363_v12 = vadd.f32 %v10084_v25, %v6307_v8  ;;  %v10294_v8 = vpop.permute.xlu1 %6407 }
 0x3d4   : > { %v6392_v42 = vmax.f32 %v6360_v33, 0.0 }
 0x3d5   : > { %v6395_v56 = vmax.f32 %v6363_v12, 0.0 }
 0x3d6   : > { %6537 = vmatpush.msra.mxu3 %v6392_v42  ;;  %7229 = vmatmul.msk.f32.gmra.mxu2 %vm6425_vm7, %v10205_v34 }
 0x3d7   : > { %v6265_v48 = vpop.f32.mrf.mxu3  ;;  %6624 = vmatpush.msrb.mxu2 %v6395_v56 }
 0x3d8   : > { %6538 = vmatpush.msra.mxu3 %v6384_v37  ;;  %v6284_v62 = vadd.f32 %v6265_v48, %v5994_v63 }
 0x3d9   : > { %6625 = vmatpush.msrb.mxu2 %v6387_v0 }
 0x3da   : > { %6539 = vmatpush.msra.mxu3 %v6376_v60  ;;  %7235 = vmatmul.msk.f32.gmra.mxu0 %vm6425_vm7, %v10144_v10  ;;  %v6340_v19 = vadd.f32 %v10103_v30, %v6284_v62  ;;  %v10302_v60 = vld [vmem:[%s10367_s5] sm:$0x7] }
 0x3db   : > { %6626 = vmatpush.msrb.mxu2 %v6379_v9  ;;  %7239 = vmatmul.msk.f32.gmra.mxu1 %vm6425_vm7, %v10144_v10 }
 0x3dc   : > { %6540 = vmatpush.msra.mxu3 %v6368_v41  ;;  %v6372_v6 = vmax.f32 %v6340_v19, 0.0 }
 0x3dd   : > { %7230 = vmatmul.msk.f32.vlgmr.msra.gmra.mxu3 %vm6425_vm7, %v10130_v53  ;;  %6627 = vmatpush.msrb.mxu2 %v6371_v13 }
 0x3de   : > { %7242 = vmatmul.msk.f32.vlgmr.msrb.gmra.mxu2 %vm6425_vm7, %v10130_v53 }
 0x3df   : > { %v6268_v16 = vpop.f32.mrf.mxu3 }
 0x3e0   : > { %v6292_v24 = vadd.f32 %v6268_v16, %v5997_v2 }
 0x3e2   : > { %7236 = vmatmul.msk.f32.gmra.mxu0 %vm6425_vm7, %v10159_v55  ;;  %v6348_v35 = vadd.f32 %v10099_v46, %v6292_v24 }
 0x3e3   : > { %7240 = vmatmul.msk.f32.gmra.mxu1 %vm6425_vm7, %v10159_v55 }
 0x3e4   : > { %v6380_v14 = vmax.f32 %v6348_v35, 0.0 }
 0x3e5   : > { %7231 = vmatmul.msk.f32.gmra.mxu3 %vm6425_vm7, %v10144_v10 }
 0x3e6   : > { %7243 = vmatmul.msk.f32.gmra.mxu2 %vm6425_vm7, %v10144_v10 }
 0x3e7   : > { %v6271_v28 = vpop.f32.mrf.mxu3 }
 0x3e8   : > { %v6300_v31 = vadd.f32 %v6271_v28, %v6000_v26 }
 0x3ea   : > { %7237 = vmatmul.msk.f32.gmra.mxu0 %vm6425_vm7, %v10205_v34  ;;  %v6356_v36 = vadd.f32 %v10092_v5, %v6300_v31 }
 0x3eb   : > { %7241 = vmatmul.msk.f32.gmra.mxu1 %vm6425_vm7, %v10205_v34 }
 0x3ec   : > { %v6388_v57 = vmax.f32 %v6356_v36, 0.0 }
 0x3ed   : > { %7232 = vmatmul.msk.f32.gmra.mxu3 %vm6425_vm7, %v10159_v55 }
 0x3ee   : > { %7244 = vmatmul.msk.f32.gmra.mxu2 %vm6425_vm7, %v10159_v55 }
 0x3ef   : > { %v6274_v3 = vpop.f32.mrf.mxu3 }
 0x3f0   : > { %v6308_v39 = vadd.f32 %v6274_v3, %v6003_v15 }
 0x3f2   : > { %v6364_v43 = vadd.f32 %v10084_v25, %v6308_v39 }
 0x3f4   : > { %v6396_v20 = vmax.f32 %v6364_v43, 0.0 }
 0x3f5   : > { %7233 = vmatmul.msk.f32.gmra.mxu3 %vm6425_vm7, %v10205_v34 }
 0x3f6   : > { %6653 = vmatpush.msrb.mxu3 %v6396_v20  ;;  %7245 = vmatmul.msk.f32.gmra.mxu2 %vm6425_vm7, %v10205_v34 }
 0x3f8   : > { %6654 = vmatpush.msrb.mxu3 %v6388_v57 }
 0x3fa   : > { %6655 = vmatpush.msrb.mxu3 %v6380_v14 }
 0x3fc   : > { %6656 = vmatpush.msrb.mxu3 %v6372_v6 }
 0x3fd   : > { %7246 = vmatmul.msk.f32.vlgmr.msrb.gmra.mxu3 %vm6425_vm7, %v10130_v53  ;;  %v10285_v53 = vpop.permute.xlu2 %6417 }
 0x405   : > { %7247 = vmatmul.msk.f32.gmra.mxu3 %vm6425_vm7, %v10144_v10 }
 0x40d   : > { %7248 = vmatmul.msk.f32.gmra.mxu3 %vm6425_vm7, %v10159_v55 }
 0x415   : > { %7249 = vmatmul.msk.f32.gmra.mxu3 %vm6425_vm7, %v10205_v34 }
 0x42b   : > { %v6484_v5 = vpop.f32.mrf.mxu1 }
 0x42c   : > { %v6485_v42 = vadd.f32 %v6484_v5, %v10294_v8 }
 0x42e   : > { %v6671_v52 = vmax.f32 %v6485_v42, 0.0 }
 0x42f   : > { %v6455_v25 = vpop.f32.mrf.mxu0 }
 0x430   : > { %v6456_v61 = vadd.f32 %v6455_v25, %v10294_v8 }
 0x432   : > { %v6670_v37 = vmax.f32 %v6456_v61, 0.0 }
 0x433   : > { %v6487_v30 = vpop.f32.mrf.mxu1 }
 0x434   : > { %v6488_v49 = vadd.f32 %v6487_v30, %v10289_v4 }
 0x436   : > { %v6679_v17 = vmax.f32 %v6488_v49, 0.0 }
 0x437   : > { %v6458_v46 = vpop.f32.mrf.mxu0 }
 0x438   : > { %v6459_v33 = vadd.f32 %v6458_v46, %v10289_v4 }
 0x43a   : > { %v6678_v11 = vmax.f32 %v6459_v33, 0.0 }
 0x43b   : > { %v6490_v27 = vpop.f32.mrf.mxu1 }
 0x43c   : > { %v6491_v34 = vadd.f32 %v6490_v27, %v10285_v53 }
 0x43e   : > { %v6687_v54 = vmax.f32 %v6491_v34, 0.0 }
 0x43f   : > { %v6461_v18 = vpop.f32.mrf.mxu0 }
 0x440   : > { %v6462_v10 = vadd.f32 %v6461_v18, %v10285_v53 }
 0x441   : > { %v6513_v47 = vpop.f32.mrf.mxu2 }
 0x442   : > { %v6686_v7 = vmax.f32 %v6462_v10, 0.0  ;;  %v6514_v1 = vadd.f32 %v6513_v47, %v10294_v8 }
 0x443   : > { %v6493_v40 = vpop.f32.mrf.mxu1 }
 0x444   : > { %v6494_v44 = vadd.f32 %v6493_v40, %v10283_v50  ;;  %v6672_v21 = vmax.f32 %v6514_v1, 0.0 }
 0x446   : > { %v6695_v45 = vmax.f32 %v6494_v44, 0.0 }
 0x447   : > { %v6464_v22 = vpop.f32.mrf.mxu0 }
 0x448   : > { %v6465_v55 = vadd.f32 %v6464_v22, %v10283_v50  ;;  %6744 = vmatpush.msra.mxu1 %v6695_v45 }
 0x449   : > { %v6516_v58 = vpop.f32.mrf.mxu2 }
 0x44a   : > { %v6694_v38 = vmax.f32 %v6465_v55, 0.0  ;;  %6745 = vmatpush.msra.mxu1 %v6687_v54  ;;  %v6517_v9 = vadd.f32 %v6516_v58, %v10289_v4 }
 0x44c   : > { %6724 = vmatpush.msra.mxu0 %v6694_v38  ;;  %6746 = vmatpush.msra.mxu1 %v6679_v17  ;;  %v6680_v51 = vmax.f32 %v6517_v9, 0.0 }
 0x44e   : > { %6725 = vmatpush.msra.mxu0 %v6686_v7  ;;  %6747 = vmatpush.msra.mxu1 %v6671_v52 }
 0x44f   : > { %v6571_v56 = vpop.f32.mrf.mxu0  ;;  %v6600_v48 = vpop.f32.mrf.mxu1  ;;  %7251 = vmatmul.msk.f32.vlgmr.msra.gmra.mxu1 %vm6425_vm7, %v10302_v60 }
 0x450   : > { %6726 = vmatpush.msra.mxu0 %v6678_v11  ;;  %v6572_v6 = vadd.f32 %v6571_v56, %v10294_v8  ;;  %v6601_v25 = vadd.f32 %v6600_v48, %v10294_v8 }
 0x451   : > { %v6519_v12 = vpop.f32.mrf.mxu2 }
 0x452   : > { %6727 = vmatpush.msra.mxu0 %v6670_v37  ;;  %v6520_v0 = vadd.f32 %v6519_v12, %v10285_v53  ;;  %v6674_v18 = vmax.f32 %v6572_v6, 0.0  ;;  %v6675_v27 = vmax.f32 %v6601_v25, 0.0 }
 0x453   : > { %7250 = vmatmul.msk.f32.vlgmr.msra.gmra.mxu0 %vm6425_vm7, %v10302_v60 }
 0x454   : > { %v6688_v26 = vmax.f32 %v6520_v0, 0.0 }
 0x457   : > { %v6574_v16 = vpop.f32.mrf.mxu0 }
 0x458   : > { %v6603_v28 = vpop.f32.mrf.mxu1  ;;  %v6575_v35 = vadd.f32 %v6574_v16, %v10289_v4 }
 0x459   : > { %v6522_v32 = vpop.f32.mrf.mxu2  ;;  %v6604_v20 = vadd.f32 %v6603_v28, %v10289_v4 }
 0x45a   : > { %v6523_v41 = vadd.f32 %v6522_v32, %v10283_v50  ;;  %v6682_v30 = vmax.f32 %v6575_v35, 0.0 }
 0x45b   : > { %v6683_v47 = vmax.f32 %v6604_v20, 0.0 }
 0x45c   : > { %v6696_v13 = vmax.f32 %v6523_v41, 0.0 }
 0x45e   : > { %6764 = vmatpush.msra.mxu2 %v6696_v13 }
 0x45f   : > { %v6577_v15 = vpop.f32.mrf.mxu0 }
 0x460   : > { %v6542_v59 = vpop.f32.mrf.mxu3  ;;  %6765 = vmatpush.msra.mxu2 %v6688_v26  ;;  %v6606_v31 = vpop.f32.mrf.mxu1  ;;  %v6578_v24 = vadd.f32 %v6577_v15, %v10285_v53 }
 0x461   : > { %v6629_v2 = vpop.f32.mrf.mxu2  ;;  %v6607_v39 = vadd.f32 %v6606_v31, %v10285_v53  ;;  %v6543_v38 = vadd.f32 %v6542_v59, %v10294_v8  ;;  %v6707_v26 = vpop.permute.xlu2 %6706 }
 0x462   : > { %6766 = vmatpush.msra.mxu2 %v6680_v51  ;;  %v6690_v5 = vmax.f32 %v6578_v24, 0.0  ;;  %v6630_v42 = vadd.f32 %v6629_v2, %v10294_v8 }
 0x463   : > { %v6691_v46 = vmax.f32 %v6607_v39, 0.0  ;;  %v6673_v11 = vmax.f32 %v6543_v38, 0.0 }
 0x464   : > { %6767 = vmatpush.msra.mxu2 %v6672_v21  ;;  %v6676_v37 = vmax.f32 %v6630_v42, 0.0 }
 0x465   : > { %7252 = vmatmul.msk.f32.vlgmr.msra.gmra.mxu2 %vm6425_vm7, %v10302_v60 }
 0x467   : > { %v6580_v29 = vpop.f32.mrf.mxu0 }
 0x468   : > { %v6545_v3 = vpop.f32.mrf.mxu3  ;;  %v6609_v63 = vpop.f32.mrf.mxu1  ;;  %v6581_v62 = vadd.f32 %v6580_v29, %v10283_v50 }
 0x469   : > { %v6632_v23 = vpop.f32.mrf.mxu2  ;;  %v6610_v36 = vadd.f32 %v6609_v63, %v10283_v50  ;;  %v6546_v40 = vadd.f32 %v6545_v3, %v10289_v4 }
 0x46a   : > { %v6698_v19 = vmax.f32 %v6581_v62, 0.0  ;;  %v6633_v45 = vadd.f32 %v6632_v23, %v10289_v4 }
 0x46b   : > { %v6699_v57 = vmax.f32 %v6610_v36, 0.0  ;;  %v6681_v7 = vmax.f32 %v6546_v40, 0.0 }
 0x46c   : > { %6804 = vmatpush.msrb.mxu0 %v6698_v19  ;;  %v6684_v17 = vmax.f32 %v6633_v45, 0.0 }
 0x46d   : > { %6824 = vmatpush.msrb.mxu1 %v6699_v57 }
 0x46e   : > { %6805 = vmatpush.msrb.mxu0 %v6690_v5 }
 0x46f   : > { %6825 = vmatpush.msrb.mxu1 %v6691_v46 }
 0x470   : > { %v6548_v43 = vpop.f32.mrf.mxu3  ;;  %6806 = vmatpush.msrb.mxu0 %v6682_v30 }
 0x471   : > { %v6635_v14 = vpop.f32.mrf.mxu2  ;;  %6826 = vmatpush.msrb.mxu1 %v6683_v47  ;;  %v6549_v22 = vadd.f32 %v6548_v43, %v10285_v53 }
 0x472   : > { %6807 = vmatpush.msrb.mxu0 %v6674_v18  ;;  %v6636_v44 = vadd.f32 %v6635_v14, %v10285_v53 }
 0x473   : > { %6827 = vmatpush.msrb.mxu1 %v6675_v27  ;;  %7254 = vmatmul.msk.f32.vlgmr.msrb.gmra.mxu0 %vm6425_vm7, %v10302_v60  ;;  %v6689_v49 = vmax.f32 %v6549_v22, 0.0 }
 0x474   : > { %7255 = vmatmul.msk.f32.vlgmr.msrb.gmra.mxu1 %vm6425_vm7, %v10302_v60  ;;  %v6692_v54 = vmax.f32 %v6636_v44, 0.0 }
 0x478   : > { %v6551_v58 = vpop.f32.mrf.mxu3 }
 0x479   : > { %v6552_v10 = vadd.f32 %v6551_v58, %v10283_v50  ;;  %v6638_v55 = vpop.f32.mrf.mxu2 }
 0x47a   : > { %v6639_v33 = vadd.f32 %v6638_v55, %v10283_v50 }
 0x47b   : > { %v6697_v34 = vmax.f32 %v6552_v10, 0.0 }
 0x47c   : > { %v6700_v61 = vmax.f32 %v6639_v33, 0.0 }
 0x47d   : > { %6784 = vmatpush.msra.mxu3 %v6697_v34 }
 0x47e   : > { %6844 = vmatpush.msrb.mxu2 %v6700_v61 }
 0x47f   : > { %6785 = vmatpush.msra.mxu3 %v6689_v49 }
 0x480   : > { %v6658_v12 = vpop.f32.mrf.mxu3  ;;  %6845 = vmatpush.msrb.mxu2 %v6692_v54 }
 0x481   : > { %6786 = vmatpush.msra.mxu3 %v6681_v7  ;;  %v6659_v13 = vadd.f32 %v6658_v12, %v10294_v8 }
 0x482   : > { %6846 = vmatpush.msrb.mxu2 %v6684_v17 }
 0x483   : > { %6787 = vmatpush.msra.mxu3 %v6673_v11  ;;  %v6677_v1 = vmax.f32 %v6659_v13, 0.0 }
 0x484   : > { %7253 = vmatmul.msk.f32.vlgmr.msra.gmra.mxu3 %vm6425_vm7, %v10302_v60  ;;  %6847 = vmatpush.msrb.mxu2 %v6676_v37 }
 0x485   : > { %7256 = vmatmul.msk.f32.vlgmr.msrb.gmra.mxu2 %vm6425_vm7, %v10302_v60 }
 0x488   : > { %v6661_v52 = vpop.f32.mrf.mxu3 }
 0x489   : > { %v6662_v41 = vadd.f32 %v6661_v52, %v10289_v4 }
 0x48b   : > { %v6685_v28 = vmax.f32 %v6662_v41, 0.0 }
 0x490   : > { %v6664_v56 = vpop.f32.mrf.mxu3 }
 0x491   : > { %v6665_v32 = vadd.f32 %v6664_v56, %v10285_v53 }
 0x493   : > { %v6693_v16 = vmax.f32 %v6665_v32, 0.0 }
 0x498   : > { %v6667_v48 = vpop.f32.mrf.mxu3 }
 0x499   : > { %v6668_v0 = vadd.f32 %v6667_v48, %v10283_v50 }
 0x49b   : > { %v6701_v9 = vmax.f32 %v6668_v0, 0.0 }
 0x49d   : > { %6864 = vmatpush.msrb.mxu3 %v6701_v9 }
 0x49f   : > { %6865 = vmatpush.msrb.mxu3 %v6693_v16 }
 0x4a1   : > { %6866 = vmatpush.msrb.mxu3 %v6685_v28 }
 0x4a3   : > { %6867 = vmatpush.msrb.mxu3 %v6677_v1 }
 0x4a4   : > { %7257 = vmatmul.msk.f32.vlgmr.msrb.gmra.mxu3 %vm6425_vm7, %v10302_v60 }
 0x4cc   : > { %v6749_v59 = vpop.f32.mrf.mxu1 }
 0x4cd   : > { %v6750_v50 = vadd.f32 %v6749_v59, %v6707_v26 }
 0x4cf   : > { %v6880_v8 = vrot.slane %v6750_v50, 4 }
 0x4d0   : > { %v6729_v53 = vpop.f32.mrf.mxu0 }
 0x4d1   : > { %v6730_v4 = vadd.f32 %v6729_v53, %v6707_v26 }
 0x4d3   : > { %v6884_v51 = vsel %vm5472_vm13, %v6730_v4, %v6880_v8 }
 0x4d4   : > { %6892 = vst [vmem:[%s322_s9] sm:$0x77] %v6884_v51 }
 0x4e8   : > { %v6769_v23 = vpop.f32.mrf.mxu2 }
 0x4e9   : > { %v6770_v24 = vadd.f32 %v6769_v23, %v6707_v26 }
 0x4f0   : > { %v6809_v2 = vpop.f32.mrf.mxu0 }
 0x4f1   : > { %v6829_v21 = vpop.f32.mrf.mxu1  ;;  %v6810_v31 = vadd.f32 %v6809_v2, %v6707_v26 }
 0x4f2   : > { %v6830_v15 = vadd.f32 %v6829_v21, %v6707_v26 }
 0x4f4   : > { %v6882_v3 = vrot.slane %v6830_v15, 4 }
 0x4f6   : > { %v6886_v60 = vsel %vm5472_vm13, %v6810_v31, %v6882_v3 }
 0x4f7   : > { %6894 = vst [vmem:[%s322_s9 + $0x10] sm:$0x77] %v6886_v60 }
 0x507   : > { %v6789_v29 = vpop.f32.mrf.mxu3 }
 0x508   : > { %v6790_v63 = vadd.f32 %v6789_v29, %v6707_v26  ;;  %v6849_v36 = vpop.f32.mrf.mxu2 }
 0x509   : > { %v6850_v20 = vadd.f32 %v6849_v36, %v6707_v26 }
 0x50a   : > { %v6881_v39 = vrot.slane %v6790_v63, 4 }
 0x50c   : > { %v6885_v62 = vsel %vm5472_vm13, %v6770_v24, %v6881_v39 }
 0x50d   : > { %6893 = vst [vmem:[%s322_s9 + $0x8] sm:$0x77] %v6885_v62 }
 0x527   : > { %v6869_v43 = vpop.f32.mrf.mxu3 }
 0x528   : > { %v6870_v35 = vadd.f32 %v6869_v43, %v6707_v26 }
 0x52a   : > { %v6883_v19 = vrot.slane %v6870_v35, 4 }
 0x52c   : > { %v6887_v57 = vsel %vm5472_vm13, %v6850_v20, %v6883_v19 }
 0x52d   : > { %6895 = vst [vmem:[%s322_s9 + $0x18] sm:$0x77] %v6887_v57 }
 0x52e PF: > { %s17_s26 = sadd.s32 1, %s7328_s26   ;;  %s10619_s24 = smov %s7324_s25 }
 0x52f   : > { %p14_p5 = scmp.ge.s32.totalorder %s17_s26, 4   ;;  %s10620_s25 = smov %s10622_s27 }
 0x531   :  { %16 = sbr.rel (!%p14_p5) target bundleno = 2 (0x2), region = 96 }

</bundles_post_ra>
